<compile_context>
chip_gen: v7x
topology: tpu7x:2x2x1
jax: 0.10.0
libtpu: 0.0.40
codegen_flags: <defaults>
</compile_context>

<pallas_src>
import functools

import jax
import jax.numpy as jnp
from jax import lax
from jax.experimental import pallas as pl
from jax.experimental.pallas import tpu as pltpu

HIDDEN = 1024
_VMEM_LIMIT = 48 * 1024 * 1024     # fits v7x (64 MiB phys) and v5e/v6e (128 MiB)
_TAIL = 16                         # zero tail rows of the hidden band scratch


# ------------------------------ small helpers ------------------------------ #
def _round_up(x, m):
    return ((x + m - 1) // m) * m


def _choose_tile_p(P, preferred=1024):
    """Largest pixel tile <= preferred keeping >= 2 grid steps (both v7x TCs)."""
    tp = preferred
    while tp > 128 and _round_up(P, tp) // tp < 2:
        tp //= 2
    return tp


def _choose_band_rows(W2):
    """Even number of output rows per conv band; hidden band <= ~24 MiB."""
    R = 8
    while R > 2 and (R + 2) * W2 * HIDDEN * 2 > 24 * (1 << 20):
        R -= 2
    return R


def _silu(x):
    # SiLU via tanh: one EUP push per element (vs exp + reciprocal); f32 math
    # so it is also correct/fast on v5e (no bf16 EUP/VPU there).
    return 0.5 * x * (1.0 + jnp.tanh(0.5 * x))


# ------------------------------ Pallas kernels ----------------------------- #
def _pixel_fused_kernel(x_ref, w1_ref, b1_ref, w2_ref, b2_ref, o_ref):
    """Fused per-pixel MLP: (tp, C)@(C,1024) -> SiLU -> @(1024, Tpad) + bias.
    The (tp, 1024) hidden only lives in VMEM/vregs."""
    h = jnp.dot(x_ref[...], w1_ref[...], preferred_element_type=jnp.float32)
    h = _silu(h + b1_ref[...])
    y = jnp.dot(h.astype(w2_ref.dtype), w2_ref[...],
                preferred_element_type=jnp.float32)
    o_ref[...] = (y + b2_ref[...]).astype(o_ref.dtype)


def _conv_fused_kernel(colsA_ref, colsB_ref, w1_ref, b1_ref, w2_ref, b2_ref,
                       o_ref, hb_ref, *, R, W2, H, W, t_pad):
    """Fused 3x3 conv stack for one (image, row-band) grid step.

    colsA_ref : (R*W2, CK)   bf16  im2col(pad=2) rows of this band
    colsB_ref : (2*W2, CK)   bf16  two extra halo rows (start of next band)
    w1_ref    : (CK, 1024)   bf16
    b1_ref    : (1, 1024)    f32
    w2_ref    : (9, 1024, t_pad) bf16   tap = dh*3 + dw
    b2_ref    : (1, t_pad)   f32
    o_ref     : (R*W2, t_pad) f32  flat (row-major r, x) band output
    hb_ref    : ((R+2)*W2 + _TAIL, 1024) bf16 VMEM scratch (padded hidden band)
    """
    band0 = pl.program_id(1) * R          # first padded-hidden row of the band
    CH = 2 * W2                           # rows per chunk (multiple of 32)

    def hidden_chunk(cols_chunk, chunk_start):
        h = jnp.dot(cols_chunk, w1_ref[...], preferred_element_type=jnp.float32)
        h = _silu(h + b1_ref[...])
        # zero out layer-2 padding positions (rows/cols outside the valid image)
        i = chunk_start + lax.broadcasted_iota(jnp.int32, (CH, 1), 0)
        p = band0 + i // W2                # padded-hidden row index
        q = i % W2                         # padded-hidden col index
        valid = (p >= 1) & (p <= H) & (q >= 1) & (q <= W)
        h = jnp.where(valid, h, 0.0)
        hb_ref[pl.ds(chunk_start, CH), :] = h.astype(hb_ref.dtype)

    # ---- layer 1 + SiLU: fill the (R+2)*W2-row hidden band (VMEM only) ----
    for c in range(R // 2):
        hidden_chunk(colsA_ref[pl.ds(c * CH, CH), :], c * CH)
    hidden_chunk(colsB_ref[...], R * W2)
    hb_ref[pl.ds((R + 2) * W2, _TAIL), :] = jnp.zeros((_TAIL, HIDDEN),
                                                      hb_ref.dtype)

    # ---- layer 2: 3x3 conv as 9 accumulated matmuls per output-row pair ----
    # flat output index g = r*W2 + x ; tap (dh,dw) reads hb[g + dh*W2 + dw].
    for m in range(R // 2):
        base = m * CH
        acc = jnp.zeros((CH, t_pad), jnp.float32)
        for dh in range(3):
            for dw in range(3):
                off = base + dh * W2 + dw
                acc = acc + jnp.dot(hb_ref[pl.ds(off, CH), :],
                                    w2_ref[dh * 3 + dw],
                                    preferred_element_type=jnp.float32)
        o_ref[pl.ds(base, CH), :] = (acc + b2_ref[...]).astype(o_ref.dtype)


# ------------------------------- forward glue ------------------------------ #
def _pixel_forward(x_nchw, w1, b1, w2, b2, t_out):
    N, C, H, W = x_nchw.shape
    hid = w1.shape[1]
    t_pad = w2.shape[1]
    P = N * H * W
    rows = jnp.transpose(x_nchw, (0, 2, 3, 1)).reshape(P, C).astype(jnp.bfloat16)

    tp = _choose_tile_p(P)
    p_pad = _round_up(P, tp)
    if p_pad != P:
        rows = jnp.pad(rows, ((0, p_pad - P), (0, 0)))

    out = pl.pallas_call(
        _pixel_fused_kernel,
        out_shape=jax.ShapeDtypeStruct((p_pad, t_pad), jnp.float32),
        grid_spec=pltpu.PrefetchScalarGridSpec(
            num_scalar_prefetch=0,
            grid=(p_pad // tp,),
            in_specs=[
                pl.BlockSpec((tp, C), lambda i: (i, 0)),
                pl.BlockSpec((C, hid), lambda i: (0, 0)),
                pl.BlockSpec((1, hid), lambda i: (0, 0)),
                pl.BlockSpec((hid, t_pad), lambda i: (0, 0)),
                pl.BlockSpec((1, t_pad), lambda i: (0, 0)),
            ],
            out_specs=pl.BlockSpec((tp, t_pad), lambda i: (i, 0)),
        ),
        compiler_params=pltpu.CompilerParams(
            dimension_semantics=("parallel",),
            vmem_limit_bytes=_VMEM_LIMIT),
    )(rows, w1, b1, w2, b2)

    out = out[:P, :t_out]
    return jnp.transpose(out.reshape(N, H, W, t_out), (0, 3, 1, 2))


def _im2col_3x3_pad2(x_nchw):
    """3x3 patches with padding=2 -> (N, H+2, W+2, C*9); the patch at output
    position (p, q) is centred at input pixel (p-1, q-1); ordering (C, kh, kw)."""
    N, C, H, W = x_nchw.shape
    xp = jnp.pad(x_nchw, ((0, 0), (0, 0), (2, 2), (2, 2)))
    patches = []
    for dh in range(3):
        for dw in range(3):
            patches.append(xp[:, :, dh:dh + H + 2, dw:dw + W + 2])
    p = jnp.stack(patches, axis=-1)              # (N, C, H+2, W+2, 9)
    p = jnp.transpose(p, (0, 2, 3, 1, 4))        # (N, H+2, W+2, C, 9)
    return p.reshape(N, H + 2, W + 2, C * 9)


def _conv_forward(x_nchw, w1, b1, w2, b2, t_out):
    N, C, H, W = x_nchw.shape
    CK = w1.shape[0]
    t_pad = w2.shape[-1]
    W2 = _round_up(W + 2, 16)               # padded row stride (bf16 sublane tile)
    R = _choose_band_rows(W2)               # even number of output rows per band
    nb = (H + R - 1) // R
    rows_pad = nb * R + 2

    # im2col of the SMALL-C input (C*9 lanes) with pad=2; the 1024-ch hidden
    # itself is never materialized in HBM.
    cols = _im2col_3x3_pad2(x_nchw.astype(jnp.bfloat16))     # (N, H+2, W+2, CK)
    cols = jnp.pad(cols, ((0, 0), (0, rows_pad - (H + 2)),
                          (0, W2 - (W + 2)), (0, 0)))
    cols = cols.reshape(N, rows_pad * W2, CK)                # flat (row, col)

    kernel = functools.partial(_conv_fused_kernel, R=R, W2=W2, H=H, W=W,
                               t_pad=t_pad)
    band_alloc = (R + 2) * W2 + _TAIL

    out = pl.pallas_call(
        kernel,
        out_shape=jax.ShapeDtypeStruct((N, nb * R * W2, t_pad), jnp.float32),
        grid_spec=pltpu.PrefetchScalarGridSpec(
            num_scalar_prefetch=0,
            grid=(N, nb),
            in_specs=[
                # band rows [b*R, b*R+R) of the flat im2col image
                pl.BlockSpec((None, R * W2, CK), lambda n, b: (n, b, 0)),
                # two halo rows [(b+1)*R, (b+1)*R+2) (R is even)
                pl.BlockSpec((None, 2 * W2, CK),
                             lambda n, b: (n, (b + 1) * (R // 2), 0)),
                pl.BlockSpec((CK, HIDDEN), lambda n, b: (0, 0)),
                pl.BlockSpec((1, HIDDEN), lambda n, b: (0, 0)),
                pl.BlockSpec((9, HIDDEN, t_pad), lambda n, b: (0, 0, 0)),
                pl.BlockSpec((1, t_pad), lambda n, b: (0, 0)),
            ],
            out_specs=pl.BlockSpec((None, R * W2, t_pad), lambda n, b: (n, b, 0)),
            scratch_shapes=[pltpu.VMEM((band_alloc, HIDDEN), jnp.bfloat16)],
        ),
        compiler_params=pltpu.CompilerParams(
            dimension_semantics=("parallel", "parallel"),
            vmem_limit_bytes=_VMEM_LIMIT),
    )(cols, cols, w1, b1, w2, b2)

    out = out.reshape(N, nb * R, W2, t_pad)[:, :H, :W, :t_out]
    return jnp.transpose(out, (0, 3, 1, 2))


# ---------------------------------- module ---------------------------------- #
class Calculator:
    """JAX/Pallas port of the PyTorch Calculator module."""

    def __init__(self, num_euv_channels, num_temperature_bins, model_type, key):
        assert model_type in ("pixel", "convolution")
        self.num_euv_channels = num_euv_channels
        self.num_temperature_bins = num_temperature_bins
        self.model_type = model_type
        k = 1 if model_type == "pixel" else 3
        self.k = k

        T = num_temperature_bins
        self.t_pad = _round_up(T, 8)          # narrow output lanes (small writeback)

        k1, k2, k3, k4 = jax.random.split(key, 4)
        fan_in1 = num_euv_channels * k * k
        fan_in2 = HIDDEN * k * k
        bound1 = 1.0 / float(fan_in1) ** 0.5
        bound2 = 1.0 / float(fan_in2) ** 0.5

        # layer 1 as a (K, HIDDEN) matmul matrix, K ordered (Cin, kh, kw)
        w1 = jax.random.uniform(k1, (fan_in1, HIDDEN), jnp.float32, -bound1, bound1)
        b1 = jax.random.uniform(k2, (HIDDEN,), jnp.float32, -bound1, bound1)

        if model_type == "pixel":
            w2 = jax.random.uniform(k3, (HIDDEN, T), jnp.float32, -bound2, bound2)
            w2 = jnp.pad(w2, ((0, 0), (0, self.t_pad - T)))
        else:
            # (kh*kw, HIDDEN, Tpad): one (1024, Tpad) slab per tap t = dh*3 + dw
            w2 = jax.random.uniform(k3, (9, HIDDEN, T), jnp.float32, -bound2, bound2)
            w2 = jnp.pad(w2, ((0, 0), (0, 0), (0, self.t_pad - T)))
        b2 = jax.random.uniform(k4, (T,), jnp.float32, -bound2, bound2)
        b2 = jnp.pad(b2, (0, self.t_pad - T))

        # bf16 MXU operands; biases stay f32 (added to f32 accumulators)
        self.w1 = w1.astype(jnp.bfloat16)
        self.w2 = w2.astype(jnp.bfloat16)
        self.b1 = b1.reshape(1, HIDDEN)
        self.b2 = b2.reshape(1, self.t_pad)

    def __call__(self, x_nchw):
        N, C, H, W = x_nchw.shape
        assert C == self.num_euv_channels
        if self.model_type == "pixel":
            return _pixel_forward(x_nchw, self.w1, self.b1, self.w2, self.b2,
                                  self.num_temperature_bins)
        return _conv_forward(x_nchw, self.w1, self.b1, self.w2, self.b2,
                             self.num_temperature_bins)

    # Pure-JAX reference mirroring the kernel's bf16 quantization points.
    def reference(self, x_nchw):
        T = self.num_temperature_bins
        xb = x_nchw.astype(jnp.bfloat16).astype(jnp.float32)
        w1 = self.w1.astype(jnp.float32)
        w2 = self.w2.astype(jnp.float32)
        if self.model_type == "pixel":
            N, C, H, W = x_nchw.shape
            rows = jnp.transpose(xb, (0, 2, 3, 1)).reshape(-1, C)
            h = _silu(rows @ w1 + self.b1)
            h = h.astype(jnp.bfloat16).astype(jnp.float32)
            out = h @ w2[:, :T] + self.b2[0, :T]
            return jnp.transpose(out.reshape(N, H, W, T), (0, 3, 1, 2))
        C = self.num_euv_channels
        w1_oihw = w1.reshape(C, 3, 3, HIDDEN).transpose(3, 0, 1, 2)
        h = lax.conv_general_dilated(xb, w1_oihw, (1, 1), ((1, 1), (1, 1)),
                                     dimension_numbers=("NCHW", "OIHW", "NCHW"))
        h = _silu(h + self.b1.reshape(1, HIDDEN, 1, 1))
        h = h.astype(jnp.bfloat16).astype(jnp.float32)
        w2_oihw = w2[:, :, :T].reshape(3, 3, HIDDEN, T).transpose(3, 2, 0, 1)
        out = lax.conv_general_dilated(h, w2_oihw, (1, 1), ((1, 1), (1, 1)),
                                       dimension_numbers=("NCHW", "OIHW", "NCHW"))
        return out + self.b2[0, :T].reshape(1, T, 1, 1)


if __name__ == "__main__":
    key = jax.random.PRNGKey(0)
    kx, kp1, kp2 = jax.random.split(key, 3)

    N, C, H, W = 2, 4, 16, 16
    T = 16
    x = jax.random.normal(kx, (N, C, H, W), jnp.float32)

    # pixel mode: fully fused per-pixel MLP in one pallas_call
    calc_px = Calculator(C, T, "pixel", kp1)
    y_px = jax.block_until_ready(calc_px(x))
    assert y_px.shape == (N, T, H, W)
    err_px = float(jnp.max(jnp.abs(y_px - calc_px.reference(x))))
    assert err_px < 2e-2, f"pixel mode mismatch: {err_px}"

    # convolution mode: fully fused band kernel (hidden never touches HBM)
    calc_cv = Calculator(C, T, "convolution", kp2)
    y_cv = jax.block_until_ready(calc_cv(x))
    assert y_cv.shape == (N, T, H, W)
    err_cv = float(jnp.max(jnp.abs(y_cv - calc_cv.reference(x))))
    assert err_cv < 2e-2, f"convolution mode mismatch: {err_cv}"

    print("KERNEL_OK")
</pallas_src>

<mosaic_0001>
module attributes {stable_mosaic.version = 11 : i64} {
  func.func @_pixel_fused_kernel(%arg0: i32, %arg1: memref<256x4xbf16, #tpu.memory_space<vmem>>, %arg2: memref<4x1024xbf16, #tpu.memory_space<vmem>>, %arg3: memref<1x1024xf32, #tpu.memory_space<vmem>>, %arg4: memref<1024x16xbf16, #tpu.memory_space<vmem>>, %arg5: memref<1x16xf32, #tpu.memory_space<vmem>>, %arg6: memref<256x16xf32, #tpu.memory_space<vmem>>) attributes {dimension_semantics = [#tpu.dimension_semantics<parallel>], iteration_bounds = array<i64: 2>, scalar_prefetch = 0 : i64, scratch_operands = 0 : i64, tpu.core_type = #tpu.core_type<tc>, window_params = [{transform_indices = @transform_0, window_bounds = array<i64: 256, 4>}, {pipeline_mode = #tpu.pipeline_mode<synchronous>, transform_indices = @transform_1, window_bounds = array<i64: 4, 1024>}, {pipeline_mode = #tpu.pipeline_mode<synchronous>, transform_indices = @transform_2, window_bounds = array<i64: 1, 1024>}, {pipeline_mode = #tpu.pipeline_mode<synchronous>, transform_indices = @transform_3, window_bounds = array<i64: 1024, 16>}, {pipeline_mode = #tpu.pipeline_mode<synchronous>, transform_indices = @transform_4, window_bounds = array<i64: 1, 16>}, {transform_indices = @transform_5, window_bounds = array<i64: 256, 16>}]} {
    %c0 = arith.constant 0 : index
    %c0_0 = arith.constant 0 : index
    %0 = vector.load %arg1[%c0, %c0_0] : memref<256x4xbf16, #tpu.memory_space<vmem>>, vector<256x4xbf16>
    %c0_1 = arith.constant 0 : index
    %c0_2 = arith.constant 0 : index
    %1 = vector.load %arg2[%c0_1, %c0_2] : memref<4x1024xbf16, #tpu.memory_space<vmem>>, vector<4x1024xbf16>
    %cst = arith.constant dense<0.000000e+00> : vector<256x1024xf32>
    %2 = tpu.matmul %0, %1, %cst {dimension_numbers = #tpu.dot_dimension_numbers<[1], [0], [0], [1], [0, 0, 1, 1], [], []>} : vector<256x4xbf16>, vector<4x1024xbf16>, vector<256x1024xf32> -> vector<256x1024xf32>
    %c0_3 = arith.constant 0 : index
    %c0_4 = arith.constant 0 : index
    %3 = vector.load %arg3[%c0_3, %c0_4] : memref<1x1024xf32, #tpu.memory_space<vmem>>, vector<1x1024xf32>
    %4 = vector.broadcast %3 : vector<1x1024xf32> to vector<256x1024xf32>
    %5 = arith.addf %2, %4 : vector<256x1024xf32>
    %cst_5 = arith.constant 5.000000e-01 : f32
    %6 = vector.broadcast %cst_5 : f32 to vector<256x1024xf32>
    %7 = arith.mulf %6, %5 : vector<256x1024xf32>
    %cst_6 = arith.constant 5.000000e-01 : f32
    %8 = vector.broadcast %cst_6 : f32 to vector<256x1024xf32>
    %9 = arith.mulf %8, %5 : vector<256x1024xf32>
    %10 = math.tanh %9 : vector<256x1024xf32>
    %cst_7 = arith.constant 1.000000e+00 : f32
    %11 = vector.broadcast %cst_7 : f32 to vector<256x1024xf32>
    %12 = arith.addf %11, %10 : vector<256x1024xf32>
    %13 = arith.mulf %7, %12 : vector<256x1024xf32>
    %14 = arith.truncf %13 : vector<256x1024xf32> to vector<256x1024xbf16>
    %c0_8 = arith.constant 0 : index
    %c0_9 = arith.constant 0 : index
    %15 = vector.load %arg4[%c0_8, %c0_9] : memref<1024x16xbf16, #tpu.memory_space<vmem>>, vector<1024x16xbf16>
    %cst_10 = arith.constant dense<0.000000e+00> : vector<256x16xf32>
    %16 = tpu.matmul %14, %15, %cst_10 {dimension_numbers = #tpu.dot_dimension_numbers<[1], [0], [0], [1], [0, 0, 1, 1], [], []>} : vector<256x1024xbf16>, vector<1024x16xbf16>, vector<256x16xf32> -> vector<256x16xf32>
    %c0_11 = arith.constant 0 : index
    %c0_12 = arith.constant 0 : index
    %17 = vector.load %arg5[%c0_11, %c0_12] : memref<1x16xf32, #tpu.memory_space<vmem>>, vector<1x16xf32>
    %18 = vector.broadcast %17 : vector<1x16xf32> to vector<256x16xf32>
    %19 = arith.addf %16, %18 : vector<256x16xf32>
    %c0_13 = arith.constant 0 : index
    %c0_14 = arith.constant 0 : index
    %20 = vector.load %arg6[%c0_13, %c0_14] : memref<256x16xf32, #tpu.memory_space<vmem>>, vector<256x16xf32>
    tpu.vector_store %arg6[%c0_13, %c0_14], %19 {strides = array<i32>} : memref<256x16xf32, #tpu.memory_space<vmem>>, vector<256x16xf32>,
    return
  }
  func.func @transform_0(%arg0: i32) -> (i32, i32) {
    %c0_i32 = arith.constant 0 : i32
    %c0_i32_0 = arith.constant 0 : i32
    return %arg0, %c0_i32 : i32, i32
  }
  func.func @transform_1(%arg0: i32) -> (i32, i32) {
    %c0_i32 = arith.constant 0 : i32
    %c0_i32_0 = arith.constant 0 : i32
    %c0_i32_1 = arith.constant 0 : i32
    return %c0_i32, %c0_i32_0 : i32, i32
  }
  func.func @transform_2(%arg0: i32) -> (i32, i32) {
    %c0_i32 = arith.constant 0 : i32
    %c0_i32_0 = arith.constant 0 : i32
    %c0_i32_1 = arith.constant 0 : i32
    return %c0_i32, %c0_i32_0 : i32, i32
  }
  func.func @transform_3(%arg0: i32) -> (i32, i32) {
    %c0_i32 = arith.constant 0 : i32
    %c0_i32_0 = arith.constant 0 : i32
    %c0_i32_1 = arith.constant 0 : i32
    return %c0_i32, %c0_i32_0 : i32, i32
  }
  func.func @transform_4(%arg0: i32) -> (i32, i32) {
    %c0_i32 = arith.constant 0 : i32
    %c0_i32_0 = arith.constant 0 : i32
    %c0_i32_1 = arith.constant 0 : i32
    return %c0_i32, %c0_i32_0 : i32, i32
  }
  func.func @transform_5(%arg0: i32) -> (i32, i32) {
    %c0_i32 = arith.constant 0 : i32
    %c0_i32_0 = arith.constant 0 : i32
    return %arg0, %c0_i32 : i32, i32
  }
}

</mosaic_0001>

<bundles_post_ra>
// kernel: tpu_custom_call.1
= control target key start
LH: loop header
LB: loop body
LE: loop exit
PB: predicated region body
PF: predicated region fallthrough
CT: control target
= control target key end

     0   :  { %s4923_s18 = smov 0   ;;  %s8570_s0 = inlined_call_operand.vmem [shape: bf16[512,4], index: 0, kind: input, shape index: {}]   ;;  %s8571_s1 = inlined_call_operand.vmem [shape: bf16[4,1024], index: 1, kind: input, shape index: {}]   ;;  %s8572_s2 = inlined_call_operand.vmem [shape: f32[1,1024], index: 2, kind: input, shape index: {}]   ;;  %s8573_s3 = inlined_call_operand.vmem [shape: bf16[1024,16], index: 3, kind: input, shape index: {}]   ;;  %s8574_s4 = inlined_call_operand.vmem [shape: f32[1,16], index: 4, kind: input, shape index: {}]   ;;  %s8575_s5 = inlined_call_operand.vmem [shape: f32[512,16], index: 5, kind: output, shape index: {}]  }
   0x1 LB: > { %s3671_s19 = sadd.s32 4294967295, %s4889_s18   ;;  %p3675_p0 = scmp.ge.s32.totalorder %s4889_s18, 1  ;;  %s4889_s18 = sphi %s4923_s18, %s15_s18  }
   0x2   : > { %p188_p1 = scmp.lt.s32.totalorder %s4889_s18, 3 }
   0x4   : > { %p189_p2 = pnand %p3675_p0, %p188_p1 }
   0x6   : > { %192 = sbr.rel (%p189_p2) target bundleno = 855 (0x357), region = 40 }
   0xd   : > { %v265_v0 = vlaneseq  ;;  %v261_v1 = vld [vmem:[%s8571_s1] sm:$0xff]  ;;  %v4891_v2 = vmov 1983009808   ;;  %v4892_v4 = vmov 0   ;;  %s3676_s22 = sshll.u32 %s3671_s19, 5  ;;  %v262_v5 = vld [vmem:[%s8571_s1 + $0x8] sm:$0xff] }
   0xe   : > { %v389_v3 = vunpack.c.l.s4 %v4891_v2  ;;  %527 = vmatprep.mubr.bf16.mxu0 %v4892_v4  ;;  %720 = vmatprep.mubr.bf16.mxu1 %v4892_v4  ;;  %p217_p3 = scmp.lt.s32.totalorder %s3676_s22, 63  ;;  %v4950_v12 = vld [vmem:[%s8572_s2] sm:$0xff]  ;;  %v387_v13 = vcombine.high %v261_v1, %v261_v1  ;;  %v404_v14 = vcombine.high %v262_v5, %v262_v5  ;;  %vm470_vm0 = vcmask 1041408   ;;  %v4311_v52 = vld [vmem:[%s8573_s3 + $0x48] sm:$0xff]   ;;  %v4315_v56 = vld [vmem:[%s8573_s3 + $0x50] sm:$0xff]  }
   0xf   : > { %v4939_v6 = vshrl.u32 %v265_v0, 7  ;;  %vm421_vm1 = vcmask 31744   ;;  %v4307_v34 = vld [vmem:[%s8573_s3 + $0x40] sm:$0xff]   ;;  %v4313_v53 = vld [vmem:[%s8573_s3 + $0xc8] sm:$0xff]   ;;  %v4317_v57 = vld [vmem:[%s8573_s3 + $0xd0] sm:$0xff]   ;;  %vm3582_vm2 = vcmask 130048  }
  0x10   : > { %v390_v7 = vunpack.c.0.s8 %v389_v3  ;;  %s9045_s22 = smov (!%p217_p3, %s3676_s22), 63  ;;  %v4309_v35 = vld [vmem:[%s8573_s3 + $0xc0] sm:$0xff]   ;;  %v4312_v54 = vld [vmem:[%s8573_s3 + $0x8] sm:$0xff]   ;;  %v4316_v58 = vld [vmem:[%s8573_s3 + $0x10] sm:$0xff]  }
  0x11   : > { %v283_v8 = vsub.s32 4, %v4939_v6  ;;  %v287_v9 = vsub.s32 5, %v4939_v6  ;;  %v291_v10 = vsub.s32 6, %v4939_v6  ;;  %v295_v11 = vsub.s32 7, %v4939_v6  ;;  %s3677_s27 = sshll.u32 %s9045_s22, 2  ;;  %v4308_v50 = vld [vmem:[%s8573_s3] sm:$0xff]  }
  0x12   : > { %s4968_s30 = scalar_lea.vmem %s8570_s0, %s3677_s27  ;;  %v393_v19 = vsub.s32 %v390_v7, %v4939_v6  ;;  %v4310_v51 = vld [vmem:[%s8573_s3 + $0x80] sm:$0xff]   ;;  %v4314_v55 = vld [vmem:[%s8573_s3 + $0x88] sm:$0xff]   ;;  %v4318_v59 = vld [vmem:[%s8573_s3 + $0x90] sm:$0xff]   ;;  %s3679_s23 = sshll.u32 %s9045_s22, 3 }
  0x13   : > { %v4954_v15 = vrot.slane %v4950_v12, %v283_v8  ;;  %v4957_v16 = vrot.slane %v4950_v12, %v287_v9  ;;  %v4960_v17 = vrot.slane %v4950_v12, %v291_v10  ;;  %v4963_v18 = vrot.slane %v4950_v12, %v295_v11  ;;  %v4974_v28 = vld [vmem:[%s4968_s30] sm:$0xff]   ;;  %v4989_v33 = vld [vmem:[%s4968_s30 + $0x8] sm:$0xff]   ;;  %v5004_v36 = vld [vmem:[%s4968_s30 + $0x10] sm:$0xff]   ;;  %s8470_s26 = scalar_lea.vmem %s8575_s5, %s3679_s23 }
  0x14   : > { %v394_v20 = vrot.slane %v261_v1, %v393_v19  ;;  %v401_v21 = vrot.slane %v387_v13, %v393_v19  ;;  %v411_v22 = vrot.slane %v262_v5, %v393_v19  ;;  %v418_v23 = vrot.slane %v404_v14, %v393_v19  ;;  %v5013_v37 = vld [vmem:[%s4968_s30 + $0x18] sm:$0xff]   ;;  %v5022_v38 = vld [vmem:[%s4968_s30 + $0x20] sm:$0xff]   ;;  %v5031_v39 = vld [vmem:[%s4968_s30 + $0x28] sm:$0xff]  }
  0x15   : > { %8580 = vst [vmem:[#allocation2_spill] sm:$0xff] %v4954_v15  ;;  %8581 = vst [vmem:[#allocation3_spill] sm:$0xff] %v4957_v16  ;;  %v5040_v40 = vld [vmem:[%s4968_s30 + $0x30] sm:$0xff]   ;;  %v5049_v41 = vld [vmem:[%s4968_s30 + $0x38] sm:$0xff]  }
  0x16   : > { %8582 = vst [vmem:[#allocation4_spill] sm:$0xff] %v4960_v17  ;;  %8583 = vst [vmem:[#allocation5_spill] sm:$0xff] %v4963_v18  ;;  %v402_v24 = vcombine.high %v394_v20, %v394_v20  ;;  %v403_v25 = vcombine.high %v401_v21, %v401_v21  ;;  %v472_v26 = vsel %vm470_vm0, %v394_v20, 0  ;;  %v478_v27 = vsel %vm470_vm0, %v401_v21, 0  ;;  %v5058_v42 = vld [vmem:[%s4968_s30 + $0x40] sm:$0xff]   ;;  %v5067_v43 = vld [vmem:[%s4968_s30 + $0x48] sm:$0xff]  }
  0x17   : > { %v419_v29 = vcombine.high %v411_v22, %v411_v22  ;;  %v420_v30 = vcombine.high %v418_v23, %v418_v23  ;;  %v484_v31 = vsel %vm470_vm0, %v411_v22, 0  ;;  %v490_v32 = vsel %vm470_vm0, %v418_v23, 0  ;;  %v5076_v44 = vld [vmem:[%s4968_s30 + $0x50] sm:$0xff]   ;;  %v5085_v45 = vld [vmem:[%s4968_s30 + $0x58] sm:$0xff]   ;;  %v5094_v46 = vld [vmem:[%s4968_s30 + $0x60] sm:$0xff]  }
  0x18   : > { %3696 = vmatprep.subr.msk.bf16.mxu0 %vm470_vm0, %v402_v24  ;;  %3713 = vmatprep.subr.msk.bf16.mxu1 %vm470_vm0, %v403_v25  ;;  %v5103_v47 = vld [vmem:[%s4968_s30 + $0x68] sm:$0xff]   ;;  %v5112_v48 = vld [vmem:[%s4968_s30 + $0x70] sm:$0xff]   ;;  %v5121_v49 = vld [vmem:[%s4968_s30 + $0x78] sm:$0xff]   ;;  %v267_v25 = vsub.s32 0, %v4939_v6 }
  0x19   : > { %496 = vmatpush1.bf16.msra.mxu0 %v472_v26  ;;  %689 = vmatpush1.bf16.msra.mxu1 %v478_v27  ;;  %v4319_v60 = vld [vmem:[%s8573_s3 + $0x58] sm:$0xff]   ;;  %v4323_v0 = vld [vmem:[%s8573_s3 + $0x60] sm:$0xff]   ;;  %v4327_v5 = vld [vmem:[%s8573_s3 + $0x68] sm:$0xff]   ;;  %v275_v26 = vsub.s32 2, %v4939_v6  ;;  %v271_v27 = vsub.s32 1, %v4939_v6 }
  0x1a   : > { %3730 = vmatprep.subr.msk.bf16.mxu0 %vm470_vm0, %v419_v29  ;;  %3747 = vmatprep.subr.msk.bf16.mxu1 %vm470_vm0, %v420_v30  ;;  %v4321_v61 = vld [vmem:[%s8573_s3 + $0xd8] sm:$0xff]   ;;  %v4325_v1 = vld [vmem:[%s8573_s3 + $0xe0] sm:$0xff]   ;;  %v4329_v7 = vld [vmem:[%s8573_s3 + $0xe8] sm:$0xff]   ;;  %v5290_v29 = vrot.slane %v4950_v12, %v267_v25 }
  0x1b   : > { %v4320_v62 = vld [vmem:[%s8573_s3 + $0x18] sm:$0xff]   ;;  %v4324_v2 = vld [vmem:[%s8573_s3 + $0x20] sm:$0xff]   ;;  %v4328_v8 = vld [vmem:[%s8573_s3 + $0x28] sm:$0xff]   ;;  %v5293_v30 = vrot.slane %v4950_v12, %v275_v26 }
  0x1c   : > { %3697 = vmatmul.mubr.msk.bf16.vlgmr.msra.gmra.mrb[0].mxu0 %vm421_vm1, %v4974_v28  ;;  %3714 = vmatmul.mubr.msk.bf16.vlgmr.msra.gmra.mrb[0].mxu1 %vm421_vm1, %v4974_v28  ;;  %v4322_v63 = vld [vmem:[%s8573_s3 + $0x98] sm:$0xff]   ;;  %v4326_v3 = vld [vmem:[%s8573_s3 + $0xa0] sm:$0xff]   ;;  %v4330_v9 = vld [vmem:[%s8573_s3 + $0xa8] sm:$0xff]  }
  0x1d   : > { %882 = vmatpush1.bf16.msra.mxu0 %v484_v31  ;;  %1075 = vmatpush1.bf16.msra.mxu1 %v490_v32  ;;  %v4331_v10 = vld [vmem:[%s8573_s3 + $0x70] sm:$0xff]   ;;  %v4335_v19 = vld [vmem:[%s8573_s3 + $0x78] sm:$0xff]   ;;  %v4339_v23 = vld [vmem:[%s8573_s3 + $0x140] sm:$0xff]   ;;  %v5300_v31 = vrot.slane %v4950_v12, %v271_v27 }
  0x1e   : > { %537 = vmatprep.mubr.bf16.mxu0 %v4892_v4  ;;  %730 = vmatprep.mubr.bf16.mxu1 %v4892_v4  ;;  %v4333_v11 = vld [vmem:[%s8573_s3 + $0xf0] sm:$0xff]   ;;  %v4337_v20 = vld [vmem:[%s8573_s3 + $0xf8] sm:$0xff]   ;;  %v4341_v24 = vld [vmem:[%s8573_s3 + $0x1c0] sm:$0xff]  }
  0x1f   : > { %3831 = vmatprep.subr.bf16.mxu0 %v4307_v34  ;;  %3943 = vmatprep.subr.bf16.mxu1 %v4309_v35  ;;  %v4332_v13 = vld [vmem:[%s8573_s3 + $0x30] sm:$0xff]   ;;  %v4336_v21 = vld [vmem:[%s8573_s3 + $0x38] sm:$0xff]  }
  0x20   : > { %v4334_v14 = vld [vmem:[%s8573_s3 + $0xb0] sm:$0xff]   ;;  %v4338_v22 = vld [vmem:[%s8573_s3 + $0xb8] sm:$0xff]  }
  0x24   : > { %3698 = vmatmul.mubr.msk.bf16.gmra.mrb[4].mxu0 %vm421_vm1, %v4989_v33  ;;  %3715 = vmatmul.mubr.msk.bf16.gmra.mrb[4].mxu1 %vm421_vm1, %v4989_v33 }
  0x25   : > { %547 = vmatprep.mubr.bf16.mxu0 %v4892_v4  ;;  %740 = vmatprep.mubr.bf16.mxu1 %v4892_v4 }
  0x2c   : > { %3699 = vmatmul.mubr.msk.bf16.gmra.mrb[8].mxu0 %vm421_vm1, %v5004_v36  ;;  %3716 = vmatmul.mubr.msk.bf16.gmra.mrb[8].mxu1 %vm421_vm1, %v5004_v36 }
  0x2d   : > { %557 = vmatprep.mubr.bf16.mxu0 %v4892_v4  ;;  %750 = vmatprep.mubr.bf16.mxu1 %v4892_v4 }
  0x34   : > { %3700 = vmatmul.mubr.msk.bf16.gmra.mrb[12].mxu0 %vm421_vm1, %v5013_v37  ;;  %3717 = vmatmul.mubr.msk.bf16.gmra.mrb[12].mxu1 %vm421_vm1, %v5013_v37 }
  0x35   : > { %567 = vmatprep.mubr.bf16.mxu0 %v4892_v4  ;;  %760 = vmatprep.mubr.bf16.mxu1 %v4892_v4 }
  0x3c   : > { %3701 = vmatmul.mubr.msk.bf16.gmra.mrb[16].mxu0 %vm421_vm1, %v5022_v38  ;;  %3718 = vmatmul.mubr.msk.bf16.gmra.mrb[16].mxu1 %vm421_vm1, %v5022_v38 }
  0x3d   : > { %577 = vmatprep.mubr.bf16.mxu0 %v4892_v4  ;;  %770 = vmatprep.mubr.bf16.mxu1 %v4892_v4 }
  0x44   : > { %3702 = vmatmul.mubr.msk.bf16.gmra.mrb[20].mxu0 %vm421_vm1, %v5031_v39  ;;  %3719 = vmatmul.mubr.msk.bf16.gmra.mrb[20].mxu1 %vm421_vm1, %v5031_v39 }
  0x45   : > { %587 = vmatprep.mubr.bf16.mxu0 %v4892_v4  ;;  %780 = vmatprep.mubr.bf16.mxu1 %v4892_v4 }
  0x4c   : > { %3703 = vmatmul.mubr.msk.bf16.gmra.mrb[24].mxu0 %vm421_vm1, %v5040_v40  ;;  %3720 = vmatmul.mubr.msk.bf16.gmra.mrb[24].mxu1 %vm421_vm1, %v5040_v40 }
  0x4d   : > { %597 = vmatprep.mubr.bf16.mxu0 %v4892_v4  ;;  %790 = vmatprep.mubr.bf16.mxu1 %v4892_v4 }
  0x54   : > { %3704 = vmatmul.mubr.msk.bf16.gmra.mrb[28].mxu0 %vm421_vm1, %v5049_v41  ;;  %3721 = vmatmul.mubr.msk.bf16.gmra.mrb[28].mxu1 %vm421_vm1, %v5049_v41 }
  0x55   : > { %607 = vmatprep.mubr.bf16.mxu0 %v4892_v4  ;;  %800 = vmatprep.mubr.bf16.mxu1 %v4892_v4 }
  0x5c   : > { %3705 = vmatmul.mubr.msk.bf16.gmra.mrb[32].mxu0 %vm421_vm1, %v5058_v42  ;;  %3722 = vmatmul.mubr.msk.bf16.gmra.mrb[32].mxu1 %vm421_vm1, %v5058_v42 }
  0x5d   : > { %617 = vmatprep.mubr.bf16.mxu0 %v4892_v4  ;;  %810 = vmatprep.mubr.bf16.mxu1 %v4892_v4 }
  0x64   : > { %3706 = vmatmul.mubr.msk.bf16.gmra.mrb[36].mxu0 %vm421_vm1, %v5067_v43  ;;  %3723 = vmatmul.mubr.msk.bf16.gmra.mrb[36].mxu1 %vm421_vm1, %v5067_v43 }
  0x65   : > { %627 = vmatprep.mubr.bf16.mxu0 %v4892_v4  ;;  %820 = vmatprep.mubr.bf16.mxu1 %v4892_v4 }
  0x6c   : > { %3707 = vmatmul.mubr.msk.bf16.gmra.mrb[40].mxu0 %vm421_vm1, %v5076_v44  ;;  %3724 = vmatmul.mubr.msk.bf16.gmra.mrb[40].mxu1 %vm421_vm1, %v5076_v44 }
  0x6d   : > { %637 = vmatprep.mubr.bf16.mxu0 %v4892_v4  ;;  %830 = vmatprep.mubr.bf16.mxu1 %v4892_v4 }
  0x74   : > { %3708 = vmatmul.mubr.msk.bf16.gmra.mrb[44].mxu0 %vm421_vm1, %v5085_v45  ;;  %3725 = vmatmul.mubr.msk.bf16.gmra.mrb[44].mxu1 %vm421_vm1, %v5085_v45 }
  0x75   : > { %647 = vmatprep.mubr.bf16.mxu0 %v4892_v4  ;;  %840 = vmatprep.mubr.bf16.mxu1 %v4892_v4 }
  0x7c   : > { %3709 = vmatmul.mubr.msk.bf16.gmra.mrb[48].mxu0 %vm421_vm1, %v5094_v46  ;;  %3726 = vmatmul.mubr.msk.bf16.gmra.mrb[48].mxu1 %vm421_vm1, %v5094_v46 }
  0x7d   : > { %657 = vmatprep.mubr.bf16.mxu0 %v4892_v4  ;;  %850 = vmatprep.mubr.bf16.mxu1 %v4892_v4 }
  0x84   : > { %3710 = vmatmul.mubr.msk.bf16.gmra.mrb[52].mxu0 %vm421_vm1, %v5103_v47  ;;  %3727 = vmatmul.mubr.msk.bf16.gmra.mrb[52].mxu1 %vm421_vm1, %v5103_v47 }
  0x85   : > { %667 = vmatprep.mubr.bf16.mxu0 %v4892_v4  ;;  %860 = vmatprep.mubr.bf16.mxu1 %v4892_v4 }
  0x8c   : > { %3711 = vmatmul.mubr.msk.bf16.gmra.mrb[56].mxu0 %vm421_vm1, %v5112_v48  ;;  %3728 = vmatmul.mubr.msk.bf16.gmra.mrb[56].mxu1 %vm421_vm1, %v5112_v48 }
  0x8d   : > { %677 = vmatprep.mubr.bf16.mxu0 %v4892_v4  ;;  %870 = vmatprep.mubr.bf16.mxu1 %v4892_v4 }
  0x94   : > { %3712 = vmatmul.mubr.msk.bf16.gmra.mrb[60].mxu0 %vm421_vm1, %v5121_v49  ;;  %3729 = vmatmul.mubr.msk.bf16.gmra.mrb[60].mxu1 %vm421_vm1, %v5121_v49 }
  0x95   : > { %913 = vmatprep.mubr.bf16.mxu0 %v4892_v4  ;;  %1106 = vmatprep.mubr.bf16.mxu1 %v4892_v4 }
  0x9c   : > { %3731 = vmatmul.mubr.msk.bf16.vlgmr.msra.gmra.mrb[64].mxu0 %vm421_vm1, %v4974_v28  ;;  %3748 = vmatmul.mubr.msk.bf16.vlgmr.msra.gmra.mrb[64].mxu1 %vm421_vm1, %v4974_v28  ;;  %v279_v28 = vsub.s32 3, %v4939_v6 }
  0x9d   : > { %3832 = vmatpush3.bf16.msra.mxu0 %v4308_v50  ;;  %3944 = vmatpush3.bf16.msra.mxu1 %v4310_v51 }
  0x9e   : > { %923 = vmatprep.mubr.bf16.mxu0 %v4892_v4  ;;  %1116 = vmatprep.mubr.bf16.mxu1 %v4892_v4  ;;  %v5303_v32 = vrot.slane %v4950_v12, %v279_v28 }
  0x9f   : > { %3833 = vmatprep.subr.bf16.mxu0 %v4311_v52  ;;  %3945 = vmatprep.subr.bf16.mxu1 %v4313_v53 }
  0xa1   : > { %3834 = vmatpush3.bf16.msra.mxu0 %v4312_v54  ;;  %3946 = vmatpush3.bf16.msra.mxu1 %v4314_v55 }
  0xa2   : > { %3835 = vmatprep.subr.bf16.mxu0 %v4315_v56  ;;  %3947 = vmatprep.subr.bf16.mxu1 %v4317_v57 }
  0xa4   : > { %3732 = vmatmul.mubr.msk.bf16.gmra.mrb[68].mxu0 %vm421_vm1, %v4989_v33  ;;  %3749 = vmatmul.mubr.msk.bf16.gmra.mrb[68].mxu1 %vm421_vm1, %v4989_v33 }
  0xa5   : > { %933 = vmatprep.mubr.bf16.mxu0 %v4892_v4  ;;  %1126 = vmatprep.mubr.bf16.mxu1 %v4892_v4 }
  0xa6   : > { %3836 = vmatpush3.bf16.msra.mxu0 %v4316_v58  ;;  %3948 = vmatpush3.bf16.msra.mxu1 %v4318_v59 }
  0xa7   : > { %3837 = vmatprep.subr.bf16.mxu0 %v4319_v60  ;;  %3949 = vmatprep.subr.bf16.mxu1 %v4321_v61 }
  0xaa   : > { %3838 = vmatpush3.bf16.msra.mxu0 %v4320_v62  ;;  %3950 = vmatpush3.bf16.msra.mxu1 %v4322_v63 }
  0xab   : > { %3839 = vmatprep.subr.bf16.mxu0 %v4323_v0  ;;  %3951 = vmatprep.subr.bf16.mxu1 %v4325_v1 }
  0xac   : > { %3733 = vmatmul.mubr.msk.bf16.gmra.mrb[72].mxu0 %vm421_vm1, %v5004_v36  ;;  %3750 = vmatmul.mubr.msk.bf16.gmra.mrb[72].mxu1 %vm421_vm1, %v5004_v36 }
  0xad   : > { %943 = vmatprep.mubr.bf16.mxu0 %v4892_v4  ;;  %1136 = vmatprep.mubr.bf16.mxu1 %v4892_v4 }
  0xae   : > { %3840 = vmatpush3.bf16.msra.mxu0 %v4324_v2  ;;  %3952 = vmatpush3.bf16.msra.mxu1 %v4326_v3 }
  0xaf   : > { %3841 = vmatprep.subr.bf16.mxu0 %v4327_v5  ;;  %3953 = vmatprep.subr.bf16.mxu1 %v4329_v7 }
  0xb2   : > { %3842 = vmatpush3.bf16.msra.mxu0 %v4328_v8  ;;  %3954 = vmatpush3.bf16.msra.mxu1 %v4330_v9 }
  0xb3   : > { %3843 = vmatprep.subr.bf16.mxu0 %v4331_v10  ;;  %3955 = vmatprep.subr.bf16.mxu1 %v4333_v11 }
  0xb4   : > { %3734 = vmatmul.mubr.msk.bf16.gmra.mrb[76].mxu0 %vm421_vm1, %v5013_v37  ;;  %3751 = vmatmul.mubr.msk.bf16.gmra.mrb[76].mxu1 %vm421_vm1, %v5013_v37 }
  0xb5   : > { %953 = vmatprep.mubr.bf16.mxu0 %v4892_v4  ;;  %1146 = vmatprep.mubr.bf16.mxu1 %v4892_v4 }
  0xb6   : > { %3844 = vmatpush3.bf16.msra.mxu0 %v4332_v13  ;;  %3956 = vmatpush3.bf16.msra.mxu1 %v4334_v14 }
  0xb7   : > { %3845 = vmatprep.subr.bf16.mxu0 %v4335_v19  ;;  %3957 = vmatprep.subr.bf16.mxu1 %v4337_v20 }
  0xba   : > { %3846 = vmatpush3.bf16.msra.mxu0 %v4336_v21  ;;  %3958 = vmatpush3.bf16.msra.mxu1 %v4338_v22 }
  0xbb   : > { %4055 = vmatprep.subr.bf16.mxu0 %v4339_v23  ;;  %4167 = vmatprep.subr.bf16.mxu1 %v4341_v24 }
  0xbc   : > { %3735 = vmatmul.mubr.msk.bf16.gmra.mrb[80].mxu0 %vm421_vm1, %v5022_v38  ;;  %3752 = vmatmul.mubr.msk.bf16.gmra.mrb[80].mxu1 %vm421_vm1, %v5022_v38 }
  0xbd   : > { %963 = vmatprep.mubr.bf16.mxu0 %v4892_v4  ;;  %1156 = vmatprep.mubr.bf16.mxu1 %v4892_v4 }
  0xc4   : > { %3736 = vmatmul.mubr.msk.bf16.gmra.mrb[84].mxu0 %vm421_vm1, %v5031_v39  ;;  %3753 = vmatmul.mubr.msk.bf16.gmra.mrb[84].mxu1 %vm421_vm1, %v5031_v39 }
  0xc5   : > { %973 = vmatprep.mubr.bf16.mxu0 %v4892_v4  ;;  %1166 = vmatprep.mubr.bf16.mxu1 %v4892_v4 }
  0xcc   : > { %3737 = vmatmul.mubr.msk.bf16.gmra.mrb[88].mxu0 %vm421_vm1, %v5040_v40  ;;  %3754 = vmatmul.mubr.msk.bf16.gmra.mrb[88].mxu1 %vm421_vm1, %v5040_v40 }
  0xcd   : > { %983 = vmatprep.mubr.bf16.mxu0 %v4892_v4  ;;  %1176 = vmatprep.mubr.bf16.mxu1 %v4892_v4 }
  0xd4   : > { %3738 = vmatmul.mubr.msk.bf16.gmra.mrb[92].mxu0 %vm421_vm1, %v5049_v41  ;;  %3755 = vmatmul.mubr.msk.bf16.gmra.mrb[92].mxu1 %vm421_vm1, %v5049_v41 }
  0xd5   : > { %993 = vmatprep.mubr.bf16.mxu0 %v4892_v4  ;;  %1186 = vmatprep.mubr.bf16.mxu1 %v4892_v4 }
  0xdc   : > { %3739 = vmatmul.mubr.msk.bf16.gmra.mrb[96].mxu0 %vm421_vm1, %v5058_v42  ;;  %3756 = vmatmul.mubr.msk.bf16.gmra.mrb[96].mxu1 %vm421_vm1, %v5058_v42 }
  0xdd   : > { %1003 = vmatprep.mubr.bf16.mxu0 %v4892_v4  ;;  %1196 = vmatprep.mubr.bf16.mxu1 %v4892_v4 }
  0xe4   : > { %3740 = vmatmul.mubr.msk.bf16.gmra.mrb[100].mxu0 %vm421_vm1, %v5067_v43  ;;  %3757 = vmatmul.mubr.msk.bf16.gmra.mrb[100].mxu1 %vm421_vm1, %v5067_v43 }
  0xe5   : > { %1013 = vmatprep.mubr.bf16.mxu0 %v4892_v4  ;;  %1206 = vmatprep.mubr.bf16.mxu1 %v4892_v4 }
  0xec   : > { %3741 = vmatmul.mubr.msk.bf16.gmra.mrb[104].mxu0 %vm421_vm1, %v5076_v44  ;;  %3758 = vmatmul.mubr.msk.bf16.gmra.mrb[104].mxu1 %vm421_vm1, %v5076_v44 }
  0xed   : > { %1023 = vmatprep.mubr.bf16.mxu0 %v4892_v4  ;;  %1216 = vmatprep.mubr.bf16.mxu1 %v4892_v4 }
  0xef   : > { %v529_v6 = vpop.f32.mrb[0].mxu0  ;;  %v722_v33 = vpop.f32.mrb[0].mxu1 }
  0xf0   : > { %v530_v34 = vadd.f32 %v529_v6, %v5290_v29  ;;  %v723_v35 = vadd.f32 %v722_v33, %v5293_v30  ;;  %v531_v36 = vpop.f32.mrb[1].mxu0  ;;  %v724_v37 = vpop.f32.mrb[1].mxu1 }
  0xf1   : > { %v532_v38 = vadd.f32 %v531_v36, %v5300_v31  ;;  %v725_v39 = vadd.f32 %v724_v37, %v5303_v32  ;;  %v533_v40 = vpop.f32.mrb[2].mxu0  ;;  %v726_v41 = vpop.f32.mrb[2].mxu1 }
  0xf2   : > { %v5311_v12 = vmul.f32 0.5, %v530_v34  ;;  %v5313_v42 = vmul.f32 0.5, %v723_v35  ;;  %v534_v43 = vadd.f32 %v533_v40, %v5290_v29  ;;  %v727_v44 = vadd.f32 %v726_v41, %v5293_v30  ;;  %v535_v50 = vpop.f32.mrb[3].mxu0  ;;  %v728_v51 = vpop.f32.mrb[3].mxu1 }
  0xf3   : > { %v5317_v52 = vmul.f32 0.5, %v532_v38  ;;  %v5319_v53 = vmul.f32 0.5, %v725_v39  ;;  %v536_v54 = vadd.f32 %v535_v50, %v5300_v31  ;;  %v729_v55 = vadd.f32 %v728_v51, %v5303_v32 }
  0xf4   : > { %4371 = vtanh.f32 %v5311_v12  ;;  %v5324_v56 = vmul.f32 0.5, %v534_v43  ;;  %3742 = vmatmul.mubr.msk.bf16.gmra.mrb[108].mxu0 %vm421_vm1, %v5085_v45  ;;  %3759 = vmatmul.mubr.msk.bf16.gmra.mrb[108].mxu1 %vm421_vm1, %v5085_v45  ;;  %v5331_v57 = vmul.f32 0.5, %v727_v44 }
  0xf5   : > { %4373 = vtanh.f32 %v5313_v42  ;;  %1033 = vmatprep.mubr.bf16.mxu0 %v4892_v4  ;;  %1226 = vmatprep.mubr.bf16.mxu1 %v4892_v4  ;;  %v5336_v58 = vmul.f32 0.5, %v536_v54  ;;  %v5339_v59 = vmul.f32 0.5, %v729_v55 }
  0xf6   : > { %4375 = vtanh.f32 %v5317_v52 }
  0xf7   : > { %4377 = vtanh.f32 %v5319_v53  ;;  %v539_v60 = vpop.f32.mrb[4].mxu0  ;;  %v732_v61 = vpop.f32.mrb[4].mxu1 }
  0xf8   : > { %4379 = vtanh.f32 %v5324_v56  ;;  %v540_v45 = vadd.f32 %v539_v60, %v5290_v29  ;;  %v733_v62 = vadd.f32 %v732_v61, %v5293_v30  ;;  %v541_v63 = vpop.f32.mrb[5].mxu0  ;;  %v734_v0 = vpop.f32.mrb[5].mxu1 }
  0xf9   : > { %4381 = vtanh.f32 %v5331_v57  ;;  %v542_v1 = vadd.f32 %v541_v63, %v5300_v31  ;;  %v735_v2 = vadd.f32 %v734_v0, %v5303_v32  ;;  %v543_v3 = vpop.f32.mrb[6].mxu0  ;;  %v736_v5 = vpop.f32.mrb[6].mxu1 }
  0xfa   : > { %4383 = vtanh.f32 %v5336_v58  ;;  %v5348_v7 = vmul.f32 0.5, %v540_v45  ;;  %v5350_v8 = vmul.f32 0.5, %v733_v62  ;;  %v544_v9 = vadd.f32 %v543_v3, %v5290_v29  ;;  %v545_v10 = vpop.f32.mrb[7].mxu0  ;;  %v738_v11 = vpop.f32.mrb[7].mxu1 }
  0xfb   : > { %4385 = vtanh.f32 %v5339_v59  ;;  %v5354_v13 = vmul.f32 0.5, %v542_v1  ;;  %v5356_v14 = vmul.f32 0.5, %v735_v2  ;;  %v737_v19 = vadd.f32 %v736_v5, %v5293_v30 }
  0xfc   : > { %4387 = vtanh.f32 %v5348_v7  ;;  %v5360_v20 = vmul.f32 0.5, %v544_v9  ;;  %v546_v21 = vadd.f32 %v545_v10, %v5300_v31  ;;  %v739_v22 = vadd.f32 %v738_v11, %v5303_v32  ;;  %3743 = vmatmul.mubr.msk.bf16.gmra.mrb[112].mxu0 %vm421_vm1, %v5094_v46  ;;  %3760 = vmatmul.mubr.msk.bf16.gmra.mrb[112].mxu1 %vm421_vm1, %v5094_v46 }
  0xfd   : > { %4389 = vtanh.f32 %v5350_v8  ;;  %v5369_v23 = vmul.f32 0.5, %v737_v19  ;;  %1043 = vmatprep.mubr.bf16.mxu0 %v4892_v4  ;;  %1236 = vmatprep.mubr.bf16.mxu1 %v4892_v4 }
  0xfe   : > { %v4372_v24 = vpop.eup %4371  ;;  %4391 = vtanh.f32 %v5354_v13  ;;  %v5374_v25 = vmul.f32 0.5, %v546_v21  ;;  %v5377_v28 = vmul.f32 0.5, %v739_v22 }
  0xff   : > { %v4374_v26 = vpop.eup %4373  ;;  %v1779_v27 = vadd.f32 1.0, %v4372_v24  ;;  %4393 = vtanh.f32 %v5356_v14  ;;  %v549_v46 = vpop.f32.mrb[8].mxu0 }
 0x100   : > { %v742_v6 = vpop.f32.mrb[8].mxu1  ;;  %v4376_v33 = vpop.eup %4375  ;;  %v1781_v34 = vadd.f32 1.0, %v4374_v26  ;;  %4395 = vtanh.f32 %v5360_v20  ;;  %v550_v35 = vadd.f32 %v549_v46, %v5290_v29 }
 0x101   : > { %v743_v36 = vadd.f32 %v742_v6, %v5293_v30  ;;  %v551_v37 = vpop.f32.mrb[9].mxu0  ;;  %v744_v38 = vpop.f32.mrb[9].mxu1  ;;  %v5383_v40 = vmul.f32 %v1779_v27, %v5311_v12  ;;  %v1780_v41 = vadd.f32 1.0, %v4376_v33  ;;  %4397 = vtanh.f32 %v5369_v23 }
 0x102   : > { %v4378_v39 = vpop.eup %4377  ;;  %v552_v43 = vadd.f32 %v551_v37, %v5300_v31  ;;  %v553_v44 = vpop.f32.mrb[10].mxu0  ;;  %v5388_v54 = vmul.f32 %v1781_v34, %v5313_v42  ;;  %4399 = vtanh.f32 %v5374_v25  ;;  %v5391_v60 = vmul.f32 0.5, %v550_v35 }
 0x103   : > { %v746_v50 = vpop.f32.mrb[10].mxu1  ;;  %v4380_v51 = vpop.eup %4379  ;;  %v1782_v55 = vadd.f32 1.0, %v4378_v39  ;;  %v5394_v62 = vmul.f32 %v1780_v41, %v5317_v52  ;;  %4401 = vtanh.f32 %v5377_v28  ;;  %v5397_v0 = vmul.f32 0.5, %v743_v36 }
 0x104   : > { %v555_v61 = vpop.f32.mrb[11].mxu0  ;;  %v748_v45 = vpop.f32.mrb[11].mxu1  ;;  %v1787_v63 = vadd.f32 1.0, %v4380_v51  ;;  %4403 = vtanh.f32 %v5391_v60  ;;  %v5403_v3 = vmul.f32 0.5, %v552_v43  ;;  %3744 = vmatmul.mubr.msk.bf16.gmra.mrb[116].mxu0 %vm421_vm1, %v5103_v47  ;;  %3761 = vmatmul.mubr.msk.bf16.gmra.mrb[116].mxu1 %vm421_vm1, %v5103_v47  ;;  %v554_v47 = vadd.f32 %v553_v44, %v5290_v29 }
 0x105   : > { %v4382_v12 = vpop.eup %4381  ;;  %v5400_v42 = vmul.f32 %v1782_v55, %v5319_v53  ;;  %4405 = vtanh.f32 %v5397_v0  ;;  %v745_v53 = vadd.f32 %v744_v38, %v5303_v32  ;;  %1053 = vmatprep.mubr.bf16.mxu0 %v4892_v4  ;;  %1246 = vmatprep.mubr.bf16.mxu1 %v4892_v4  ;;  %v747_v41 = vadd.f32 %v746_v50, %v5293_v30 }
 0x106   : > { %v4384_v1 = vpop.eup %4383  ;;  %v1789_v2 = vadd.f32 1.0, %v4382_v12  ;;  %v5410_v5 = vmul.f32 %v1787_v63, %v5324_v56  ;;  %4407 = vtanh.f32 %v5403_v3  ;;  %v5433_v35 = vmul.f32 0.5, %v554_v47 }
 0x107   : > { %v4386_v52 = vpop.eup %4385  ;;  %v1788_v9 = vadd.f32 1.0, %v4384_v1  ;;  %v5426_v26 = vmul.f32 0.5, %v745_v53  ;;  %v559_v27 = vpop.f32.mrb[12].mxu0  ;;  %v556_v12 = vadd.f32 %v555_v61, %v5300_v31  ;;  %v5450_v50 = vmul.f32 0.5, %v747_v41 }
 0x108   : > { %v4388_v10 = vpop.eup %4387  ;;  %v5417_v11 = vmul.f32 %v1789_v2, %v5331_v57  ;;  %v1790_v19 = vadd.f32 1.0, %v4386_v52  ;;  %v752_v46 = vpop.f32.mrb[12].mxu1  ;;  %v560_v61 = vadd.f32 %v559_v27, %v5290_v29 }
 0x109   : > { %v4390_v56 = vpop.eup %4389  ;;  %v5424_v22 = vmul.f32 %v1788_v9, %v5336_v58  ;;  %v1795_v24 = vadd.f32 1.0, %v4388_v10  ;;  %v561_v36 = vpop.f32.mrb[13].mxu0  ;;  %4409 = vtanh.f32 %v5426_v26  ;;  %v749_v9 = vadd.f32 %v748_v45, %v5303_v32 }
 0x10a   : > { %v4392_v6 = vpop.eup %4391  ;;  %v5431_v33 = vmul.f32 %v1790_v19, %v5339_v59  ;;  %v1797_v34 = vadd.f32 1.0, %v4390_v56  ;;  %v754_v37 = vpop.f32.mrb[13].mxu1  ;;  %4411 = vtanh.f32 %v5433_v35  ;;  %v5456_v19 = vmul.f32 0.5, %v556_v12 }
 0x10b   : > { %v4394_v38 = vpop.eup %4393  ;;  %v5436_v58 = vmul.f32 %v1795_v24, %v5348_v7  ;;  %v1796_v39 = vadd.f32 1.0, %v4392_v6  ;;  %v563_v43 = vpop.f32.mrb[14].mxu0  ;;  %4413 = vtanh.f32 %v5450_v50 }
 0x10c   : > { %v756_v44 = vpop.f32.mrb[14].mxu1  ;;  %v4396_v51 = vpop.eup %4395  ;;  %v5441_v59 = vmul.f32 %v1797_v34, %v5350_v8  ;;  %v1798_v55 = vadd.f32 1.0, %v4394_v38  ;;  %3745 = vmatmul.mubr.msk.bf16.gmra.mrb[120].mxu0 %vm421_vm1, %v5112_v48  ;;  %3762 = vmatmul.mubr.msk.bf16.gmra.mrb[120].mxu1 %vm421_vm1, %v5112_v48  ;;  %4415 = vtanh.f32 %v5456_v19  ;;  %v5475_v48 = vmul.f32 0.5, %v560_v61 }
 0x10d   : > { %v565_v63 = vpop.f32.mrb[15].mxu0  ;;  %v5445_v1 = vpop.f32.mrb[15].mxu1  ;;  %v5448_v2 = vmul.f32 %v1796_v39, %v5354_v13  ;;  %v1803_v52 = vadd.f32 1.0, %v4396_v51  ;;  %1063 = vmatprep.mubr.bf16.mxu0 %v4892_v4  ;;  %1256 = vmatprep.mubr.bf16.mxu1 %v4892_v4  ;;  %v753_v38 = vadd.f32 %v752_v46, %v5293_v30  ;;  %v755_v46 = vadd.f32 %v754_v37, %v5303_v32 }
 0x10e   : > { %v4398_v7 = vpop.eup %4397  ;;  %v5454_v8 = vmul.f32 %v1798_v55, %v5356_v14  ;;  %v5467_v14 = vmul.f32 0.5, %v749_v9  ;;  %v562_v55 = vadd.f32 %v561_v36, %v5300_v31  ;;  %v757_v36 = vadd.f32 %v756_v44, %v5293_v30 }
 0x10f   : > { %v4400_v53 = vpop.eup %4399  ;;  %v1805_v10 = vadd.f32 1.0, %v4398_v7  ;;  %v5464_v47 = vmul.f32 %v1803_v52, %v5360_v20  ;;  %v569_v39 = vpop.f32.mrb[16].mxu0  ;;  %v5490_v9 = vmul.f32 0.5, %v753_v38  ;;  %v5504_v37 = vmul.f32 0.5, %v755_v46 }
 0x110   : > { %v4402_v13 = vpop.eup %4401  ;;  %v1804_v45 = vadd.f32 1.0, %v4400_v53  ;;  %4417 = vtanh.f32 %v5467_v14  ;;  %v762_v4 = vpop.f32.mrb[16].mxu1  ;;  %v5496_v61 = vmul.f32 0.5, %v562_v55 }
 0x111   : > { %v4404_v56 = vpop.eup %4403  ;;  %v5472_v24 = vmul.f32 %v1805_v10, %v5369_v23  ;;  %v1806_v27 = vadd.f32 1.0, %v4402_v13  ;;  %4419 = vtanh.f32 %v5475_v48  ;;  %v571_v12 = vpop.f32.mrb[17].mxu0  ;;  %v564_v13 = vadd.f32 %v563_v43, %v5290_v29 }
 0x112   : > { %v4406_v20 = vpop.eup %4405  ;;  %v5478_v6 = vmul.f32 %v1804_v45, %v5374_v25  ;;  %v1811_v34 = vadd.f32 1.0, %v4404_v56  ;;  %v764_v7 = vpop.f32.mrb[17].mxu1  ;;  %4421 = vtanh.f32 %v5490_v9  ;;  %v5510_v43 = vmul.f32 0.5, %v757_v36 }
 0x113   : > { %v4408_v41 = vpop.eup %4407  ;;  %v5483_v23 = vmul.f32 %v1806_v27, %v5377_v28  ;;  %v1813_v51 = vadd.f32 1.0, %v4406_v20  ;;  %v573_v53 = vpop.f32.mrb[18].mxu0  ;;  %v566_v20 = vadd.f32 %v565_v63, %v5300_v31  ;;  %4423 = vtanh.f32 %v5496_v61 }
 0x114   : > { %v5488_v25 = vmul.f32 %v1811_v34, %v5391_v60  ;;  %v1812_v52 = vadd.f32 1.0, %v4408_v41  ;;  %v766_v10 = vpop.f32.mrb[18].mxu1  ;;  %v575_v45 = vpop.f32.mrb[19].mxu0  ;;  %v5508_v38 = vmul.f32 0.5, %v564_v13  ;;  %3746 = vmatmul.mubr.msk.bf16.gmra.mrb[124].mxu0 %vm421_vm1, %v5121_v49  ;;  %3763 = vmatmul.mubr.msk.bf16.gmra.mrb[124].mxu1 %vm421_vm1, %v5121_v49  ;;  %4425 = vtanh.f32 %v5504_v37 }
 0x115   : > { %v5494_v28 = vmul.f32 %v1813_v51, %v5397_v0  ;;  %v768_v56 = vpop.f32.mrb[19].mxu1  ;;  %v4410_v60 = vpop.eup %4409  ;;  %v5517_v44 = vmul.f32 0.5, %v566_v20  ;;  %v759_v63 = vadd.f32 %v5445_v1, %v5303_v32  ;;  %v570_v51 = vadd.f32 %v569_v39, %v5290_v29 }
 0x116   : > { %v5501_v27 = vmul.f32 %v1812_v52, %v5403_v3  ;;  %v4412_v0 = vpop.eup %4411  ;;  %v1814_v34 = vadd.f32 1.0, %v4410_v60  ;;  %4427 = vtanh.f32 %v5508_v38  ;;  %v763_v55 = vadd.f32 %v762_v4, %v5293_v30 }
 0x117   : > { %8584 = vst [vmem:[#allocation6_spill] sm:$0xff] %v5494_v28  ;;  %v1819_v3 = vadd.f32 1.0, %v4412_v0  ;;  %v4414_v52 = vpop.eup %4413  ;;  %4429 = vtanh.f32 %v5510_v43  ;;  %v5531_v46 = vmul.f32 0.5, %v759_v63  ;;  %v572_v13 = vadd.f32 %v571_v12, %v5300_v31  ;;  %v579_v1 = vpop.f32.mrb[20].mxu0 }
 0x118   : > { %v5522_v41 = vmul.f32 %v1814_v34, %v5426_v26  ;;  %v5534_v36 = vpop.f32.mrb[20].mxu1  ;;  %v4416_v26 = vpop.eup %4415  ;;  %v1821_v60 = vadd.f32 1.0, %v4414_v52  ;;  %4431 = vtanh.f32 %v5517_v44  ;;  %v5537_v39 = vmul.f32 0.5, %v570_v51 }
 0x119   : > { %v5528_v49 = vmul.f32 %v1819_v3, %v5433_v35  ;;  %v5539_v4 = vmul.f32 0.5, %v763_v55  ;;  %v5541_v20 = vpop.f32.mrb[21].mxu0  ;;  %v5543_v35 = vpop.f32.mrb[21].mxu1  ;;  %v1820_v34 = vadd.f32 1.0, %v4416_v26  ;;  %4433 = vtanh.f32 %v5531_v46 }
 0x11a   : > { %v4418_v0 = vpop.eup %4417  ;;  %v5546_v12 = vmul.f32 0.5, %v572_v13  ;;  %v765_v3 = vadd.f32 %v764_v7, %v5303_v32  ;;  %v5549_v63 = vpop.f32.mrb[22].mxu0  ;;  %v5554_v55 = vmul.f32 %v1821_v60, %v5450_v50  ;;  %4435 = vtanh.f32 %v5537_v39 }
 0x11b   : > { %8585 = vst [vmem:[#allocation7_spill] sm:$0xff] %v5528_v49  ;;  %v5551_v52 = vpop.f32.mrb[22].mxu1  ;;  %v4420_v51 = vpop.eup %4419  ;;  %v1822_v57 = vadd.f32 1.0, %v4418_v0  ;;  %v574_v21 = vadd.f32 %v573_v53, %v5290_v29  ;;  %v5563_v13 = vmul.f32 %v1820_v34, %v5456_v19  ;;  %4437 = vtanh.f32 %v5539_v4 }
 0x11c   : > { %8586 = vst [vmem:[#allocation8_spill] sm:$0xff] %v5554_v55  ;;  %v5558_v26 = vpop.f32.mrb[23].mxu0  ;;  %v5560_v18 = vpop.f32.mrb[23].mxu1  ;;  %v1827_v7 = vadd.f32 1.0, %v4420_v51  ;;  %v5566_v16 = vmul.f32 0.5, %v765_v3  ;;  %4439 = vtanh.f32 %v5546_v12  ;;  %v767_v53 = vadd.f32 %v766_v10, %v5293_v30 }
 0x11d   : > { %v5569_v50 = vmul.f32 %v1822_v57, %v5467_v14  ;;  %v5572_v60 = vmul.f32 0.5, %v574_v21  ;;  %v4422_v0 = vpop.eup %4421  ;;  %v576_v19 = vadd.f32 %v575_v45, %v5300_v31  ;;  %v769_v34 = vadd.f32 %v768_v56, %v5303_v32  ;;  %v4340_v14 = vld [vmem:[%s8573_s3 + $0x100] sm:$0xff]  }
 0x11e   : > { %v5576_v17 = vmul.f32 %v1827_v7, %v5475_v48  ;;  %4441 = vtanh.f32 %v5566_v16  ;;  %v4424_v3 = vpop.eup %4423  ;;  %v1829_v51 = vadd.f32 1.0, %v4422_v0  ;;  %v5582_v57 = vmul.f32 0.5, %v767_v53  ;;  %v4342_v48 = vld [vmem:[%s8573_s3 + $0x180] sm:$0xff]  }
 0x11f   : > { %4443 = vtanh.f32 %v5572_v60  ;;  %v2292_v21 = vpack.c.bf16 %v5424_v22, %v5394_v62  ;;  %v4426_v10 = vpop.eup %4425  ;;  %v1828_v45 = vadd.f32 1.0, %v4424_v3  ;;  %v5592_v56 = vmul.f32 0.5, %v576_v19  ;;  %v5598_v0 = vpop.f32.mrb[24].mxu0  ;;  %v4343_v22 = vld [vmem:[%s8573_s3 + $0x148] sm:$0xff]  }
 0x120   : > { %8587 = vst [vmem:[#allocation9_spill] sm:$0xff] %v5576_v17  ;;  %v5594_v7 = vmul.f32 0.5, %v769_v34  ;;  %v2294_v53 = vpack.c.bf16 %v5431_v33, %v5400_v42  ;;  %v5600_v62 = vpop.f32.mrb[24].mxu1  ;;  %v4428_v15 = vpop.eup %4427  ;;  %v5606_v17 = vmul.f32 %v1829_v51, %v5490_v9  ;;  %v1830_v3 = vadd.f32 1.0, %v4426_v10  ;;  %v4345_v33 = vld [vmem:[%s8573_s3 + $0x1c8] sm:$0xff]  }
 0x121   : > { %4445 = vtanh.f32 %v5582_v57  ;;  %2970 = vmatprep.mubr.bf16.mxu0 %v2292_v21  ;;  %v580_v19 = vadd.f32 %v579_v1, %v5290_v29  ;;  %v5610_v34 = vpop.f32.mrb[25].mxu0  ;;  %v5612_v42 = vpop.f32.mrb[25].mxu1  ;;  %v5618_v28 = vmul.f32 %v1828_v45, %v5496_v61  ;;  %v1835_v9 = vadd.f32 1.0, %v4428_v15  ;;  %v4344_v45 = vld [vmem:[%s8573_s3 + $0x108] sm:$0xff]  }
 0x122   : > { %8588 = vst [vmem:[#allocation10_spill] sm:$0xff] %v5606_v17  ;;  %v4430_v55 = vpop.eup %4429  ;;  %4447 = vtanh.f32 %v5592_v56  ;;  %3131 = vmatprep.mubr.bf16.mxu1 %v2294_v53  ;;  %v773_v51 = vadd.f32 %v5534_v36, %v5293_v30  ;;  %v8589_v1 = vpack.c.bf16 %v5410_v5, %v5383_v40  ;;  %v5626_v21 = vpop.f32.mrb[26].mxu0  ;;  %v5631_v49 = vmul.f32 %v1830_v3, %v5504_v37 }
 0x123   : > { %v5628_v10 = vpop.f32.mrb[26].mxu1  ;;  %v4432_v17 = vpop.eup %4431  ;;  %v1837_v61 = vadd.f32 1.0, %v4430_v55  ;;  %4449 = vtanh.f32 %v5594_v7  ;;  %v5634_v15 = vmul.f32 0.5, %v580_v19  ;;  %v8590_v36 = vpack.c.bf16 %v5417_v11, %v5388_v54  ;;  %v4346_v11 = vld [vmem:[%s8573_s3 + $0x188] sm:$0xff]  }
 0x124   : > { %2971 = vmatmul.mubr.bf16.vlgmr.msra.gmra.mrb[128].mxu0 %v8589_v1  ;;  %v5639_v40 = vpop.f32.mrb[27].mxu0  ;;  %v5641_v5 = vpop.f32.mrb[27].mxu1  ;;  %v5647_v55 = vmul.f32 %v1835_v9, %v5508_v38  ;;  %v1836_v53 = vadd.f32 1.0, %v4432_v17  ;;  %v5649_v3 = vmul.f32 0.5, %v773_v51  ;;  %v582_v54 = vadd.f32 %v5541_v20, %v5300_v31 }
 0x125   : > { %3132 = vmatmul.mubr.bf16.vlgmr.msra.gmra.mrb[128].mxu1 %v8590_v36  ;;  %4056 = vmatpush3.bf16.msra.mxu0 %v4340_v14  ;;  %v4434_v37 = vpop.eup %4433  ;;  %v4347_v14 = vld [vmem:[%s8573_s3 + $0x150] sm:$0xff]   ;;  %v5660_v38 = vmul.f32 %v1837_v61, %v5510_v43  ;;  %4451 = vtanh.f32 %v5634_v15  ;;  %v775_v20 = vadd.f32 %v5543_v35, %v5303_v32 }
 0x126   : > { %4168 = vmatpush3.bf16.msra.mxu1 %v4342_v48  ;;  %4057 = vmatprep.subr.bf16.mxu0 %v4343_v22  ;;  %v4436_v19 = vpop.eup %4435  ;;  %v1838_v17 = vadd.f32 1.0, %v4434_v37  ;;  %v4349_v48 = vld [vmem:[%s8573_s3 + $0x1d0] sm:$0xff]   ;;  %v5669_v9 = vmul.f32 %v1836_v53, %v5517_v44  ;;  %4453 = vtanh.f32 %v5649_v3  ;;  %v5672_v43 = vmul.f32 0.5, %v582_v54 }
 0x127   : > { %8591 = vst [vmem:[#allocation11_spill] sm:$0xff] %v5660_v38  ;;  %4169 = vmatprep.subr.bf16.mxu1 %v4345_v33  ;;  %v4438_v22 = vpop.eup %4437  ;;  %v1843_v51 = vadd.f32 1.0, %v4436_v19  ;;  %v5677_v35 = vmul.f32 0.5, %v775_v20  ;;  %v584_v33 = vadd.f32 %v5549_v63, %v5290_v29  ;;  %v4348_v44 = vld [vmem:[%s8573_s3 + $0x110] sm:$0xff]   ;;  %v5690_v19 = vpop.f32.mrb[28].mxu0 }
 0x128   : > { %v4440_v1 = vpop.eup %4439  ;;  %v5675_v61 = vmul.f32 %v1838_v17, %v5531_v46  ;;  %v1845_v36 = vadd.f32 1.0, %v4438_v22  ;;  %4455 = vtanh.f32 %v5672_v43  ;;  %v777_v46 = vadd.f32 %v5551_v52, %v5293_v30  ;;  %v5692_v17 = vpop.f32.mrb[28].mxu1  ;;  %v4350_v63 = vld [vmem:[%s8573_s3 + $0x190] sm:$0xff]  }
 0x129   : > { %4058 = vmatpush3.bf16.msra.mxu0 %v4344_v45  ;;  %v4442_v37 = vpop.eup %4441  ;;  %v5685_v53 = vmul.f32 %v1843_v51, %v5537_v39  ;;  %v1844_v54 = vadd.f32 1.0, %v4440_v1  ;;  %v4351_v39 = vld [vmem:[%s8573_s3 + $0x158] sm:$0xff]   ;;  %4457 = vtanh.f32 %v5677_v35  ;;  %v5704_v52 = vmul.f32 0.5, %v584_v33  ;;  %v5706_v51 = vpop.f32.mrb[29].mxu0 }
 0x12a   : > { %4170 = vmatpush3.bf16.msra.mxu1 %v4346_v11  ;;  %4059 = vmatprep.subr.bf16.mxu0 %v4347_v14  ;;  %v4444_v45 = vpop.eup %4443  ;;  %v5701_v20 = vmul.f32 %v1845_v36, %v5539_v4  ;;  %v1846_v22 = vadd.f32 1.0, %v4442_v37  ;;  %v5708_v11 = vpop.f32.mrb[29].mxu1  ;;  %v4353_v14 = vld [vmem:[%s8573_s3 + $0x1d8] sm:$0xff]   ;;  %v5716_v4 = vmul.f32 0.5, %v777_v46  ;;  %v586_v36 = vadd.f32 %v5558_v26, %v5300_v31 }
 0x12b   : > { %8592 = vst [vmem:[#allocation12_spill] sm:$0xff] %v5685_v53  ;;  %4171 = vmatprep.subr.bf16.mxu1 %v4349_v48  ;;  %v5714_v1 = vmul.f32 %v1844_v54, %v5546_v12  ;;  %v1851_v53 = vadd.f32 1.0, %v4444_v45  ;;  %v5720_v33 = vpop.f32.mrb[30].mxu0  ;;  %v5722_v37 = vpop.f32.mrb[30].mxu1  ;;  %4459 = vtanh.f32 %v5704_v52  ;;  %v779_v12 = vadd.f32 %v5560_v18, %v5303_v32  ;;  %v4352_v26 = vld [vmem:[%s8573_s3 + $0x118] sm:$0xff]  }
 0x12c   : > { %8593 = vst [vmem:[#allocation13_spill] sm:$0xff] %v5701_v20  ;;  %v4446_v20 = vpop.eup %4445  ;;  %v5725_v48 = vmul.f32 %v1846_v22, %v5566_v16  ;;  %v2300_v54 = vpack.c.bf16 %v5478_v6, %v5448_v2  ;;  %v5732_v46 = vpop.f32.mrb[31].mxu0  ;;  %4461 = vtanh.f32 %v5716_v4  ;;  %v5743_v18 = vmul.f32 0.5, %v586_v36  ;;  %v4354_v2 = vld [vmem:[%s8573_s3 + $0x198] sm:$0xff]   ;;  %v4355_v6 = vld [vmem:[%s8573_s3 + $0x160] sm:$0xff]  }
 0x12d   : > { %8594 = vst [vmem:[#allocation14_spill] sm:$0xff] %v5714_v1  ;;  %v5734_v45 = vpop.f32.mrb[31].mxu1  ;;  %4060 = vmatpush3.bf16.msra.mxu0 %v4348_v44  ;;  %v4448_v1 = vpop.eup %4447  ;;  %v5740_v16 = vmul.f32 %v1851_v53, %v5572_v60  ;;  %v1853_v22 = vadd.f32 1.0, %v4446_v20  ;;  %v5751_v38 = vmul.f32 0.5, %v779_v12  ;;  %v2302_v60 = vpack.c.bf16 %v5483_v23, %v5454_v8 }
 0x12e   : > { %8595 = vst [vmem:[#allocation15_spill] sm:$0xff] %v5725_v48  ;;  %4172 = vmatpush3.bf16.msra.mxu1 %v4350_v63  ;;  %4061 = vmatprep.subr.bf16.mxu0 %v4351_v39  ;;  %v4450_v44 = vpop.eup %4449  ;;  %v1852_v48 = vadd.f32 1.0, %v4448_v1  ;;  %v590_v53 = vadd.f32 %v5598_v0, %v5290_v29  ;;  %v4357_v63 = vld [vmem:[%s8573_s3 + $0x1e0] sm:$0xff]   ;;  %4463 = vtanh.f32 %v5743_v18  ;;  %v783_v1 = vadd.f32 %v5600_v62, %v5293_v30 }
 0x12f   : > { %8596 = vst [vmem:[#allocation16_spill] sm:$0xff] %v5740_v16  ;;  %2978 = vmatprep.mubr.bf16.mxu0 %v2300_v54  ;;  %4173 = vmatprep.subr.bf16.mxu1 %v4353_v14  ;;  %v5761_v39 = vmul.f32 %v1853_v22, %v5582_v57  ;;  %v1854_v20 = vadd.f32 1.0, %v4450_v44  ;;  %v4452_v36 = vpop.eup %4451  ;;  %4465 = vtanh.f32 %v5751_v38  ;;  %v592_v0 = vadd.f32 %v5610_v34, %v5300_v31  ;;  %v4356_v57 = vld [vmem:[%s8573_s3 + $0x120] sm:$0xff]   ;;  %v5784_v54 = vpop.f32.mrb[32].mxu0 }
 0x130   : > { %v5767_v8 = vmul.f32 %v1852_v48, %v5592_v56  ;;  %3139 = vmatprep.mubr.bf16.mxu1 %v2302_v60  ;;  %v5770_v23 = vmul.f32 0.5, %v590_v53  ;;  %v4454_v14 = vpop.eup %4453  ;;  %v1859_v12 = vadd.f32 1.0, %v4452_v36  ;;  %v5780_v56 = vmul.f32 0.5, %v783_v1  ;;  %v5786_v22 = vpop.f32.mrb[32].mxu1  ;;  %v4358_v34 = vld [vmem:[%s8573_s3 + $0x1a0] sm:$0xff]  }
 0x131   : > { %8597 = vst [vmem:[#allocation17_spill] sm:$0xff] %v5761_v39  ;;  %4062 = vmatpush3.bf16.msra.mxu0 %v4352_v26  ;;  %v5778_v62 = vmul.f32 %v1854_v20, %v5594_v7  ;;  %v785_v48 = vadd.f32 %v5612_v42, %v5303_v32  ;;  %v4359_v7 = vld [vmem:[%s8573_s3 + $0x168] sm:$0xff]   ;;  %v1861_v26 = vadd.f32 1.0, %v4454_v14  ;;  %v5795_v44 = vmul.f32 0.5, %v592_v0  ;;  %v5799_v60 = vpop.f32.mrb[33].mxu0 }
 0x132   : > { %4174 = vmatpush3.bf16.msra.mxu1 %v4354_v2  ;;  %4063 = vmatprep.subr.bf16.mxu0 %v4355_v6  ;;  %4467 = vtanh.f32 %v5770_v23  ;;  %v594_v42 = vadd.f32 %v5626_v21, %v5290_v29  ;;  %v5801_v2 = vpop.f32.mrb[33].mxu1  ;;  %v4361_v6 = vld [vmem:[%s8573_s3 + $0x1e8] sm:$0xff]   ;;  %v4456_v53 = vpop.eup %4455  ;;  %v5807_v20 = vmul.f32 %v1859_v12, %v5634_v15  ;;  %v787_v21 = vadd.f32 %v5628_v10, %v5293_v30 }
 0x133   : > { %4175 = vmatprep.subr.bf16.mxu1 %v4357_v63  ;;  %4469 = vtanh.f32 %v5780_v56  ;;  %v5810_v1 = vmul.f32 0.5, %v785_v48  ;;  %v5814_v36 = vpop.f32.mrb[34].mxu0  ;;  %v5816_v0 = vpop.f32.mrb[34].mxu1  ;;  %v5819_v14 = vmul.f32 %v1861_v26, %v5649_v3  ;;  %v1860_v39 = vadd.f32 1.0, %v4456_v53  ;;  %v4360_v3 = vld [vmem:[%s8573_s3 + $0x128] sm:$0xff]  }
 0x134   : > { %8598 = vst [vmem:[#allocation18_spill] sm:$0xff] %v5807_v20  ;;  %v4458_v63 = vpop.eup %4457  ;;  %4471 = vtanh.f32 %v5795_v44  ;;  %v5822_v15 = vmul.f32 0.5, %v594_v42  ;;  %v5824_v12 = vpop.f32.mrb[35].mxu0  ;;  %v5829_v10 = vmul.f32 0.5, %v787_v21  ;;  %v596_v16 = vadd.f32 %v5639_v40, %v5300_v31  ;;  %v4362_v26 = vld [vmem:[%s8573_s3 + $0x1a8] sm:$0xff]  }
 0x135   : > { %8599 = vst [vmem:[#allocation19_spill] sm:$0xff] %v5819_v14  ;;  %v5826_v48 = vpop.f32.mrb[35].mxu1  ;;  %4064 = vmatpush3.bf16.msra.mxu0 %v4356_v57  ;;  %v1862_v20 = vadd.f32 1.0, %v4458_v63  ;;  %4473 = vtanh.f32 %v5810_v1  ;;  %v4460_v42 = vpop.eup %4459  ;;  %v5840_v57 = vmul.f32 %v1860_v39, %v5672_v43  ;;  %v789_v53 = vadd.f32 %v5641_v5, %v5303_v32 }
 0x136   : > { %4176 = vmatpush3.bf16.msra.mxu1 %v4358_v34  ;;  %4065 = vmatprep.subr.bf16.mxu0 %v4359_v7  ;;  %4475 = vtanh.f32 %v5822_v15  ;;  %v2299_v40 = vpack.c.bf16 %v5464_v47, %v5436_v58  ;;  %v4462_v34 = vpop.eup %4461  ;;  %v1867_v21 = vadd.f32 1.0, %v4460_v42  ;;  %v5851_v63 = vmul.f32 0.5, %v596_v16 }
 0x137   : > { %4177 = vmatprep.subr.bf16.mxu1 %v4361_v6  ;;  %v5848_v7 = vmul.f32 %v1862_v20, %v5677_v35  ;;  %4477 = vtanh.f32 %v5829_v10  ;;  %v1869_v43 = vadd.f32 1.0, %v4462_v34  ;;  %v5853_v39 = vmul.f32 0.5, %v789_v53  ;;  %v5867_v20 = vpop.f32.mrb[36].mxu0  ;;  %v5869_v42 = vpop.f32.mrb[36].mxu1 }
 0x138   : > { %2979 = vmatmul.mubr.bf16.gmra.mrb[132].mxu0 %v2299_v40  ;;  %v2301_v5 = vpack.c.bf16 %v5472_v24, %v5441_v59  ;;  %v2308_v58 = vpack.c.bf16 %v5563_v13, %v5501_v27  ;;  %v4464_v47 = vpop.eup %4463  ;;  %v5860_v6 = vmul.f32 %v1867_v21, %v5704_v52  ;;  %4479 = vtanh.f32 %v5851_v63  ;;  %v5877_v13 = vpop.f32.mrb[37].mxu0 }
 0x139   : > { %v2310_v35 = vpack.c.bf16 %v5569_v50, %v5522_v41  ;;  %v600_v16 = vadd.f32 %v5690_v19, %v5290_v29  ;;  %4066 = vmatpush3.bf16.msra.mxu0 %v4360_v3  ;;  %v4466_v59 = vpop.eup %4465  ;;  %v5872_v24 = vmul.f32 %v1869_v43, %v5716_v4  ;;  %v1868_v27 = vadd.f32 1.0, %v4464_v47  ;;  %v5879_v50 = vpop.f32.mrb[37].mxu1 }
 0x13a   : > { %8600 = vst [vmem:[#allocation20_spill] sm:$0xff] %v5860_v6  ;;  %4178 = vmatpush3.bf16.msra.mxu1 %v4362_v26  ;;  %4481 = vtanh.f32 %v5853_v39  ;;  %2986 = vmatprep.mubr.bf16.mxu0 %v2308_v58  ;;  %v793_v41 = vadd.f32 %v5692_v17, %v5293_v30  ;;  %v1870_v19 = vadd.f32 1.0, %v4466_v59  ;;  %v602_v4 = vadd.f32 %v5706_v51, %v5300_v31  ;;  %v5887_v26 = vpop.f32.mrb[38].mxu0  ;;  %v5889_v53 = vpop.f32.mrb[38].mxu1 }
 0x13b   : > { %8601 = vst [vmem:[#allocation21_spill] sm:$0xff] %v5872_v24  ;;  %3140 = vmatmul.mubr.bf16.gmra.mrb[132].mxu1 %v2301_v5  ;;  %v5881_v52 = vmul.f32 0.5, %v600_v16  ;;  %v795_v3 = vadd.f32 %v5708_v11, %v5303_v32  ;;  %v5892_v17 = vmul.f32 %v1868_v27, %v5743_v18  ;;  %v604_v21 = vadd.f32 %v5720_v33, %v5290_v29  ;;  %v5900_v51 = vpop.f32.mrb[39].mxu0  ;;  %v5902_v5 = vpop.f32.mrb[39].mxu1 }
 0x13c   : > { %3147 = vmatprep.mubr.bf16.mxu1 %v2310_v35  ;;  %v4468_v40 = vpop.eup %4467  ;;  %v5894_v34 = vmul.f32 0.5, %v793_v41  ;;  %v797_v43 = vadd.f32 %v5722_v37, %v5293_v30  ;;  %v5905_v58 = vmul.f32 %v1870_v19, %v5751_v38  ;;  %v5908_v18 = vmul.f32 0.5, %v602_v4 }
 0x13d   : > { %v4470_v11 = vpop.eup %4469  ;;  %v1875_v47 = vadd.f32 1.0, %v4468_v40  ;;  %4483 = vtanh.f32 %v5881_v52  ;;  %v5911_v33 = vmul.f32 0.5, %v795_v3  ;;  %v5913_v37 = vmul.f32 0.5, %v604_v21  ;;  %v4364_v21 = vld [vmem:[%s8573_s3 + $0x130] sm:$0xff]  }
 0x13e   : > { %v4472_v35 = vpop.eup %4471  ;;  %v1877_v16 = vadd.f32 1.0, %v4470_v11  ;;  %4485 = vtanh.f32 %v5894_v34  ;;  %v5919_v38 = vmul.f32 0.5, %v797_v43  ;;  %v606_v3 = vadd.f32 %v5732_v46, %v5300_v31  ;;  %v4365_v43 = vld [vmem:[%s8573_s3 + $0x1f0] sm:$0xff]  }
 0x13f   : > { %v4474_v59 = vpop.eup %4473  ;;  %v5916_v27 = vmul.f32 %v1875_v47, %v5770_v23  ;;  %v1876_v41 = vadd.f32 1.0, %v4472_v35  ;;  %4487 = vtanh.f32 %v5908_v18  ;;  %v4363_v23 = vld [vmem:[%s8573_s3 + $0x170] sm:$0xff]   ;;  %v799_v46 = vadd.f32 %v5734_v45, %v5303_v32  ;;  %v5942_v35 = vpop.f32.mrb[40].mxu0  ;;  %4179 = vmatprep.subr.bf16.mxu1 %v4365_v43 }
 0x140   : > { %v4476_v19 = vpop.eup %4475  ;;  %v5922_v4 = vmul.f32 %v1877_v16, %v5780_v56  ;;  %v1878_v40 = vadd.f32 1.0, %v4474_v59  ;;  %4489 = vtanh.f32 %v5911_v33  ;;  %v5944_v16 = vpop.f32.mrb[40].mxu1  ;;  %4067 = vmatprep.subr.bf16.mxu0 %v4363_v23 }
 0x141   : > { %8602 = vst [vmem:[#allocation22_spill] sm:$0xff] %v5916_v27  ;;  %v4478_v56 = vpop.eup %4477  ;;  %v5937_v11 = vmul.f32 %v1876_v41, %v5795_v44  ;;  %v1883_v47 = vadd.f32 1.0, %v4476_v19  ;;  %4491 = vtanh.f32 %v5913_v37  ;;  %v5950_v27 = vmul.f32 0.5, %v606_v3  ;;  %v5952_v44 = vpop.f32.mrb[41].mxu0  ;;  %4068 = vmatpush3.bf16.msra.mxu0 %v4364_v21 }
 0x142   : > { %8603 = vst [vmem:[#allocation23_spill] sm:$0xff] %v5922_v4  ;;  %v5947_v59 = vmul.f32 %v1878_v40, %v5810_v1  ;;  %v1885_v4 = vadd.f32 1.0, %v4478_v56  ;;  %4493 = vtanh.f32 %v5919_v38  ;;  %v5954_v41 = vpop.f32.mrb[41].mxu1  ;;  %v4480_v19 = vpop.eup %4479  ;;  %v8607_v1 = vld [vmem:[#allocation7_spill] sm:$0xff]  ;;  %v8608_v56 = vld [vmem:[#allocation6_spill] sm:$0xff]  ;;  %v2318_v21 = vpack.c.bf16 %v5675_v61, %v5631_v49 }
 0x143   : > { %8604 = vst [vmem:[#allocation24_spill] sm:$0xff] %v5937_v11  ;;  %v5957_v45 = vmul.f32 %v1883_v47, %v5822_v15  ;;  %v5959_v11 = vmul.f32 0.5, %v799_v46  ;;  %v2307_v40 = vpack.c.bf16 %v8607_v1, %v5488_v25  ;;  %v5965_v3 = vpop.f32.mrb[42].mxu0  ;;  %v5967_v14 = vpop.f32.mrb[42].mxu1  ;;  %v1884_v43 = vadd.f32 1.0, %v4480_v19 }
 0x144   : > { %8605 = vst [vmem:[#allocation25_spill] sm:$0xff] %v5947_v59  ;;  %v8609_v59 = vld [vmem:[#allocation8_spill] sm:$0xff]  ;;  %v4482_v6 = vpop.eup %4481  ;;  %v5970_v23 = vmul.f32 %v1885_v4, %v5829_v10  ;;  %4495 = vtanh.f32 %v5950_v27  ;;  %v2316_v15 = vpack.c.bf16 %v5669_v9, %v5618_v28  ;;  %v5975_v47 = vpop.f32.mrb[43].mxu0  ;;  %v610_v10 = vadd.f32 %v5784_v54, %v5290_v29 }
 0x145   : > { %8606 = vst [vmem:[#allocation26_spill] sm:$0xff] %v5957_v45  ;;  %v2309_v24 = vpack.c.bf16 %v8609_v59, %v8608_v56  ;;  %v5977_v25 = vpop.f32.mrb[43].mxu1  ;;  %v1886_v46 = vadd.f32 1.0, %v4482_v6  ;;  %4497 = vtanh.f32 %v5959_v11  ;;  %2987 = vmatmul.mubr.bf16.gmra.mrb[136].mxu0 %v2307_v40  ;;  %v4366_v4 = vld [vmem:[%s8573_s3 + $0x1b0] sm:$0xff]   ;;  %v5988_v28 = vmul.f32 %v1884_v43, %v5851_v63 }
 0x146   : > { %8610 = vst [vmem:[#allocation7_spill] sm:$0xff] %v5970_v23  ;;  %2994 = vmatprep.mubr.bf16.mxu0 %v2316_v15  ;;  %v803_v9 = vadd.f32 %v5786_v22, %v5293_v30  ;;  %v612_v6 = vadd.f32 %v5799_v60, %v5300_v31  ;;  %v805_v49 = vadd.f32 %v5801_v2, %v5303_v32 }
 0x147   : > { %3148 = vmatmul.mubr.bf16.gmra.mrb[136].mxu1 %v2309_v24  ;;  %v4484_v61 = vpop.eup %4483  ;;  %v5997_v54 = vmul.f32 %v1886_v46, %v5853_v39  ;;  %v5999_v24 = vmul.f32 0.5, %v610_v10  ;;  %v614_v63 = vadd.f32 %v5814_v36, %v5290_v29  ;;  %v807_v59 = vadd.f32 %v5816_v0, %v5293_v30  ;;  %v6016_v36 = vpop.f32.mrb[44].mxu0 }
 0x148   : > { %3155 = vmatprep.mubr.bf16.mxu1 %v2318_v21  ;;  %4180 = vmatpush3.bf16.msra.mxu1 %v4366_v4  ;;  %v4486_v22 = vpop.eup %4485  ;;  %v1891_v19 = vadd.f32 1.0, %v4484_v61  ;;  %v6005_v60 = vmul.f32 0.5, %v803_v9  ;;  %v6007_v1 = vmul.f32 0.5, %v612_v6  ;;  %v6009_v2 = vmul.f32 0.5, %v805_v49  ;;  %v6018_v0 = vpop.f32.mrb[44].mxu1 }
 0x149   : > { %v4488_v39 = vpop.eup %4487  ;;  %v1893_v40 = vadd.f32 1.0, %v4486_v22  ;;  %4499 = vtanh.f32 %v5999_v24  ;;  %v6012_v56 = vmul.f32 0.5, %v614_v63  ;;  %v6014_v43 = vmul.f32 0.5, %v807_v59  ;;  %v6026_v4 = vpop.f32.mrb[45].mxu0 }
 0x14a   : > { %v4490_v15 = vpop.eup %4489  ;;  %v6021_v46 = vmul.f32 %v1891_v19, %v5881_v52  ;;  %v1892_v21 = vadd.f32 1.0, %v4488_v39  ;;  %4501 = vtanh.f32 %v6005_v60  ;;  %v616_v10 = vadd.f32 %v5824_v12, %v5300_v31  ;;  %v6028_v9 = vpop.f32.mrb[45].mxu1 }
 0x14b   : > { %v4492_v6 = vpop.eup %4491  ;;  %v6031_v49 = vmul.f32 %v1893_v40, %v5894_v34  ;;  %v1894_v61 = vadd.f32 1.0, %v4490_v15  ;;  %4503 = vtanh.f32 %v6007_v1  ;;  %v809_v52 = vadd.f32 %v5826_v48, %v5303_v32  ;;  %v6036_v63 = vpop.f32.mrb[46].mxu0 }
 0x14c   : > { %8611 = vst [vmem:[#allocation6_spill] sm:$0xff] %v6021_v46  ;;  %v6038_v59 = vpop.f32.mrb[46].mxu1  ;;  %v4494_v22 = vpop.eup %4493  ;;  %v6041_v12 = vmul.f32 %v1892_v21, %v5908_v18  ;;  %v1899_v19 = vadd.f32 1.0, %v4492_v6  ;;  %4505 = vtanh.f32 %v6009_v2  ;;  %v6044_v39 = vmul.f32 0.5, %v616_v10  ;;  %v8615_v21 = vld [vmem:[#allocation9_spill] sm:$0xff]  ;;  %v8616_v6 = vld [vmem:[#allocation10_spill] sm:$0xff] }
 0x14d   : > { %8612 = vst [vmem:[#allocation8_spill] sm:$0xff] %v6031_v49  ;;  %v6046_v34 = vpop.f32.mrb[47].mxu0  ;;  %v6048_v40 = vpop.f32.mrb[47].mxu1  ;;  %v6051_v15 = vmul.f32 %v1894_v61, %v5911_v33  ;;  %v1901_v48 = vadd.f32 1.0, %v4494_v22  ;;  %4507 = vtanh.f32 %v6012_v56  ;;  %v6054_v49 = vmul.f32 0.5, %v809_v52  ;;  %v8619_v52 = vld [vmem:[#allocation14_spill] sm:$0xff] }
 0x14e   : > { %8613 = vst [vmem:[#allocation27_spill] sm:$0xff] %v6041_v12  ;;  %v4496_v46 = vpop.eup %4495  ;;  %v6057_v18 = vmul.f32 %v1899_v19, %v5913_v37  ;;  %4509 = vtanh.f32 %v6014_v43  ;;  %v2315_v10 = vpack.c.bf16 %v5647_v55, %v8615_v21  ;;  %v8617_v12 = vld [vmem:[#allocation11_spill] sm:$0xff]  ;;  %v2324_v22 = vpack.c.bf16 %v5767_v8, %v8619_v52 }
 0x14f   : > { %v2317_v23 = vpack.c.bf16 %v8617_v12, %v8616_v6  ;;  %v4498_v45 = vpop.eup %4497  ;;  %v6065_v33 = vmul.f32 %v1901_v48, %v5919_v38  ;;  %v1900_v61 = vadd.f32 1.0, %v4496_v46  ;;  %4511 = vtanh.f32 %v6044_v39  ;;  %v8620_v19 = vld [vmem:[#allocation15_spill] sm:$0xff]  ;;  %v6086_v48 = vpop.f32.mrb[48].mxu1 }
 0x150   : > { %8614 = vst [vmem:[#allocation28_spill] sm:$0xff] %v6057_v18  ;;  %v1902_v37 = vadd.f32 1.0, %v4498_v45  ;;  %4513 = vtanh.f32 %v6054_v49  ;;  %2995 = vmatmul.mubr.bf16.gmra.mrb[140].mxu0 %v2315_v10  ;;  %v2326_v55 = vpack.c.bf16 %v5778_v62, %v8620_v19  ;;  %v620_v12 = vadd.f32 %v5867_v20, %v5290_v29  ;;  %v6099_v21 = vpop.f32.mrb[49].mxu1  ;;  %v8628_v18 = vld [vmem:[#allocation16_spill] sm:$0xff] }
 0x151   : > { %8618 = vst [vmem:[#allocation9_spill] sm:$0xff] %v6065_v33  ;;  %3156 = vmatmul.mubr.bf16.gmra.mrb[140].mxu1 %v2317_v23  ;;  %v6076_v38 = vmul.f32 %v1900_v61, %v5950_v27  ;;  %3002 = vmatprep.mubr.bf16.mxu0 %v2324_v22  ;;  %v813_v46 = vadd.f32 %v5869_v42, %v5293_v30  ;;  %v6084_v23 = vpop.f32.mrb[48].mxu0  ;;  %8621 = vst [vmem:[#allocation10_spill] sm:$0xff] %v6099_v21 }
 0x152   : > { %v622_v8 = vadd.f32 %v5877_v13, %v5300_v31  ;;  %v815_v45 = vadd.f32 %v5879_v50, %v5303_v32  ;;  %v6089_v62 = vmul.f32 %v1902_v37, %v5959_v11  ;;  %3163 = vmatprep.mubr.bf16.mxu1 %v2326_v55  ;;  %v6091_v20 = vmul.f32 0.5, %v620_v12  ;;  %v6097_v13 = vpop.f32.mrb[49].mxu0 }
 0x153   : > { %v624_v27 = vadd.f32 %v5887_v26, %v5290_v29  ;;  %v817_v42 = vadd.f32 %v5889_v53, %v5293_v30  ;;  %v4500_v50 = vpop.eup %4499  ;;  %v6101_v10 = vmul.f32 0.5, %v813_v46  ;;  %v626_v61 = vadd.f32 %v5900_v51, %v5300_v31  ;;  %v6109_v52 = vpop.f32.mrb[50].mxu0 }
 0x154   : > { %v6103_v6 = vmul.f32 0.5, %v622_v8  ;;  %v6105_v11 = vmul.f32 0.5, %v815_v45  ;;  %8622 = vst [vmem:[#allocation11_spill] sm:$0xff] %v6109_v52  ;;  %v6111_v26 = vpop.f32.mrb[50].mxu1  ;;  %v4502_v22 = vpop.eup %4501  ;;  %v1907_v53 = vadd.f32 1.0, %v4500_v50  ;;  %4515 = vtanh.f32 %v6091_v20 }
 0x155   : > { %8623 = vst [vmem:[#allocation14_spill] sm:$0xff] %v6111_v26  ;;  %v6114_v37 = vmul.f32 0.5, %v624_v27  ;;  %v6116_v19 = vmul.f32 0.5, %v817_v42  ;;  %v6118_v55 = vpop.f32.mrb[51].mxu0  ;;  %v6120_v12 = vpop.f32.mrb[51].mxu1  ;;  %v1909_v8 = vadd.f32 1.0, %v4502_v22  ;;  %4517 = vtanh.f32 %v6101_v10 }
 0x156   : > { %8624 = vst [vmem:[#allocation15_spill] sm:$0xff] %v6118_v55  ;;  %8625 = vst [vmem:[#allocation29_spill] sm:$0xff] %v6120_v12  ;;  %v4504_v46 = vpop.eup %4503  ;;  %v6123_v51 = vmul.f32 0.5, %v626_v61  ;;  %v819_v45 = vadd.f32 %v5902_v5, %v5303_v32  ;;  %v6128_v33 = vmul.f32 %v1907_v53, %v5999_v24  ;;  %4519 = vtanh.f32 %v6103_v6  ;;  %v8627_v42 = vld [vmem:[#allocation12_spill] sm:$0xff]  ;;  %v4367_v5 = vld [vmem:[%s8573_s3 + $0x178] sm:$0xff]  }
 0x157   : > { %v4506_v50 = vpop.eup %4505  ;;  %v1908_v27 = vadd.f32 1.0, %v4504_v46  ;;  %v2323_v55 = vpack.c.bf16 %v8628_v18, %v8627_v42  ;;  %v6134_v22 = vmul.f32 %v1909_v8, %v6005_v60  ;;  %4521 = vtanh.f32 %v6105_v11  ;;  %v4368_v24 = vld [vmem:[%s8573_s3 + $0x138] sm:$0xff]   ;;  %v6160_v21 = vpop.f32.mrb[52].mxu0  ;;  %4069 = vmatprep.subr.bf16.mxu0 %v4367_v5 }
 0x158   : > { %8626 = vst [vmem:[#allocation30_spill] sm:$0xff] %v6128_v33  ;;  %v4508_v12 = vpop.eup %4507  ;;  %v1910_v26 = vadd.f32 1.0, %v4506_v50  ;;  %v6137_v61 = vmul.f32 0.5, %v819_v45  ;;  %v4369_v18 = vld [vmem:[%s8573_s3 + $0x1f8] sm:$0xff]   ;;  %4523 = vtanh.f32 %v6114_v37  ;;  %v2332_v52 = vpack.c.bf16 %v5892_v17, %v5840_v57  ;;  %4070 = vmatpush3.bf16.msra.mxu0 %v4368_v24 }
 0x159   : > { %8629 = vst [vmem:[#allocation12_spill] sm:$0xff] %v6134_v22  ;;  %v4510_v53 = vpop.eup %4509  ;;  %v6149_v60 = vmul.f32 %v1908_v27, %v6007_v1  ;;  %v1915_v46 = vadd.f32 1.0, %v4508_v12  ;;  %3003 = vmatmul.mubr.bf16.gmra.mrb[144].mxu0 %v2323_v55  ;;  %v8630_v8 = vld [vmem:[#allocation13_spill] sm:$0xff]  ;;  %4525 = vtanh.f32 %v6116_v19  ;;  %v6162_v1 = vpop.f32.mrb[52].mxu1  ;;  %4181 = vmatprep.subr.bf16.mxu1 %v4369_v18 }
 0x15a   : > { %v8631_v45 = vld [vmem:[#allocation17_spill] sm:$0xff]  ;;  %v4512_v42 = vpop.eup %4511  ;;  %v6155_v22 = vmul.f32 %v1910_v26, %v6009_v2  ;;  %v1917_v33 = vadd.f32 1.0, %v4510_v53  ;;  %4527 = vtanh.f32 %v6123_v51  ;;  %v2334_v2 = vpack.c.bf16 %v5905_v58, %v5848_v7  ;;  %v6170_v26 = vpop.f32.mrb[53].mxu0  ;;  %3010 = vmatprep.mubr.bf16.mxu0 %v2332_v52 }
 0x15b   : > { %v2325_v50 = vpack.c.bf16 %v8631_v45, %v8630_v8  ;;  %v4514_v55 = vpop.eup %4513  ;;  %v6165_v12 = vmul.f32 %v1915_v46, %v6012_v56  ;;  %v1916_v27 = vadd.f32 1.0, %v4512_v42  ;;  %v6172_v57 = vpop.f32.mrb[53].mxu1  ;;  %4529 = vtanh.f32 %v6137_v61  ;;  %v4370_v24 = vld [vmem:[%s8573_s3 + $0x1b8] sm:$0xff]  }
 0x15c   : > { %v6175_v17 = vmul.f32 %v1917_v33, %v6014_v43  ;;  %v1918_v5 = vadd.f32 1.0, %v4514_v55  ;;  %v630_v56 = vadd.f32 %v5942_v35, %v5290_v29  ;;  %v6180_v18 = vpop.f32.mrb[54].mxu0  ;;  %v6182_v53 = vpop.f32.mrb[54].mxu1  ;;  %v823_v58 = vadd.f32 %v5944_v16, %v5293_v30  ;;  %4182 = vmatpush3.bf16.msra.mxu1 %v4370_v24  ;;  %v8635_v24 = vld [vmem:[#allocation20_spill] sm:$0xff] }
 0x15d   : > { %3164 = vmatmul.mubr.bf16.gmra.mrb[144].mxu1 %v2325_v50  ;;  %v6185_v7 = vmul.f32 %v1916_v27, %v6044_v39  ;;  %v632_v43 = vadd.f32 %v5952_v44, %v5300_v31  ;;  %v825_v33 = vadd.f32 %v5954_v41, %v5303_v32  ;;  %v6193_v52 = vpop.f32.mrb[55].mxu0  ;;  %v6195_v35 = vpop.f32.mrb[55].mxu1  ;;  %v634_v16 = vadd.f32 %v5965_v3, %v5290_v29 }
 0x15e   : > { %8632 = vst [vmem:[#allocation16_spill] sm:$0xff] %v6175_v17  ;;  %3171 = vmatprep.mubr.bf16.mxu1 %v2334_v2  ;;  %v6201_v39 = vmul.f32 %v1918_v5, %v6054_v49  ;;  %v6203_v46 = vmul.f32 0.5, %v630_v56  ;;  %v827_v44 = vadd.f32 %v5967_v14, %v5293_v30  ;;  %v4516_v41 = vpop.eup %4515  ;;  %v6209_v8 = vmul.f32 0.5, %v823_v58 }
 0x15f   : > { %v6211_v45 = vmul.f32 0.5, %v632_v43  ;;  %v6213_v50 = vmul.f32 0.5, %v825_v33  ;;  %v636_v42 = vadd.f32 %v5975_v47, %v5300_v31  ;;  %v4518_v49 = vpop.eup %4517  ;;  %v1923_v55 = vadd.f32 1.0, %v4516_v41  ;;  %v8634_v33 = vld [vmem:[#allocation18_spill] sm:$0xff]  ;;  %v6235_v41 = vpop.f32.mrb[56].mxu1 }
 0x160   : > { %4531 = vtanh.f32 %v6203_v46  ;;  %v6218_v27 = vmul.f32 0.5, %v634_v16  ;;  %v6220_v3 = vmul.f32 0.5, %v827_v44  ;;  %v4520_v14 = vpop.eup %4519  ;;  %v1925_v2 = vadd.f32 1.0, %v4518_v49  ;;  %v6233_v44 = vpop.f32.mrb[56].mxu0  ;;  %8636 = vst [vmem:[#allocation17_spill] sm:$0xff] %v6235_v41 }
 0x161   : > { %4533 = vtanh.f32 %v6209_v8  ;;  %v6223_v5 = vmul.f32 0.5, %v636_v42  ;;  %v829_v56 = vadd.f32 %v5977_v25, %v5303_v32  ;;  %v4522_v58 = vpop.eup %4521  ;;  %v6228_v47 = vmul.f32 %v1923_v55, %v6091_v20  ;;  %v6243_v20 = vpop.f32.mrb[57].mxu0 }
 0x162   : > { %v1924_v43 = vadd.f32 1.0, %v4520_v14  ;;  %4535 = vtanh.f32 %v6211_v45  ;;  %v2331_v16 = vpack.c.bf16 %v8635_v24, %v8634_v33  ;;  %v4524_v49 = vpop.eup %4523  ;;  %v6238_v42 = vmul.f32 %v1925_v2, %v6101_v10  ;;  %8638 = vst [vmem:[#allocation20_spill] sm:$0xff] %v6243_v20  ;;  %v6245_v55 = vpop.f32.mrb[57].mxu1  ;;  %v8641_v10 = vld [vmem:[#allocation21_spill] sm:$0xff] }
 0x163   : > { %8633 = vst [vmem:[#allocation13_spill] sm:$0xff] %v6228_v47  ;;  %v1926_v17 = vadd.f32 1.0, %v4522_v58  ;;  %4537 = vtanh.f32 %v6213_v50  ;;  %v6241_v25 = vmul.f32 0.5, %v829_v56  ;;  %8639 = vst [vmem:[#allocation31_spill] sm:$0xff] %v6245_v55  ;;  %v4526_v14 = vpop.eup %4525  ;;  %v1931_v24 = vadd.f32 1.0, %v4524_v49  ;;  %v8640_v47 = vld [vmem:[#allocation19_spill] sm:$0xff] }
 0x164   : > { %8637 = vst [vmem:[#allocation18_spill] sm:$0xff] %v6238_v42  ;;  %v6248_v33 = vmul.f32 %v1924_v43, %v6103_v6  ;;  %4539 = vtanh.f32 %v6218_v27  ;;  %3011 = vmatmul.mubr.bf16.gmra.mrb[148].mxu0 %v2331_v16  ;;  %v2333_v2 = vpack.c.bf16 %v8641_v10, %v8640_v47  ;;  %v6253_v58 = vpop.f32.mrb[58].mxu0  ;;  %v6255_v42 = vpop.f32.mrb[58].mxu1  ;;  %v1933_v55 = vadd.f32 1.0, %v4526_v14  ;;  %v8643_v6 = vld [vmem:[#allocation24_spill] sm:$0xff] }
 0x165   : > { %8642 = vst [vmem:[#allocation19_spill] sm:$0xff] %v6255_v42  ;;  %v4528_v56 = vpop.eup %4527  ;;  %v6258_v20 = vmul.f32 %v1926_v17, %v6105_v11  ;;  %4541 = vtanh.f32 %v6220_v3  ;;  %v2340_v43 = vpack.c.bf16 %v5988_v28, %v8643_v6  ;;  %v6263_v49 = vpop.f32.mrb[59].mxu0  ;;  %v6268_v47 = vmul.f32 %v1931_v24, %v6114_v37  ;;  %v8644_v11 = vld [vmem:[#allocation25_spill] sm:$0xff] }
 0x166   : > { %v6265_v16 = vpop.f32.mrb[59].mxu1  ;;  %v4530_v41 = vpop.eup %4529  ;;  %v1932_v10 = vadd.f32 1.0, %v4528_v56  ;;  %4543 = vtanh.f32 %v6223_v5  ;;  %3172 = vmatmul.mubr.bf16.gmra.mrb[148].mxu1 %v2333_v2  ;;  %v2342_v17 = vpack.c.bf16 %v5997_v54, %v8644_v11  ;;  %v6274_v14 = vmul.f32 %v1933_v55, %v6116_v19 }
 0x167   : > { %v1934_v42 = vadd.f32 1.0, %v4530_v41  ;;  %4545 = vtanh.f32 %v6241_v25  ;;  %3018 = vmatprep.mubr.bf16.mxu0 %v2340_v43  ;;  %v640_v28 = vadd.f32 %v6016_v36, %v5290_v29  ;;  %v833_v24 = vadd.f32 %v6018_v0, %v5293_v30 }
 0x168   : > { %v6280_v37 = vmul.f32 %v1932_v10, %v6123_v51  ;;  %3179 = vmatprep.mubr.bf16.mxu1 %v2342_v17  ;;  %v642_v54 = vadd.f32 %v6026_v4, %v5300_v31  ;;  %v835_v19 = vadd.f32 %v6028_v9, %v5303_v32  ;;  %v644_v36 = vadd.f32 %v6036_v63, %v5290_v29 }
 0x169   : > { %v6289_v41 = vmul.f32 %v1934_v42, %v6137_v61  ;;  %v6291_v55 = vmul.f32 0.5, %v640_v28  ;;  %v837_v51 = vadd.f32 %v6038_v59, %v5293_v30  ;;  %v6297_v56 = vmul.f32 0.5, %v833_v24  ;;  %v6305_v61 = vpop.f32.mrb[60].mxu0  ;;  %v6307_v42 = vpop.f32.mrb[60].mxu1 }
 0x16a   : > { %v4532_v2 = vpop.eup %4531  ;;  %v6299_v0 = vmul.f32 0.5, %v642_v54  ;;  %v6301_v4 = vmul.f32 0.5, %v835_v19  ;;  %v646_v9 = vadd.f32 %v6046_v34, %v5300_v31  ;;  %8645 = vst [vmem:[#allocation21_spill] sm:$0xff] %v6305_v61  ;;  %8646 = vst [vmem:[#allocation24_spill] sm:$0xff] %v6307_v42  ;;  %v6310_v63 = vmul.f32 0.5, %v644_v36  ;;  %v6314_v10 = vpop.f32.mrb[61].mxu0 }
 0x16b   : > { %v4534_v6 = vpop.eup %4533  ;;  %v1939_v43 = vadd.f32 1.0, %v4532_v2  ;;  %4547 = vtanh.f32 %v6291_v55  ;;  %v6312_v59 = vmul.f32 0.5, %v837_v51  ;;  %8647 = vst [vmem:[#allocation25_spill] sm:$0xff] %v6314_v10  ;;  %v6316_v11 = vpop.f32.mrb[61].mxu1  ;;  %v839_v24 = vadd.f32 %v6048_v40, %v5303_v32 }
 0x16c   : > { %8648 = vst [vmem:[#allocation32_spill] sm:$0xff] %v6316_v11  ;;  %v4536_v17 = vpop.eup %4535  ;;  %v1941_v28 = vadd.f32 1.0, %v4534_v6  ;;  %4549 = vtanh.f32 %v6297_v56  ;;  %v6319_v34 = vmul.f32 0.5, %v646_v9  ;;  %v6323_v54 = vpop.f32.mrb[62].mxu0  ;;  %v8652_v11 = vld [vmem:[#allocation22_spill] sm:$0xff] }
 0x16d   : > { %8649 = vst [vmem:[#allocation33_spill] sm:$0xff] %v6323_v54  ;;  %v6325_v19 = vpop.f32.mrb[62].mxu1  ;;  %v4538_v36 = vpop.eup %4537  ;;  %v6328_v51 = vmul.f32 %v1939_v43, %v6203_v46  ;;  %v1940_v2 = vadd.f32 1.0, %v4536_v17  ;;  %4551 = vtanh.f32 %v6299_v0  ;;  %v8653_v6 = vld [vmem:[#allocation26_spill] sm:$0xff] }
 0x16e   : > { %8650 = vst [vmem:[#allocation34_spill] sm:$0xff] %v6325_v19  ;;  %v2339_v10 = vpack.c.bf16 %v8653_v6, %v8652_v11  ;;  %v6333_v42 = vpop.f32.mrb[63].mxu0  ;;  %v6335_v9 = vpop.f32.mrb[63].mxu1  ;;  %v6338_v40 = vmul.f32 %v1941_v28, %v6209_v8  ;;  %v1942_v54 = vadd.f32 1.0, %v4538_v36  ;;  %4553 = vtanh.f32 %v6301_v4  ;;  %v8656_v11 = vld [vmem:[#allocation23_spill] sm:$0xff] }
 0x16f   : > { %8651 = vst [vmem:[#allocation35_spill] sm:$0xff] %v6328_v51  ;;  %8654 = vst [vmem:[#allocation22_spill] sm:$0xff] %v6335_v9  ;;  %v4540_v61 = vpop.eup %4539  ;;  %v6341_v19 = vmul.f32 0.5, %v839_v24  ;;  %v6344_v43 = vmul.f32 %v1940_v2, %v6211_v45  ;;  %4555 = vtanh.f32 %v6310_v63  ;;  %v8657_v6 = vld [vmem:[#allocation7_spill] sm:$0xff]  ;;  %v6367_v2 = vpop.f32.mrb[64].mxu0 }
 0x170   : > { %8655 = vst [vmem:[#allocation26_spill] sm:$0xff] %v6338_v40  ;;  %v4542_v46 = vpop.eup %4541  ;;  %v1947_v17 = vadd.f32 1.0, %v4540_v61  ;;  %3019 = vmatmul.mubr.bf16.gmra.mrb[152].mxu0 %v2339_v10  ;;  %v2341_v51 = vpack.c.bf16 %v8657_v6, %v8656_v11  ;;  %v6350_v8 = vmul.f32 %v1942_v54, %v6213_v50  ;;  %4557 = vtanh.f32 %v6312_v59  ;;  %v8658_v24 = vld [vmem:[#allocation27_spill] sm:$0xff]  ;;  %8660 = vst [vmem:[#allocation7_spill] sm:$0xff] %v6367_v2 }
 0x171   : > { %v4544_v9 = vpop.eup %4543  ;;  %v1949_v28 = vadd.f32 1.0, %v4542_v46  ;;  %v2348_v36 = vpack.c.bf16 %v6076_v38, %v8658_v24  ;;  %4559 = vtanh.f32 %v6319_v34  ;;  %v2350_v10 = vpack.c.bf16 %v6089_v62, %v6051_v15 }
 0x172   : > { %v4546_v40 = vpop.eup %4545  ;;  %v6356_v45 = vmul.f32 %v1947_v17, %v6218_v27  ;;  %v1948_v61 = vadd.f32 1.0, %v4544_v9  ;;  %3180 = vmatmul.mubr.bf16.gmra.mrb[152].mxu1 %v2341_v51  ;;  %4561 = vtanh.f32 %v6341_v19  ;;  %v650_v38 = vadd.f32 %v6084_v23, %v5290_v29  ;;  %v6369_v27 = vpop.f32.mrb[64].mxu1 }
 0x173   : > { %v6362_v50 = vmul.f32 %v1949_v28, %v6220_v3  ;;  %v1950_v54 = vadd.f32 1.0, %v4546_v40  ;;  %3026 = vmatprep.mubr.bf16.mxu0 %v2348_v36  ;;  %8661 = vst [vmem:[#allocation27_spill] sm:$0xff] %v6369_v27  ;;  %3187 = vmatprep.mubr.bf16.mxu1 %v2350_v10  ;;  %v843_v15 = vadd.f32 %v6086_v48, %v5293_v30  ;;  %v8662_v3 = vld [vmem:[#allocation10_spill] sm:$0xff]  ;;  %v6380_v40 = vpop.f32.mrb[65].mxu0  ;;  %v6382_v23 = vpop.f32.mrb[65].mxu1 }
 0x174   : > { %v6372_v9 = vmul.f32 %v1948_v61, %v6223_v5  ;;  %v652_v62 = vadd.f32 %v6097_v13, %v5300_v31  ;;  %v845_v51 = vadd.f32 %v8662_v3, %v5303_v32  ;;  %8663 = vst [vmem:[#allocation10_spill] sm:$0xff] %v6380_v40  ;;  %8664 = vst [vmem:[#allocation36_spill] sm:$0xff] %v6382_v23  ;;  %v6387_v17 = vmul.f32 0.5, %v650_v38  ;;  %v8665_v5 = vld [vmem:[#allocation11_spill] sm:$0xff]  ;;  %v8666_v48 = vld [vmem:[#allocation14_spill] sm:$0xff]  ;;  %v6393_v28 = vpop.f32.mrb[66].mxu0 }
 0x175   : > { %8659 = vst [vmem:[#allocation23_spill] sm:$0xff] %v6362_v50  ;;  %v6385_v46 = vmul.f32 %v1950_v54, %v6241_v25  ;;  %v654_v11 = vadd.f32 %v8665_v5, %v5290_v29  ;;  %v847_v6 = vadd.f32 %v8666_v48, %v5293_v30  ;;  %8667 = vst [vmem:[#allocation11_spill] sm:$0xff] %v6393_v28  ;;  %v6395_v13 = vpop.f32.mrb[66].mxu1  ;;  %v4548_v24 = vpop.eup %4547  ;;  %v6397_v36 = vmul.f32 0.5, %v843_v15  ;;  %v8669_v25 = vld [vmem:[#allocation15_spill] sm:$0xff]  ;;  %v8674_v40 = vld [vmem:[#allocation28_spill] sm:$0xff] }
 0x176   : > { %8668 = vst [vmem:[#allocation14_spill] sm:$0xff] %v6395_v13  ;;  %v6399_v61 = vmul.f32 0.5, %v652_v62  ;;  %v6401_v10 = vmul.f32 0.5, %v845_v51  ;;  %v656_v54 = vadd.f32 %v8669_v25, %v5300_v31  ;;  %v6405_v38 = vpop.f32.mrb[67].mxu0  ;;  %v6407_v3 = vpop.f32.mrb[67].mxu1  ;;  %v1955_v48 = vadd.f32 1.0, %v4548_v24 }
 0x177   : > { %8670 = vst [vmem:[#allocation15_spill] sm:$0xff] %v6405_v38  ;;  %8671 = vst [vmem:[#allocation37_spill] sm:$0xff] %v6407_v3  ;;  %v4550_v5 = vpop.eup %4549  ;;  %4563 = vtanh.f32 %v6387_v17  ;;  %v6410_v28 = vmul.f32 0.5, %v654_v11  ;;  %v6412_v13 = vmul.f32 0.5, %v847_v6  ;;  %v8672_v25 = vld [vmem:[#allocation29_spill] sm:$0xff]  ;;  %v8673_v11 = vld [vmem:[#allocation6_spill] sm:$0xff] }
 0x178   : > { %v4552_v15 = vpop.eup %4551  ;;  %v1957_v62 = vadd.f32 1.0, %v4550_v5  ;;  %4565 = vtanh.f32 %v6397_v36  ;;  %v6415_v51 = vmul.f32 0.5, %v656_v54  ;;  %v849_v23 = vadd.f32 %v8672_v25, %v5303_v32 }
 0x179   : > { %v4554_v38 = vpop.eup %4553  ;;  %v6420_v3 = vmul.f32 %v1955_v48, %v6291_v55  ;;  %v1956_v24 = vadd.f32 1.0, %v4552_v15  ;;  %4567 = vtanh.f32 %v6399_v61  ;;  %v2347_v6 = vpack.c.bf16 %v8674_v40, %v8673_v11  ;;  %v8675_v48 = vld [vmem:[#allocation8_spill] sm:$0xff]  ;;  %v8676_v15 = vld [vmem:[#allocation9_spill] sm:$0xff]  ;;  %v6437_v11 = vpop.f32.mrb[68].mxu0 }
 0x17a   : > { %v4556_v27 = vpop.eup %4555  ;;  %v6426_v5 = vmul.f32 %v1957_v62, %v6297_v56  ;;  %v1958_v2 = vadd.f32 1.0, %v4554_v38  ;;  %4569 = vtanh.f32 %v6401_v10  ;;  %v6429_v54 = vmul.f32 0.5, %v849_v23  ;;  %v6439_v56 = vpop.f32.mrb[68].mxu1 }
 0x17b   : > { %v4558_v25 = vpop.eup %4557  ;;  %v6432_v50 = vmul.f32 %v1956_v24, %v6299_v0  ;;  %v1963_v55 = vadd.f32 1.0, %v4556_v27  ;;  %4571 = vtanh.f32 %v6410_v28  ;;  %3027 = vmatmul.mubr.bf16.gmra.mrb[156].mxu0 %v2347_v6  ;;  %v2349_v40 = vpack.c.bf16 %v8676_v15, %v8675_v48  ;;  %v6447_v27 = vpop.f32.mrb[69].mxu0 }
 0x17c   : > { %v4560_v38 = vpop.eup %4559  ;;  %v6442_v62 = vmul.f32 %v1958_v2, %v6301_v4  ;;  %v1965_v23 = vadd.f32 1.0, %v4558_v25  ;;  %4573 = vtanh.f32 %v6412_v13  ;;  %v2356_v0 = vpack.c.bf16 %v6185_v7, %v6149_v60  ;;  %v6449_v24 = vpop.f32.mrb[69].mxu1 }
 0x17d   : > { %v4562_v6 = vpop.eup %4561  ;;  %v6452_v48 = vmul.f32 %v1963_v55, %v6310_v63  ;;  %v1964_v15 = vadd.f32 1.0, %v4560_v38  ;;  %4575 = vtanh.f32 %v6415_v51  ;;  %3188 = vmatmul.mubr.bf16.gmra.mrb[156].mxu1 %v2349_v40  ;;  %v2358_v4 = vpack.c.bf16 %v6201_v39, %v6155_v22  ;;  %v6457_v2 = vpop.f32.mrb[70].mxu0 }
 0x17e   : > { %v6459_v25 = vpop.f32.mrb[70].mxu1  ;;  %v6462_v60 = vmul.f32 %v1965_v23, %v6312_v59  ;;  %v1966_v7 = vadd.f32 1.0, %v4562_v6  ;;  %4577 = vtanh.f32 %v6429_v54  ;;  %3034 = vmatprep.mubr.bf16.mxu0 %v2356_v0  ;;  %v660_v63 = vadd.f32 %v6160_v21, %v5290_v29  ;;  %v6467_v55 = vpop.f32.mrb[71].mxu0 }
 0x17f   : > { %8677 = vst [vmem:[#allocation29_spill] sm:$0xff] %v6459_v25  ;;  %8678 = vst [vmem:[#allocation6_spill] sm:$0xff] %v6467_v55  ;;  %v6469_v40 = vpop.f32.mrb[71].mxu1  ;;  %v6472_v22 = vmul.f32 %v1964_v15, %v6319_v34  ;;  %3195 = vmatprep.mubr.bf16.mxu1 %v2358_v4  ;;  %v853_v39 = vadd.f32 %v6162_v1, %v5293_v30  ;;  %v662_v59 = vadd.f32 %v6170_v26, %v5300_v31 }
 0x180   : > { %8679 = vst [vmem:[#allocation28_spill] sm:$0xff] %v6469_v40  ;;  %v855_v38 = vadd.f32 %v6172_v57, %v5303_v32  ;;  %v6481_v23 = vmul.f32 %v1966_v7, %v6341_v19  ;;  %v6483_v21 = vmul.f32 0.5, %v660_v63  ;;  %v664_v0 = vadd.f32 %v6180_v18, %v5290_v29 }
 0x181   : > { %v857_v34 = vadd.f32 %v6182_v53, %v5293_v30  ;;  %v4564_v6 = vpop.eup %4563  ;;  %v6489_v15 = vmul.f32 0.5, %v853_v39  ;;  %v6491_v1 = vmul.f32 0.5, %v662_v59  ;;  %v666_v57 = vadd.f32 %v6193_v52, %v5300_v31  ;;  %v6509_v52 = vpop.f32.mrb[72].mxu1 }
 0x182   : > { %v6493_v26 = vmul.f32 0.5, %v855_v38  ;;  %v4566_v19 = vpop.eup %4565  ;;  %v1971_v4 = vadd.f32 1.0, %v4564_v6  ;;  %4579 = vtanh.f32 %v6483_v21  ;;  %v6498_v7 = vmul.f32 0.5, %v664_v0  ;;  %v6507_v38 = vpop.f32.mrb[72].mxu0  ;;  %8681 = vst [vmem:[#allocation9_spill] sm:$0xff] %v6509_v52 }
 0x183   : > { %v6500_v18 = vmul.f32 0.5, %v857_v34  ;;  %v4568_v63 = vpop.eup %4567  ;;  %v1973_v53 = vadd.f32 1.0, %v4566_v19  ;;  %4581 = vtanh.f32 %v6489_v15  ;;  %v6503_v39 = vmul.f32 0.5, %v666_v57  ;;  %8680 = vst [vmem:[#allocation8_spill] sm:$0xff] %v6507_v38  ;;  %v8682_v34 = vld [vmem:[#allocation30_spill] sm:$0xff]  ;;  %v6517_v55 = vpop.f32.mrb[73].mxu0 }
 0x184   : > { %v859_v59 = vadd.f32 %v6195_v35, %v5303_v32  ;;  %v4570_v6 = vpop.eup %4569  ;;  %v6512_v40 = vmul.f32 %v1971_v4, %v6387_v17  ;;  %v1972_v0 = vadd.f32 1.0, %v4568_v63  ;;  %4583 = vtanh.f32 %v6491_v1  ;;  %8683 = vst [vmem:[#allocation30_spill] sm:$0xff] %v6517_v55  ;;  %v6519_v57 = vpop.f32.mrb[73].mxu1 }
 0x185   : > { %v2355_v19 = vpack.c.bf16 %v6165_v12, %v8682_v34  ;;  %8684 = vst [vmem:[#allocation38_spill] sm:$0xff] %v6519_v57  ;;  %v4572_v25 = vpop.eup %4571  ;;  %v6522_v35 = vmul.f32 %v1973_v53, %v6397_v36  ;;  %v1974_v38 = vadd.f32 1.0, %v4570_v6  ;;  %4585 = vtanh.f32 %v6493_v26  ;;  %v6527_v17 = vpop.f32.mrb[74].mxu0  ;;  %v8687_v57 = vld [vmem:[#allocation12_spill] sm:$0xff] }
 0x186   : > { %v6525_v52 = vmul.f32 0.5, %v859_v59  ;;  %8685 = vst [vmem:[#allocation39_spill] sm:$0xff] %v6527_v17  ;;  %v6529_v4 = vpop.f32.mrb[74].mxu1  ;;  %v4574_v63 = vpop.eup %4573  ;;  %v6532_v12 = vmul.f32 %v1972_v0, %v6399_v61  ;;  %v1979_v34 = vadd.f32 1.0, %v4572_v25  ;;  %4587 = vtanh.f32 %v6498_v7  ;;  %v8688_v36 = vld [vmem:[#allocation16_spill] sm:$0xff] }
 0x187   : > { %8686 = vst [vmem:[#allocation40_spill] sm:$0xff] %v6529_v4  ;;  %3035 = vmatmul.mubr.bf16.gmra.mrb[160].mxu0 %v2355_v19  ;;  %v2357_v53 = vpack.c.bf16 %v8688_v36, %v8687_v57  ;;  %v6537_v6 = vpop.f32.mrb[75].mxu0  ;;  %v6539_v55 = vpop.f32.mrb[75].mxu1  ;;  %v6542_v17 = vmul.f32 %v1974_v38, %v6401_v10  ;;  %v1981_v4 = vadd.f32 1.0, %v4574_v63  ;;  %4589 = vtanh.f32 %v6500_v18 }
 0x188   : > { %8689 = vst [vmem:[#allocation12_spill] sm:$0xff] %v6539_v55  ;;  %v4576_v59 = vpop.eup %4575  ;;  %v2364_v61 = vpack.c.bf16 %v6280_v37, %v6248_v33  ;;  %v6548_v0 = vmul.f32 %v1979_v34, %v6410_v28  ;;  %4591 = vtanh.f32 %v6503_v39  ;;  %v2366_v57 = vpack.c.bf16 %v6289_v41, %v6258_v20  ;;  %v8690_v28 = vld [vmem:[#allocation17_spill] sm:$0xff]  ;;  %v8691_v34 = vld [vmem:[#allocation20_spill] sm:$0xff]  ;;  %v8692_v41 = vld [vmem:[#allocation31_spill] sm:$0xff] }
 0x189   : > { %v4578_v25 = vpop.eup %4577  ;;  %v1980_v19 = vadd.f32 1.0, %v4576_v59  ;;  %3196 = vmatmul.mubr.bf16.gmra.mrb[160].mxu1 %v2357_v53  ;;  %v6554_v10 = vmul.f32 %v1981_v4, %v6412_v13  ;;  %4593 = vtanh.f32 %v6525_v52  ;;  %v670_v33 = vadd.f32 %v6233_v44, %v5290_v29  ;;  %v6577_v59 = vpop.f32.mrb[76].mxu0 }
 0x18a   : > { %v1982_v38 = vadd.f32 1.0, %v4578_v25  ;;  %3042 = vmatprep.mubr.bf16.mxu0 %v2364_v61  ;;  %3203 = vmatprep.mubr.bf16.mxu1 %v2366_v57  ;;  %v863_v63 = vadd.f32 %v8690_v28, %v5293_v30  ;;  %v672_v20 = vadd.f32 %v8691_v34, %v5300_v31  ;;  %v865_v13 = vadd.f32 %v8692_v41, %v5303_v32  ;;  %v6579_v61 = vpop.f32.mrb[76].mxu1 }
 0x18b   : > { %v6560_v37 = vmul.f32 %v1980_v19, %v6415_v51  ;;  %v6571_v36 = vmul.f32 0.5, %v670_v33  ;;  %v674_v44 = vadd.f32 %v6253_v58, %v5290_v29  ;;  %v8693_v51 = vld [vmem:[#allocation19_spill] sm:$0xff]  ;;  %8694 = vst [vmem:[#allocation16_spill] sm:$0xff] %v6577_v59  ;;  %8695 = vst [vmem:[#allocation17_spill] sm:$0xff] %v6579_v61  ;;  %v6591_v58 = vpop.f32.mrb[77].mxu1 }
 0x18c   : > { %v6569_v4 = vmul.f32 %v1982_v38, %v6429_v54  ;;  %v867_v53 = vadd.f32 %v8693_v51, %v5293_v30  ;;  %v4580_v25 = vpop.eup %4579  ;;  %v6581_v19 = vmul.f32 0.5, %v863_v63  ;;  %v6583_v57 = vmul.f32 0.5, %v672_v20  ;;  %v6589_v38 = vpop.f32.mrb[77].mxu0  ;;  %8697 = vst [vmem:[#allocation31_spill] sm:$0xff] %v6591_v58 }
 0x18d   : > { %v6585_v28 = vmul.f32 0.5, %v865_v13  ;;  %v676_v54 = vadd.f32 %v6263_v49, %v5300_v31  ;;  %8696 = vst [vmem:[#allocation20_spill] sm:$0xff] %v6589_v38  ;;  %v4582_v33 = vpop.eup %4581  ;;  %v1987_v34 = vadd.f32 1.0, %v4580_v25  ;;  %4595 = vtanh.f32 %v6571_v36  ;;  %v6598_v63 = vpop.f32.mrb[78].mxu0 }
 0x18e   : > { %v6594_v41 = vmul.f32 0.5, %v674_v44  ;;  %v6596_v51 = vmul.f32 0.5, %v867_v53  ;;  %8698 = vst [vmem:[#allocation19_spill] sm:$0xff] %v6598_v63  ;;  %v6600_v20 = vpop.f32.mrb[78].mxu1  ;;  %v4584_v13 = vpop.eup %4583  ;;  %v1989_v61 = vadd.f32 1.0, %v4582_v33  ;;  %4597 = vtanh.f32 %v6581_v19 }
 0x18f   : > { %8699 = vst [vmem:[#allocation41_spill] sm:$0xff] %v6600_v20  ;;  %v6603_v49 = vmul.f32 0.5, %v676_v54  ;;  %v869_v58 = vadd.f32 %v6265_v16, %v5303_v32  ;;  %v6607_v25 = vpop.f32.mrb[79].mxu0  ;;  %v6609_v38 = vpop.f32.mrb[79].mxu1  ;;  %v6612_v53 = vmul.f32 %v1987_v34, %v6483_v21  ;;  %v1988_v63 = vadd.f32 1.0, %v4584_v13  ;;  %v8702_v20 = vld [vmem:[#allocation13_spill] sm:$0xff] }
 0x190   : > { %8700 = vst [vmem:[#allocation42_spill] sm:$0xff] %v6607_v25  ;;  %8701 = vst [vmem:[#allocation43_spill] sm:$0xff] %v6609_v38  ;;  %v4586_v44 = vpop.eup %4585  ;;  %4599 = vtanh.f32 %v6583_v57  ;;  %v2363_v33 = vpack.c.bf16 %v6268_v47, %v8702_v20  ;;  %v6618_v54 = vmul.f32 %v1989_v61, %v6489_v15  ;;  %v8703_v34 = vld [vmem:[#allocation18_spill] sm:$0xff] }
 0x191   : > { %v4588_v59 = vpop.eup %4587  ;;  %v1990_v55 = vadd.f32 1.0, %v4586_v44  ;;  %4601 = vtanh.f32 %v6585_v28  ;;  %v6621_v16 = vmul.f32 0.5, %v869_v58  ;;  %v6624_v25 = vmul.f32 %v1988_v63, %v6491_v1  ;;  %v6641_v63 = vpop.f32.mrb[80].mxu0 }
 0x192   : > { %v4590_v38 = vpop.eup %4589  ;;  %v1995_v21 = vadd.f32 1.0, %v4588_v59  ;;  %4603 = vtanh.f32 %v6594_v41  ;;  %3043 = vmatmul.mubr.bf16.gmra.mrb[164].mxu0 %v2363_v33  ;;  %v2365_v47 = vpack.c.bf16 %v6274_v14, %v8703_v34  ;;  %v2372_v58 = vpack.c.bf16 %v6372_v9, %v6344_v43  ;;  %8704 = vst [vmem:[#allocation13_spill] sm:$0xff] %v6641_v63  ;;  %v8706_v43 = vld [vmem:[#allocation21_spill] sm:$0xff]  ;;  %v8711_v34 = vld [vmem:[#allocation32_spill] sm:$0xff] }
 0x193   : > { %v4592_v20 = vpop.eup %4591  ;;  %v6630_v15 = vmul.f32 %v1990_v55, %v6493_v26  ;;  %v1997_v61 = vadd.f32 1.0, %v4590_v38  ;;  %4605 = vtanh.f32 %v6596_v51  ;;  %v2374_v14 = vpack.c.bf16 %v6385_v46, %v6350_v8  ;;  %v6643_v55 = vpop.f32.mrb[80].mxu1  ;;  %v8709_v46 = vld [vmem:[#allocation24_spill] sm:$0xff] }
 0x194   : > { %v4594_v13 = vpop.eup %4593  ;;  %v6636_v1 = vmul.f32 %v1995_v21, %v6498_v7  ;;  %v1996_v59 = vadd.f32 1.0, %v4592_v20  ;;  %4607 = vtanh.f32 %v6603_v49  ;;  %3204 = vmatmul.mubr.bf16.gmra.mrb[164].mxu1 %v2365_v47  ;;  %8705 = vst [vmem:[#allocation18_spill] sm:$0xff] %v6643_v55  ;;  %3050 = vmatprep.mubr.bf16.mxu0 %v2372_v58  ;;  %v680_v9 = vadd.f32 %v8706_v43, %v5290_v29  ;;  %v6651_v7 = vpop.f32.mrb[81].mxu0 }
 0x195   : > { %v6646_v26 = vmul.f32 %v1997_v61, %v6500_v18  ;;  %v1998_v38 = vadd.f32 1.0, %v4594_v13  ;;  %4609 = vtanh.f32 %v6621_v16  ;;  %8707 = vst [vmem:[#allocation21_spill] sm:$0xff] %v6651_v7  ;;  %v6653_v44 = vpop.f32.mrb[81].mxu1  ;;  %3211 = vmatprep.mubr.bf16.mxu1 %v2374_v14  ;;  %v873_v33 = vadd.f32 %v8709_v46, %v5293_v30  ;;  %v8710_v18 = vld [vmem:[#allocation25_spill] sm:$0xff]  ;;  %v6664_v20 = vpop.f32.mrb[82].mxu0  ;;  %v8715_v14 = vld [vmem:[#allocation34_spill] sm:$0xff] }
 0x196   : > { %8708 = vst [vmem:[#allocation44_spill] sm:$0xff] %v6653_v44  ;;  %v6656_v8 = vmul.f32 %v1996_v59, %v6503_v39  ;;  %v682_v21 = vadd.f32 %v8710_v18, %v5300_v31  ;;  %v875_v47 = vadd.f32 %v8711_v34, %v5303_v32  ;;  %8712 = vst [vmem:[#allocation24_spill] sm:$0xff] %v6664_v20  ;;  %v6666_v61 = vpop.f32.mrb[82].mxu1  ;;  %v6671_v13 = vmul.f32 0.5, %v680_v9  ;;  %v8714_v39 = vld [vmem:[#allocation33_spill] sm:$0xff]  ;;  %v6677_v46 = vpop.f32.mrb[83].mxu0 }
 0x197   : > { %8713 = vst [vmem:[#allocation25_spill] sm:$0xff] %v6666_v61  ;;  %v6669_v58 = vmul.f32 %v1998_v38, %v6525_v52  ;;  %v684_v59 = vadd.f32 %v8714_v39, %v5290_v29  ;;  %v877_v43 = vadd.f32 %v8715_v14, %v5293_v30  ;;  %8716 = vst [vmem:[#allocation32_spill] sm:$0xff] %v6677_v46  ;;  %v6679_v18 = vpop.f32.mrb[83].mxu1  ;;  %v4596_v34 = vpop.eup %4595  ;;  %v6681_v44 = vmul.f32 0.5, %v873_v33 }
 0x198   : > { %8717 = vst [vmem:[#allocation33_spill] sm:$0xff] %v6679_v18  ;;  %v6683_v20 = vmul.f32 0.5, %v682_v21  ;;  %v6685_v61 = vmul.f32 0.5, %v875_v47  ;;  %v686_v52 = vadd.f32 %v6333_v42, %v5300_v31  ;;  %v4598_v38 = vpop.eup %4597  ;;  %v2003_v9 = vadd.f32 1.0, %v4596_v34  ;;  %v8718_v21 = vld [vmem:[#allocation22_spill] sm:$0xff] }
 0x199   : > { %4611 = vtanh.f32 %v6671_v13  ;;  %v6690_v29 = vmul.f32 0.5, %v684_v59  ;;  %v6692_v30 = vmul.f32 0.5, %v877_v43  ;;  %v2005_v14 = vadd.f32 1.0, %v4598_v38  ;;  %v8719_v59 = vld [vmem:[#allocation35_spill] sm:$0xff] }
 0x19a   : > { %v4600_v39 = vpop.eup %4599  ;;  %4613 = vtanh.f32 %v6681_v44  ;;  %v6695_v33 = vmul.f32 0.5, %v686_v52  ;;  %v879_v47 = vadd.f32 %v8718_v21, %v5303_v32  ;;  %v6700_v31 = vmul.f32 %v2003_v9, %v6571_v36  ;;  %v6711_v32 = vpop.f32.mrb[84].mxu0 }
 0x19b   : > { %v4602_v18 = vpop.eup %4601  ;;  %v2004_v42 = vadd.f32 1.0, %v4600_v39  ;;  %4615 = vtanh.f32 %v6683_v20  ;;  %v2371_v43 = vpack.c.bf16 %v6356_v45, %v8719_v59  ;;  %v6706_v38 = vmul.f32 %v2005_v14, %v6581_v19  ;;  %8721 = vst [vmem:[#allocation22_spill] sm:$0xff] %v6711_v32  ;;  %v6713_v21 = vpop.f32.mrb[84].mxu1  ;;  %v8723_v45 = vld [vmem:[#allocation26_spill] sm:$0xff]  ;;  %v8724_v19 = vld [vmem:[#allocation23_spill] sm:$0xff] }
 0x19c   : > { %v4604_v34 = vpop.eup %4603  ;;  %v2006_v46 = vadd.f32 1.0, %v4602_v18  ;;  %4617 = vtanh.f32 %v6685_v61  ;;  %v6709_v52 = vmul.f32 0.5, %v879_v47  ;;  %8722 = vst [vmem:[#allocation35_spill] sm:$0xff] %v6713_v21  ;;  %v2373_v14 = vpack.c.bf16 %v8724_v19, %v8723_v45  ;;  %v6721_v18 = vpop.f32.mrb[85].mxu0 }
 0x19d   : > { %8720 = vst [vmem:[#allocation34_spill] sm:$0xff] %v6706_v38  ;;  %v4606_v36 = vpop.eup %4605  ;;  %v6716_v9 = vmul.f32 %v2004_v42, %v6583_v57  ;;  %v2011_v39 = vadd.f32 1.0, %v4604_v34  ;;  %4619 = vtanh.f32 %v6690_v29  ;;  %3051 = vmatmul.mubr.bf16.gmra.mrb[168].mxu0 %v2371_v43  ;;  %8725 = vst [vmem:[#allocation26_spill] sm:$0xff] %v6721_v18  ;;  %v6723_v59 = vpop.f32.mrb[85].mxu1  ;;  %v2380_v57 = vpack.c.bf16 %v6472_v22, %v6432_v50 }
 0x19e   : > { %8726 = vst [vmem:[#allocation23_spill] sm:$0xff] %v6723_v59  ;;  %v4608_v47 = vpop.eup %4607  ;;  %v6726_v32 = vmul.f32 %v2006_v46, %v6585_v28  ;;  %v2013_v21 = vadd.f32 1.0, %v4606_v36  ;;  %4621 = vtanh.f32 %v6692_v30  ;;  %v6731_v42 = vpop.f32.mrb[86].mxu0  ;;  %3212 = vmatmul.mubr.bf16.gmra.mrb[168].mxu1 %v2373_v14  ;;  %v2382_v28 = vpack.c.bf16 %v6481_v23, %v6442_v62  ;;  %v8735_v14 = vld [vmem:[#allocation4_spill] sm:$0xff]  ;;  %v8736_v62 = vld [vmem:[#allocation27_spill] sm:$0xff]  ;;  %v8739_v59 = vld [vmem:[#allocation5_spill] sm:$0xff] }
 0x19f   : > { %8727 = vst [vmem:[#allocation45_spill] sm:$0xff] %v6731_v42  ;;  %v6733_v43 = vpop.f32.mrb[86].mxu1  ;;  %v4610_v34 = vpop.eup %4609  ;;  %v6736_v45 = vmul.f32 %v2011_v39, %v6594_v41  ;;  %v2012_v19 = vadd.f32 1.0, %v4608_v47  ;;  %4623 = vtanh.f32 %v6695_v33  ;;  %3058 = vmatprep.mubr.bf16.mxu0 %v2380_v57  ;;  %v8733_v41 = vld [vmem:[#allocation2_spill] sm:$0xff]  ;;  %v8734_v39 = vld [vmem:[#allocation7_spill] sm:$0xff]  ;;  %v1109_v23 = vadd.f32 %v8736_v62, %v8735_v14 }
 0x1a0   : > { %8728 = vst [vmem:[#allocation46_spill] sm:$0xff] %v6733_v43  ;;  %v6741_v46 = vpop.f32.mrb[87].mxu0  ;;  %v6743_v36 = vpop.f32.mrb[87].mxu1  ;;  %v6746_v50 = vmul.f32 %v2013_v21, %v6596_v51  ;;  %v2014_v22 = vadd.f32 1.0, %v4610_v34  ;;  %4625 = vtanh.f32 %v6709_v52  ;;  %v916_v47 = vadd.f32 %v8734_v39, %v8733_v41  ;;  %3219 = vmatprep.mubr.bf16.mxu1 %v2382_v28  ;;  %v8738_v42 = vld [vmem:[#allocation10_spill] sm:$0xff]  ;;  %v8740_v51 = vld [vmem:[#allocation36_spill] sm:$0xff] }
 0x1a1   : > { %8729 = vst [vmem:[#allocation47_spill] sm:$0xff] %v6736_v45  ;;  %8730 = vst [vmem:[#allocation48_spill] sm:$0xff] %v6741_v46  ;;  %v6752_v43 = vmul.f32 %v2012_v19, %v6603_v49  ;;  %v8737_v46 = vld [vmem:[#allocation3_spill] sm:$0xff]  ;;  %v1111_v21 = vadd.f32 %v8740_v51, %v8739_v59  ;;  %v8742_v49 = vld [vmem:[#allocation14_spill] sm:$0xff]  ;;  %v6769_v7 = vmul.f32 0.5, %v1109_v23  ;;  %v6782_v63 = vpop.f32.mrb[88].mxu0 }
 0x1a2   : > { %8731 = vst [vmem:[#allocation49_spill] sm:$0xff] %v6743_v36  ;;  %8732 = vst [vmem:[#allocation50_spill] sm:$0xff] %v6746_v50  ;;  %v918_v36 = vadd.f32 %v8738_v42, %v8737_v46  ;;  %v6761_v34 = vmul.f32 %v2014_v22, %v6621_v16  ;;  %v6763_v57 = vmul.f32 0.5, %v916_v47  ;;  %v8741_v39 = vld [vmem:[#allocation11_spill] sm:$0xff]  ;;  %v1113_v19 = vadd.f32 %v8742_v49, %v8735_v14  ;;  %v6784_v49 = vpop.f32.mrb[88].mxu1 }
 0x1a3   : > { %v920_v18 = vadd.f32 %v8741_v39, %v8733_v41  ;;  %v4612_v28 = vpop.eup %4611  ;;  %v6773_v42 = vmul.f32 0.5, %v1111_v21  ;;  %v8743_v51 = vld [vmem:[#allocation15_spill] sm:$0xff]  ;;  %8744 = vst [vmem:[#allocation2_spill] sm:$0xff] %v6782_v63  ;;  %8745 = vst [vmem:[#allocation7_spill] sm:$0xff] %v6784_v49  ;;  %v6793_v38 = vpop.f32.mrb[89].mxu1 }
 0x1a4   : > { %v6771_v62 = vmul.f32 0.5, %v918_v36  ;;  %v922_v55 = vadd.f32 %v8743_v51, %v8737_v46  ;;  %v4614_v16 = vpop.eup %4613  ;;  %v2019_v22 = vadd.f32 1.0, %v4612_v28  ;;  %4627 = vtanh.f32 %v6763_v57  ;;  %v8746_v51 = vld [vmem:[#allocation37_spill] sm:$0xff]  ;;  %v6791_v28 = vpop.f32.mrb[89].mxu0  ;;  %8748 = vst [vmem:[#allocation27_spill] sm:$0xff] %v6793_v38 }
 0x1a5   : > { %v6778_v47 = vmul.f32 0.5, %v920_v18  ;;  %v6780_v39 = vmul.f32 0.5, %v1113_v19  ;;  %v4616_v23 = vpop.eup %4615  ;;  %v2021_v36 = vadd.f32 1.0, %v4614_v16  ;;  %4629 = vtanh.f32 %v6769_v7  ;;  %8747 = vst [vmem:[#allocation4_spill] sm:$0xff] %v6791_v28  ;;  %v6801_v49 = vpop.f32.mrb[90].mxu0 }
 0x1a6   : > { %v6787_v21 = vmul.f32 0.5, %v922_v55  ;;  %v1115_v50 = vadd.f32 %v8746_v51, %v8739_v59  ;;  %v4618_v18 = vpop.eup %4617  ;;  %v6796_v19 = vmul.f32 %v2019_v22, %v6671_v13  ;;  %v2020_v63 = vadd.f32 1.0, %v4616_v23  ;;  %v6803_v55 = vpop.f32.mrb[90].mxu1 }
 0x1a7   : > { %4631 = vtanh.f32 %v6771_v62  ;;  %v2379_v16 = vpack.c.bf16 %v6452_v48, %v6420_v3  ;;  %v4620_v45 = vpop.eup %4619  ;;  %v6806_v51 = vmul.f32 %v2021_v36, %v6681_v44  ;;  %v2022_v28 = vadd.f32 1.0, %v4618_v18  ;;  %v6811_v13 = vpop.f32.mrb[91].mxu0 }
 0x1a8   : > { %4633 = vtanh.f32 %v6773_v42  ;;  %v6809_v38 = vmul.f32 0.5, %v1115_v50  ;;  %8749 = vst [vmem:[#allocation3_spill] sm:$0xff] %v6811_v13  ;;  %v6813_v22 = vpop.f32.mrb[91].mxu1  ;;  %v4622_v23 = vpop.eup %4621  ;;  %v6816_v3 = vmul.f32 %v2020_v63, %v6683_v20  ;;  %v2027_v48 = vadd.f32 1.0, %v4620_v45 }
 0x1a9   : > { %8750 = vst [vmem:[#allocation10_spill] sm:$0xff] %v6813_v22  ;;  %4635 = vtanh.f32 %v6778_v47  ;;  %3059 = vmatmul.mubr.bf16.gmra.mrb[172].mxu0 %v2379_v16  ;;  %v2381_v44 = vpack.c.bf16 %v6462_v60, %v6426_v5  ;;  %v4624_v36 = vpop.eup %4623  ;;  %v6822_v18 = vmul.f32 %v2022_v28, %v6685_v61  ;;  %v2029_v50 = vadd.f32 1.0, %v4622_v23  ;;  %v6850_v45 = vpop.f32.mrb[92].mxu1 }
 0x1aa   : > { %4637 = vtanh.f32 %v6780_v39  ;;  %v2388_v22 = vpack.c.bf16 %v6560_v37, %v6532_v12  ;;  %v4626_v13 = vpop.eup %4625  ;;  %v6828_v63 = vmul.f32 %v2027_v48, %v6690_v29  ;;  %v2028_v20 = vadd.f32 1.0, %v4624_v36 }
 0x1ab   : > { %4639 = vtanh.f32 %v6787_v21  ;;  %3220 = vmatmul.mubr.bf16.gmra.mrb[172].mxu1 %v2381_v44  ;;  %v2390_v5 = vpack.c.bf16 %v6569_v4, %v6542_v17  ;;  %v6834_v60 = vmul.f32 %v2029_v50, %v6692_v30  ;;  %v2030_v61 = vadd.f32 1.0, %v4626_v13  ;;  %v6848_v30 = vpop.f32.mrb[92].mxu0 }
 0x1ac   : > { %4641 = vtanh.f32 %v6809_v38  ;;  %3066 = vmatprep.mubr.bf16.mxu0 %v2388_v22  ;;  %v926_v12 = vadd.f32 %v6437_v11, %v8733_v41  ;;  %v6840_v37 = vmul.f32 %v2028_v20, %v6695_v33  ;;  %v1119_v29 = vadd.f32 %v6439_v56, %v8735_v14  ;;  %v8751_v56 = vld [vmem:[#allocation29_spill] sm:$0xff]  ;;  %v6861_v13 = vpop.f32.mrb[93].mxu0 }
 0x1ad   : > { %3227 = vmatprep.mubr.bf16.mxu1 %v2390_v5  ;;  %v928_v17 = vadd.f32 %v6447_v27, %v8737_v46  ;;  %v1121_v4 = vadd.f32 %v6449_v24, %v8739_v59  ;;  %v6853_v28 = vmul.f32 %v2030_v61, %v6709_v52  ;;  %v930_v33 = vadd.f32 %v6457_v2, %v8733_v41  ;;  %v6863_v27 = vpop.f32.mrb[93].mxu1  ;;  %v8753_v52 = vld [vmem:[#allocation6_spill] sm:$0xff]  ;;  %v6873_v36 = vpop.f32.mrb[94].mxu0 }
 0x1ae   : > { %v6855_v11 = vmul.f32 0.5, %v926_v12  ;;  %v1123_v16 = vadd.f32 %v8751_v56, %v8735_v14  ;;  %8752 = vst [vmem:[#allocation5_spill] sm:$0xff] %v6863_v27  ;;  %v4628_v24 = vpop.eup %4627  ;;  %v6865_v22 = vmul.f32 0.5, %v1119_v29  ;;  %v932_v44 = vadd.f32 %v8753_v52, %v8737_v46  ;;  %8754 = vst [vmem:[#allocation36_spill] sm:$0xff] %v6873_v36  ;;  %v6875_v2 = vpop.f32.mrb[94].mxu1  ;;  %v8758_v52 = vld [vmem:[#allocation28_spill] sm:$0xff] }
 0x1af   : > { %v6867_v23 = vmul.f32 0.5, %v928_v17  ;;  %v6869_v48 = vmul.f32 0.5, %v1121_v4  ;;  %8755 = vst [vmem:[#allocation11_spill] sm:$0xff] %v6875_v2  ;;  %v4630_v50 = vpop.eup %4629  ;;  %v1783_v20 = vadd.f32 1.0, %v4628_v24  ;;  %v6878_v5 = vmul.f32 0.5, %v930_v33  ;;  %v6882_v12 = vpop.f32.mrb[95].mxu0 }
 0x1b0   : > { %4643 = vtanh.f32 %v6855_v11  ;;  %v6880_v61 = vmul.f32 0.5, %v1123_v16  ;;  %8756 = vst [vmem:[#allocation14_spill] sm:$0xff] %v6882_v12  ;;  %v6884_v29 = vpop.f32.mrb[95].mxu1  ;;  %v1785_v4 = vadd.f32 1.0, %v4630_v50  ;;  %v6887_v56 = vmul.f32 0.5, %v932_v44 }
 0x1b1   : > { %8757 = vst [vmem:[#allocation15_spill] sm:$0xff] %v6884_v29  ;;  %v4632_v17 = vpop.eup %4631  ;;  %4645 = vtanh.f32 %v6865_v22  ;;  %v1125_v2 = vadd.f32 %v8758_v52, %v8739_v59  ;;  %v6892_v36 = vmul.f32 %v1783_v20, %v6763_v57  ;;  %v2387_v16 = vpack.c.bf16 %v6548_v0, %v6512_v40 }
 0x1b2   : > { %v4634_v24 = vpop.eup %4633  ;;  %v1784_v33 = vadd.f32 1.0, %v4632_v17  ;;  %4647 = vtanh.f32 %v6867_v23  ;;  %v6898_v50 = vmul.f32 %v1785_v4, %v6769_v7  ;;  %v2389_v40 = vpack.c.bf16 %v6554_v10, %v6522_v35  ;;  %v6915_v17 = vpop.f32.mrb[96].mxu0 }
 0x1b3   : > { %v4636_v29 = vpop.eup %4635  ;;  %v1786_v12 = vadd.f32 1.0, %v4634_v24  ;;  %4649 = vtanh.f32 %v6869_v48  ;;  %v6901_v44 = vmul.f32 0.5, %v1125_v2  ;;  %3067 = vmatmul.mubr.bf16.gmra.mrb[176].mxu0 %v2387_v16  ;;  %v2396_v2 = vpack.c.bf16 %v6656_v8, %v6624_v25  ;;  %8759 = vst [vmem:[#allocation37_spill] sm:$0xff] %v6915_v17  ;;  %v6925_v10 = vpop.f32.mrb[97].mxu0 }
 0x1b4   : > { %v4638_v52 = vpop.eup %4637  ;;  %v6904_v27 = vmul.f32 %v1784_v33, %v6771_v62  ;;  %v1791_v57 = vadd.f32 1.0, %v4636_v29  ;;  %4651 = vtanh.f32 %v6878_v5  ;;  %v6917_v62 = vpop.f32.mrb[96].mxu1  ;;  %3228 = vmatmul.mubr.bf16.gmra.mrb[176].mxu1 %v2389_v40  ;;  %v2398_v35 = vpack.c.bf16 %v6669_v58, %v6630_v15  ;;  %8761 = vst [vmem:[#allocation6_spill] sm:$0xff] %v6925_v10 }
 0x1b5   : > { %v4640_v0 = vpop.eup %4639  ;;  %v6910_v7 = vmul.f32 %v1786_v12, %v6773_v42  ;;  %v1793_v20 = vadd.f32 1.0, %v4638_v52  ;;  %4653 = vtanh.f32 %v6880_v61  ;;  %8760 = vst [vmem:[#allocation29_spill] sm:$0xff] %v6917_v62  ;;  %v6927_v42 = vpop.f32.mrb[97].mxu1  ;;  %3074 = vmatprep.mubr.bf16.mxu0 %v2396_v2 }
 0x1b6   : > { %v4642_v29 = vpop.eup %4641  ;;  %v6920_v4 = vmul.f32 %v1791_v57, %v6778_v47  ;;  %v1792_v24 = vadd.f32 1.0, %v4640_v0  ;;  %4655 = vtanh.f32 %v6887_v56  ;;  %8762 = vst [vmem:[#allocation28_spill] sm:$0xff] %v6927_v42  ;;  %v8763_v47 = vld [vmem:[#allocation8_spill] sm:$0xff]  ;;  %v6935_v33 = vpop.f32.mrb[98].mxu0  ;;  %3235 = vmatprep.mubr.bf16.mxu1 %v2398_v35  ;;  %v8767_v57 = vld [vmem:[#allocation30_spill] sm:$0xff] }
 0x1b7   : > { %v6930_v25 = vmul.f32 %v1793_v20, %v6780_v39  ;;  %v1794_v8 = vadd.f32 1.0, %v4642_v29  ;;  %4657 = vtanh.f32 %v6901_v44  ;;  %v936_v12 = vadd.f32 %v8763_v47, %v8733_v41  ;;  %8764 = vst [vmem:[#allocation8_spill] sm:$0xff] %v6935_v33  ;;  %v6937_v16 = vpop.f32.mrb[98].mxu1  ;;  %v8766_v39 = vld [vmem:[#allocation9_spill] sm:$0xff]  ;;  %v6948_v0 = vpop.f32.mrb[99].mxu0 }
 0x1b8   : > { %8765 = vst [vmem:[#allocation51_spill] sm:$0xff] %v6937_v16  ;;  %v6942_v58 = vmul.f32 %v1792_v24, %v6787_v21  ;;  %v1129_v52 = vadd.f32 %v8766_v39, %v8735_v14  ;;  %v938_v40 = vadd.f32 %v8767_v57, %v8737_v46  ;;  %8768 = vst [vmem:[#allocation9_spill] sm:$0xff] %v6948_v0  ;;  %v6950_v20 = vpop.f32.mrb[99].mxu1  ;;  %v8770_v21 = vld [vmem:[#allocation38_spill] sm:$0xff]  ;;  %v8771_v57 = vld [vmem:[#allocation39_spill] sm:$0xff]  ;;  %v6985_v42 = vpop.f32.mrb[100].mxu0 }
 0x1b9   : > { %8769 = vst [vmem:[#allocation30_spill] sm:$0xff] %v6950_v20  ;;  %v6955_v29 = vmul.f32 %v1794_v8, %v6809_v38  ;;  %v6957_v47 = vmul.f32 0.5, %v936_v12  ;;  %v1131_v24 = vadd.f32 %v8770_v21, %v8739_v59  ;;  %v940_v0 = vadd.f32 %v8771_v57, %v8733_v41  ;;  %v8772_v20 = vld [vmem:[#allocation40_spill] sm:$0xff]  ;;  %8773 = vst [vmem:[#allocation38_spill] sm:$0xff] %v6985_v42 }
 0x1ba   : > { %v4644_v35 = vpop.eup %4643  ;;  %v6961_v39 = vmul.f32 0.5, %v1129_v52  ;;  %v6963_v15 = vmul.f32 0.5, %v938_v40  ;;  %v1133_v16 = vadd.f32 %v8772_v20, %v8735_v14  ;;  %v942_v8 = vadd.f32 %v6537_v6, %v8737_v46  ;;  %v6987_v6 = vpop.f32.mrb[100].mxu1 }
 0x1bb   : > { %v4646_v2 = vpop.eup %4645  ;;  %v1799_v33 = vadd.f32 1.0, %v4644_v35  ;;  %4659 = vtanh.f32 %v6957_v47  ;;  %v6970_v38 = vmul.f32 0.5, %v1131_v24  ;;  %v6975_v40 = vmul.f32 0.5, %v940_v0  ;;  %8774 = vst [vmem:[#allocation39_spill] sm:$0xff] %v6987_v6 }
 0x1bc   : > { %v4648_v12 = vpop.eup %4647  ;;  %v1801_v52 = vadd.f32 1.0, %v4646_v2  ;;  %4661 = vtanh.f32 %v6961_v39  ;;  %v6977_v21 = vmul.f32 0.5, %v1133_v16  ;;  %v6983_v24 = vmul.f32 0.5, %v942_v8  ;;  %v8775_v16 = vld [vmem:[#allocation12_spill] sm:$0xff] }
 0x1bd   : > { %v4650_v57 = vpop.eup %4649  ;;  %v6980_v20 = vmul.f32 %v1799_v33, %v6855_v11  ;;  %v1800_v35 = vadd.f32 1.0, %v4648_v12  ;;  %4663 = vtanh.f32 %v6963_v15  ;;  %v1135_v11 = vadd.f32 %v8775_v16, %v8739_v59  ;;  %v6995_v33 = vpop.f32.mrb[101].mxu0 }
 0x1be   : > { %v4652_v2 = vpop.eup %4651  ;;  %v6990_v10 = vmul.f32 %v1801_v52, %v6865_v22  ;;  %v1802_v0 = vadd.f32 1.0, %v4650_v57  ;;  %4665 = vtanh.f32 %v6970_v38  ;;  %8776 = vst [vmem:[#allocation40_spill] sm:$0xff] %v6995_v33  ;;  %v6997_v12 = vpop.f32.mrb[101].mxu1  ;;  %v2395_v22 = vpack.c.bf16 %v6636_v1, %v6612_v53 }
 0x1bf   : > { %8777 = vst [vmem:[#allocation12_spill] sm:$0xff] %v6997_v12  ;;  %v4654_v8 = vpop.eup %4653  ;;  %v7000_v62 = vmul.f32 %v1800_v35, %v6867_v23  ;;  %v1807_v42 = vadd.f32 1.0, %v4652_v2  ;;  %4667 = vtanh.f32 %v6975_v40  ;;  %v7005_v52 = vpop.f32.mrb[102].mxu0  ;;  %v7013_v12 = vmul.f32 0.5, %v1135_v11 }
 0x1c0   : > { %8778 = vst [vmem:[#allocation52_spill] sm:$0xff] %v7005_v52  ;;  %v7007_v57 = vpop.f32.mrb[102].mxu1  ;;  %v4656_v6 = vpop.eup %4655  ;;  %v7010_v16 = vmul.f32 %v1802_v0, %v6869_v48  ;;  %v1809_v33 = vadd.f32 1.0, %v4654_v8  ;;  %4669 = vtanh.f32 %v6977_v21  ;;  %3075 = vmatmul.mubr.bf16.gmra.mrb[180].mxu0 %v2395_v22  ;;  %v2397_v48 = vpack.c.bf16 %v6646_v26, %v6618_v54  ;;  %v8783_v54 = vld [vmem:[#allocation17_spill] sm:$0xff]  ;;  %v8786_v22 = vld [vmem:[#allocation19_spill] sm:$0xff] }
 0x1c1   : > { %8779 = vst [vmem:[#allocation53_spill] sm:$0xff] %v7007_v57  ;;  %v7015_v23 = vpop.f32.mrb[103].mxu0  ;;  %v7017_v35 = vpop.f32.mrb[103].mxu1  ;;  %v7020_v53 = vmul.f32 %v1807_v42, %v6878_v5  ;;  %v1808_v1 = vadd.f32 1.0, %v4656_v6  ;;  %4671 = vtanh.f32 %v6983_v24  ;;  %v2404_v8 = vpack.c.bf16 %v6752_v43, %v6716_v9  ;;  %v8782_v42 = vld [vmem:[#allocation16_spill] sm:$0xff]  ;;  %v8785_v43 = vld [vmem:[#allocation31_spill] sm:$0xff] }
 0x1c2   : > { %8780 = vst [vmem:[#allocation54_spill] sm:$0xff] %v7015_v23  ;;  %8781 = vst [vmem:[#allocation55_spill] sm:$0xff] %v7017_v35  ;;  %v4658_v2 = vpop.eup %4657  ;;  %v7026_v0 = vmul.f32 %v1809_v33, %v6880_v61  ;;  %4673 = vtanh.f32 %v7013_v12  ;;  %3236 = vmatmul.mubr.bf16.gmra.mrb[180].mxu1 %v2397_v48  ;;  %v2406_v5 = vpack.c.bf16 %v6761_v34, %v6726_v32  ;;  %v8784_v33 = vld [vmem:[#allocation20_spill] sm:$0xff]  ;;  %v8787_v48 = vld [vmem:[#allocation41_spill] sm:$0xff] }
 0x1c3   : > { %v1810_v11 = vadd.f32 1.0, %v4658_v2  ;;  %v7032_v35 = vmul.f32 %v1808_v1, %v6887_v56  ;;  %v946_v6 = vadd.f32 %v8782_v42, %v8733_v41  ;;  %v1139_v26 = vadd.f32 %v8783_v54, %v8735_v14  ;;  %3082 = vmatprep.mubr.bf16.mxu0 %v2404_v8  ;;  %v7057_v42 = vpop.f32.mrb[104].mxu0  ;;  %v7059_v54 = vpop.f32.mrb[104].mxu1 }
 0x1c4   : > { %v948_v9 = vadd.f32 %v8784_v33, %v8737_v46  ;;  %v1141_v56 = vadd.f32 %v8785_v43, %v8739_v59  ;;  %v950_v2 = vadd.f32 %v8786_v22, %v8733_v41  ;;  %3243 = vmatprep.mubr.bf16.mxu1 %v2406_v5  ;;  %8789 = vst [vmem:[#allocation16_spill] sm:$0xff] %v7057_v42  ;;  %8790 = vst [vmem:[#allocation17_spill] sm:$0xff] %v7059_v54 }
 0x1c5   : > { %v7041_v61 = vmul.f32 %v1810_v11, %v6901_v44  ;;  %v4660_v32 = vpop.eup %4659  ;;  %v7049_v34 = vmul.f32 0.5, %v946_v6  ;;  %v7051_v1 = vmul.f32 0.5, %v1139_v26  ;;  %v1143_v44 = vadd.f32 %v8787_v48, %v8735_v14  ;;  %v8788_v11 = vld [vmem:[#allocation42_spill] sm:$0xff]  ;;  %v7067_v6 = vpop.f32.mrb[105].mxu0 }
 0x1c6   : > { %v952_v8 = vadd.f32 %v8788_v11, %v8737_v46  ;;  %v4662_v33 = vpop.eup %4661  ;;  %v1815_v43 = vadd.f32 1.0, %v4660_v32  ;;  %v7061_v23 = vmul.f32 0.5, %v948_v9  ;;  %v7063_v22 = vmul.f32 0.5, %v1141_v56  ;;  %8791 = vst [vmem:[#allocation20_spill] sm:$0xff] %v7067_v6  ;;  %v7069_v26 = vpop.f32.mrb[105].mxu1 }
 0x1c7   : > { %v7065_v5 = vmul.f32 0.5, %v950_v2  ;;  %8792 = vst [vmem:[#allocation31_spill] sm:$0xff] %v7069_v26  ;;  %v4664_v48 = vpop.eup %4663  ;;  %v1817_v57 = vadd.f32 1.0, %v4662_v33  ;;  %4675 = vtanh.f32 %v7049_v34  ;;  %v7072_v11 = vmul.f32 0.5, %v1143_v44  ;;  %v7076_v54 = vpop.f32.mrb[106].mxu0  ;;  %v8795_v26 = vld [vmem:[#allocation43_spill] sm:$0xff] }
 0x1c8   : > { %v7074_v42 = vmul.f32 0.5, %v952_v8  ;;  %8793 = vst [vmem:[#allocation19_spill] sm:$0xff] %v7076_v54  ;;  %v7078_v9 = vpop.f32.mrb[106].mxu1  ;;  %v4666_v56 = vpop.eup %4665  ;;  %v7081_v2 = vmul.f32 %v1815_v43, %v6957_v47  ;;  %v1816_v32 = vadd.f32 1.0, %v4664_v48  ;;  %4677 = vtanh.f32 %v7051_v1  ;;  %v8798_v47 = vld [vmem:[#allocation47_spill] sm:$0xff] }
 0x1c9   : > { %8794 = vst [vmem:[#allocation41_spill] sm:$0xff] %v7078_v9  ;;  %v1145_v33 = vadd.f32 %v8795_v26, %v8739_v59  ;;  %v7086_v6 = vpop.f32.mrb[107].mxu0  ;;  %v7088_v44 = vpop.f32.mrb[107].mxu1  ;;  %v7091_v52 = vmul.f32 %v1817_v57, %v6961_v39  ;;  %v1818_v54 = vadd.f32 1.0, %v4666_v56  ;;  %4679 = vtanh.f32 %v7061_v23  ;;  %v8799_v57 = vld [vmem:[#allocation34_spill] sm:$0xff] }
 0x1ca   : > { %8796 = vst [vmem:[#allocation42_spill] sm:$0xff] %v7086_v6  ;;  %8797 = vst [vmem:[#allocation43_spill] sm:$0xff] %v7088_v44  ;;  %v4668_v8 = vpop.eup %4667  ;;  %v2403_v43 = vpack.c.bf16 %v8798_v47, %v6700_v31  ;;  %v7097_v9 = vmul.f32 %v1816_v32, %v6963_v15  ;;  %4681 = vtanh.f32 %v7063_v22  ;;  %v8800_v56 = vld [vmem:[#allocation50_spill] sm:$0xff] }
 0x1cb   : > { %v4670_v48 = vpop.eup %4669  ;;  %v1823_v17 = vadd.f32 1.0, %v4668_v8  ;;  %v7100_v26 = vmul.f32 0.5, %v1145_v33  ;;  %v7103_v6 = vmul.f32 %v1818_v54, %v6970_v38  ;;  %4683 = vtanh.f32 %v7065_v5 }
 0x1cc   : > { %v4672_v44 = vpop.eup %4671  ;;  %v1825_v39 = vadd.f32 1.0, %v4670_v48  ;;  %3083 = vmatmul.mubr.bf16.gmra.mrb[184].mxu0 %v2403_v43  ;;  %v2405_v31 = vpack.c.bf16 %v8800_v56, %v8799_v57  ;;  %4685 = vtanh.f32 %v7072_v11  ;;  %v2412_v33 = vpack.c.bf16 %v6840_v37, %v6816_v3  ;;  %v7120_v43 = vpop.f32.mrb[108].mxu0  ;;  %v8804_v3 = vld [vmem:[#allocation13_spill] sm:$0xff]  ;;  %v8809_v57 = vld [vmem:[#allocation44_spill] sm:$0xff] }
 0x1cd   : > { %v4674_v47 = vpop.eup %4673  ;;  %v7109_v15 = vmul.f32 %v1823_v17, %v6975_v40  ;;  %v1824_v32 = vadd.f32 1.0, %v4672_v44  ;;  %4687 = vtanh.f32 %v7074_v42  ;;  %v2414_v8 = vpack.c.bf16 %v6853_v28, %v6822_v18  ;;  %8802 = vst [vmem:[#allocation34_spill] sm:$0xff] %v7120_v43  ;;  %v7122_v17 = vpop.f32.mrb[108].mxu1  ;;  %v8808_v28 = vld [vmem:[#allocation21_spill] sm:$0xff] }
 0x1ce   : > { %v7115_v38 = vmul.f32 %v1825_v39, %v6977_v21  ;;  %v1826_v54 = vadd.f32 1.0, %v4674_v47  ;;  %3244 = vmatmul.mubr.bf16.gmra.mrb[184].mxu1 %v2405_v31  ;;  %8803 = vst [vmem:[#allocation50_spill] sm:$0xff] %v7122_v17  ;;  %4689 = vtanh.f32 %v7100_v26  ;;  %3090 = vmatprep.mubr.bf16.mxu0 %v2412_v33  ;;  %v956_v37 = vadd.f32 %v8804_v3, %v8733_v41  ;;  %v8805_v21 = vld [vmem:[#allocation18_spill] sm:$0xff]  ;;  %v7132_v48 = vpop.f32.mrb[109].mxu0  ;;  %v7134_v39 = vpop.f32.mrb[109].mxu1  ;;  %v8810_v31 = vld [vmem:[#allocation24_spill] sm:$0xff] }
 0x1cf   : > { %v7125_v40 = vmul.f32 %v1824_v32, %v6983_v24  ;;  %v1149_v44 = vadd.f32 %v8805_v21, %v8735_v14  ;;  %8806 = vst [vmem:[#allocation13_spill] sm:$0xff] %v7132_v48  ;;  %8807 = vst [vmem:[#allocation18_spill] sm:$0xff] %v7134_v39  ;;  %3251 = vmatprep.mubr.bf16.mxu1 %v2414_v8  ;;  %v958_v24 = vadd.f32 %v8808_v28, %v8737_v46  ;;  %v7145_v32 = vpop.f32.mrb[110].mxu0  ;;  %v7147_v33 = vpop.f32.mrb[110].mxu1  ;;  %v8814_v8 = vld [vmem:[#allocation32_spill] sm:$0xff] }
 0x1d0   : > { %8801 = vst [vmem:[#allocation47_spill] sm:$0xff] %v7115_v38  ;;  %v7137_v18 = vmul.f32 %v1826_v54, %v7013_v12  ;;  %v1151_v56 = vadd.f32 %v8809_v57, %v8739_v59  ;;  %v960_v47 = vadd.f32 %v8810_v31, %v8733_v41  ;;  %8811 = vst [vmem:[#allocation21_spill] sm:$0xff] %v7145_v32  ;;  %v7149_v3 = vmul.f32 0.5, %v956_v37  ;;  %v8813_v12 = vld [vmem:[#allocation25_spill] sm:$0xff]  ;;  %v7157_v39 = vpop.f32.mrb[111].mxu0  ;;  %v7159_v57 = vpop.f32.mrb[111].mxu1 }
 0x1d1   : > { %8812 = vst [vmem:[#allocation44_spill] sm:$0xff] %v7147_v33  ;;  %v7151_v21 = vmul.f32 0.5, %v1149_v44  ;;  %v1153_v54 = vadd.f32 %v8813_v12, %v8735_v14  ;;  %v962_v28 = vadd.f32 %v8814_v8, %v8737_v46  ;;  %8815 = vst [vmem:[#allocation24_spill] sm:$0xff] %v7157_v39  ;;  %v4676_v48 = vpop.eup %4675  ;;  %v7161_v31 = vmul.f32 0.5, %v958_v24  ;;  %v8817_v37 = vld [vmem:[#allocation33_spill] sm:$0xff] }
 0x1d2   : > { %8816 = vst [vmem:[#allocation25_spill] sm:$0xff] %v7159_v57  ;;  %v7163_v32 = vmul.f32 0.5, %v1151_v56  ;;  %v7165_v33 = vmul.f32 0.5, %v960_v47  ;;  %v1155_v44 = vadd.f32 %v8817_v37, %v8739_v59  ;;  %v4678_v17 = vpop.eup %4677  ;;  %v1831_v43 = vadd.f32 1.0, %v4676_v48 }
 0x1d3   : > { %4691 = vtanh.f32 %v7149_v3  ;;  %v7170_v12 = vmul.f32 0.5, %v1153_v54  ;;  %v7172_v8 = vmul.f32 0.5, %v962_v28  ;;  %v4680_v39 = vpop.eup %4679  ;;  %v1833_v57 = vadd.f32 1.0, %v4678_v17 }
 0x1d4   : > { %4693 = vtanh.f32 %v7151_v21  ;;  %v7175_v24 = vmul.f32 0.5, %v1155_v44  ;;  %v2411_v56 = vpack.c.bf16 %v6828_v63, %v6796_v19  ;;  %v4682_v47 = vpop.eup %4681  ;;  %v7180_v37 = vmul.f32 %v1831_v43, %v7049_v34  ;;  %v7191_v63 = vpop.f32.mrb[112].mxu0 }
 0x1d5   : > { %v1832_v48 = vadd.f32 1.0, %v4680_v39  ;;  %4695 = vtanh.f32 %v7161_v31  ;;  %v2413_v54 = vpack.c.bf16 %v6834_v60, %v6806_v51  ;;  %v4684_v28 = vpop.eup %4683  ;;  %v7186_v17 = vmul.f32 %v1833_v57, %v7051_v1  ;;  %8818 = vst [vmem:[#allocation32_spill] sm:$0xff] %v7191_v63  ;;  %v7193_v34 = vpop.f32.mrb[112].mxu1 }
 0x1d6   : > { %v1834_v38 = vadd.f32 1.0, %v4682_v47  ;;  %4697 = vtanh.f32 %v7163_v32  ;;  %3091 = vmatmul.mubr.bf16.gmra.mrb[188].mxu0 %v2411_v56  ;;  %v2296_v19 = vpack.c.bf16 %v6942_v58, %v6904_v27  ;;  %8819 = vst [vmem:[#allocation33_spill] sm:$0xff] %v7193_v34  ;;  %v4686_v43 = vpop.eup %4685  ;;  %v1839_v51 = vadd.f32 1.0, %v4684_v28  ;;  %v7201_v1 = vpop.f32.mrb[113].mxu0 }
 0x1d7   : > { %v7196_v39 = vmul.f32 %v1832_v48, %v7061_v23  ;;  %4699 = vtanh.f32 %v7165_v33  ;;  %3252 = vmatmul.mubr.bf16.gmra.mrb[188].mxu1 %v2413_v54  ;;  %v2298_v60 = vpack.c.bf16 %v6955_v29, %v6910_v7  ;;  %8820 = vst [vmem:[#allocation56_spill] sm:$0xff] %v7201_v1  ;;  %v7203_v57 = vpop.f32.mrb[113].mxu1  ;;  %v4688_v27 = vpop.eup %4687  ;;  %v1841_v44 = vadd.f32 1.0, %v4686_v43  ;;  %v8822_v23 = vld [vmem:[#allocation22_spill] sm:$0xff] }
 0x1d8   : > { %8821 = vst [vmem:[#allocation57_spill] sm:$0xff] %v7203_v57  ;;  %v7206_v58 = vmul.f32 %v1834_v38, %v7063_v22  ;;  %4701 = vtanh.f32 %v7170_v12  ;;  %3292 = vmatprep.mubr.bf16.mxu0 %v2296_v19  ;;  %v966_v56 = vadd.f32 %v8822_v23, %v8733_v41  ;;  %v7211_v47 = vpop.f32.mrb[114].mxu0  ;;  %v7213_v48 = vpop.f32.mrb[114].mxu1  ;;  %v7216_v29 = vmul.f32 %v1839_v51, %v7065_v5  ;;  %v8825_v22 = vld [vmem:[#allocation35_spill] sm:$0xff] }
 0x1d9   : > { %8823 = vst [vmem:[#allocation22_spill] sm:$0xff] %v7211_v47  ;;  %8824 = vst [vmem:[#allocation58_spill] sm:$0xff] %v7213_v48  ;;  %v4690_v7 = vpop.eup %4689  ;;  %v1840_v54 = vadd.f32 1.0, %v4688_v27  ;;  %4703 = vtanh.f32 %v7172_v8  ;;  %3453 = vmatprep.mubr.bf16.mxu1 %v2298_v60  ;;  %v1159_v38 = vadd.f32 %v8825_v22, %v8735_v14  ;;  %v7221_v28 = vpop.f32.mrb[115].mxu0  ;;  %v7226_v43 = vmul.f32 %v1841_v44, %v7072_v11  ;;  %v8828_v60 = vld [vmem:[#allocation26_spill] sm:$0xff]  ;;  %v8829_v22 = vld [vmem:[#allocation23_spill] sm:$0xff] }
 0x1da   : > { %8826 = vst [vmem:[#allocation35_spill] sm:$0xff] %v7221_v28  ;;  %v7223_v19 = vpop.f32.mrb[115].mxu1  ;;  %v1842_v23 = vadd.f32 1.0, %v4690_v7  ;;  %4705 = vtanh.f32 %v7175_v24  ;;  %v7229_v48 = vmul.f32 0.5, %v966_v56  ;;  %v968_v27 = vadd.f32 %v8828_v60, %v8737_v46  ;;  %v8830_v11 = vld [vmem:[#allocation45_spill] sm:$0xff]  ;;  %v8831_v56 = vld [vmem:[#allocation46_spill] sm:$0xff] }
 0x1db   : > { %8827 = vst [vmem:[#allocation59_spill] sm:$0xff] %v7223_v19  ;;  %v7232_v5 = vmul.f32 %v1840_v54, %v7074_v42  ;;  %v7234_v51 = vmul.f32 0.5, %v1159_v38  ;;  %v1161_v28 = vadd.f32 %v8829_v22, %v8739_v59  ;;  %v970_v44 = vadd.f32 %v8830_v11, %v8733_v41  ;;  %v8832_v60 = vld [vmem:[#allocation48_spill] sm:$0xff]  ;;  %v8833_v11 = vld [vmem:[#allocation49_spill] sm:$0xff] }
 0x1dc   : > { %v7241_v19 = vmul.f32 %v1842_v23, %v7100_v26  ;;  %4707 = vtanh.f32 %v7229_v48  ;;  %v1163_v42 = vadd.f32 %v8831_v56, %v8735_v14  ;;  %v7249_v54 = vmul.f32 0.5, %v968_v27  ;;  %v7264_v27 = vpop.f32.mrb[116].mxu0 }
 0x1dd   : > { %v4692_v7 = vpop.eup %4691  ;;  %4709 = vtanh.f32 %v7234_v51  ;;  %v7251_v38 = vmul.f32 0.5, %v1161_v28  ;;  %v972_v22 = vadd.f32 %v8832_v60, %v8737_v46  ;;  %v7255_v47 = vmul.f32 0.5, %v970_v44  ;;  %v7266_v28 = vpop.f32.mrb[116].mxu1 }
 0x1de   : > { %v4694_v26 = vpop.eup %4693  ;;  %v1847_v23 = vadd.f32 1.0, %v4692_v7  ;;  %v7257_v57 = vmul.f32 0.5, %v1163_v42  ;;  %v1165_v1 = vadd.f32 %v8833_v11, %v8739_v59  ;;  %v8834_v56 = vpack.c.bf16 %v6920_v4, %v6892_v36  ;;  %8835 = vst [vmem:[#allocation26_spill] sm:$0xff] %v7266_v28  ;;  %v7276_v60 = vpop.f32.mrb[117].mxu0 }
 0x1df   : > { %v4696_v34 = vpop.eup %4695  ;;  %v1849_v63 = vadd.f32 1.0, %v4694_v26  ;;  %4711 = vtanh.f32 %v7249_v54  ;;  %v7269_v7 = vmul.f32 0.5, %v972_v22  ;;  %v8836_v44 = vpack.c.bf16 %v6930_v25, %v6898_v50  ;;  %8837 = vst [vmem:[#allocation23_spill] sm:$0xff] %v7276_v60  ;;  %v7278_v36 = vpop.f32.mrb[117].mxu1 }
 0x1e0   : > { %3293 = vmatmul.mubr.bf16.vlgmr.msra.gmra.mrb[192].mxu0 %v8834_v56  ;;  %v2304_v42 = vpack.c.bf16 %v7032_v35, %v7000_v62  ;;  %8838 = vst [vmem:[#allocation45_spill] sm:$0xff] %v7278_v36  ;;  %v4698_v4 = vpop.eup %4697  ;;  %v7281_v11 = vmul.f32 %v1847_v23, %v7149_v3  ;;  %v1848_v26 = vadd.f32 1.0, %v4696_v34  ;;  %4713 = vtanh.f32 %v7251_v38  ;;  %v7286_v56 = vpop.f32.mrb[118].mxu0 }
 0x1e1   : > { %3454 = vmatmul.mubr.bf16.vlgmr.msra.gmra.mrb[192].mxu1 %v8836_v44  ;;  %v7284_v22 = vmul.f32 0.5, %v1165_v1  ;;  %8839 = vst [vmem:[#allocation46_spill] sm:$0xff] %v7286_v56  ;;  %v7288_v50 = vpop.f32.mrb[118].mxu1  ;;  %v4700_v25 = vpop.eup %4699  ;;  %v7291_v62 = vmul.f32 %v1849_v63, %v7151_v21  ;;  %v1850_v35 = vadd.f32 1.0, %v4698_v4  ;;  %4715 = vtanh.f32 %v7255_v47  ;;  %v8843_v21 = vld [vmem:[#allocation2_spill] sm:$0xff] }
 0x1e2   : > { %8840 = vst [vmem:[#allocation48_spill] sm:$0xff] %v7288_v50  ;;  %3300 = vmatprep.mubr.bf16.mxu0 %v2304_v42  ;;  %v2306_v3 = vpack.c.bf16 %v7041_v61, %v7010_v16  ;;  %v7296_v34 = vpop.f32.mrb[119].mxu0  ;;  %v7298_v23 = vpop.f32.mrb[119].mxu1  ;;  %v7301_v44 = vmul.f32 %v1848_v26, %v7161_v31  ;;  %v1855_v50 = vadd.f32 1.0, %v4700_v25  ;;  %4717 = vtanh.f32 %v7257_v57  ;;  %v8844_v16 = vld [vmem:[#allocation7_spill] sm:$0xff] }
 0x1e3   : > { %8841 = vst [vmem:[#allocation49_spill] sm:$0xff] %v7296_v34  ;;  %8842 = vst [vmem:[#allocation60_spill] sm:$0xff] %v7298_v23  ;;  %v4702_v1 = vpop.eup %4701  ;;  %v976_v63 = vadd.f32 %v8843_v21, %v8733_v41  ;;  %v7307_v42 = vmul.f32 %v1850_v35, %v7163_v32  ;;  %4719 = vtanh.f32 %v7269_v7  ;;  %v1169_v61 = vadd.f32 %v8844_v16, %v8735_v14 }
 0x1e4   : > { %v4704_v4 = vpop.eup %4703  ;;  %v1857_v56 = vadd.f32 1.0, %v4702_v1  ;;  %3461 = vmatprep.mubr.bf16.mxu1 %v2306_v3  ;;  %v7313_v31 = vmul.f32 %v1855_v50, %v7165_v33  ;;  %4721 = vtanh.f32 %v7284_v22  ;;  %v8845_v3 = vld [vmem:[#allocation4_spill] sm:$0xff]  ;;  %v8846_v33 = vld [vmem:[#allocation27_spill] sm:$0xff] }
 0x1e5   : > { %v4706_v23 = vpop.eup %4705  ;;  %v1856_v26 = vadd.f32 1.0, %v4704_v4  ;;  %v7316_v25 = vmul.f32 0.5, %v976_v63  ;;  %v7321_v35 = vmul.f32 0.5, %v1169_v61  ;;  %v978_v1 = vadd.f32 %v8845_v3, %v8737_v46 }
 0x1e6   : > { %v7319_v21 = vmul.f32 %v1857_v56, %v7170_v12  ;;  %v1858_v32 = vadd.f32 1.0, %v4706_v23  ;;  %v4708_v34 = vpop.eup %4707  ;;  %v1171_v50 = vadd.f32 %v8846_v33, %v8739_v59  ;;  %v980_v63 = vadd.f32 %v6801_v49, %v8733_v41  ;;  %v7333_v12 = vpop.f32.mrb[120].mxu0 }
 0x1e7   : > { %v7326_v16 = vmul.f32 %v1856_v26, %v7172_v8  ;;  %4723 = vtanh.f32 %v7316_v25  ;;  %8847 = vst [vmem:[#allocation2_spill] sm:$0xff] %v7333_v12  ;;  %v7335_v56 = vpop.f32.mrb[120].mxu1  ;;  %v4710_v23 = vpop.eup %4709  ;;  %v1863_v61 = vadd.f32 1.0, %v4708_v34  ;;  %v7341_v8 = vmul.f32 0.5, %v978_v1  ;;  %v8853_v1 = vld [vmem:[#allocation3_spill] sm:$0xff] }
 0x1e8   : > { %8848 = vst [vmem:[#allocation7_spill] sm:$0xff] %v7335_v56  ;;  %v7338_v4 = vmul.f32 %v1858_v32, %v7175_v24  ;;  %4725 = vtanh.f32 %v7321_v35  ;;  %v7343_v26 = vpop.f32.mrb[121].mxu0  ;;  %v7345_v3 = vpop.f32.mrb[121].mxu1  ;;  %v1865_v33 = vadd.f32 1.0, %v4710_v23  ;;  %v7347_v36 = vmul.f32 0.5, %v1171_v50  ;;  %v8854_v50 = vld [vmem:[#allocation10_spill] sm:$0xff] }
 0x1e9   : > { %8849 = vst [vmem:[#allocation4_spill] sm:$0xff] %v7343_v26  ;;  %8850 = vst [vmem:[#allocation27_spill] sm:$0xff] %v7345_v3  ;;  %v7349_v49 = vmul.f32 0.5, %v980_v63  ;;  %v1173_v56 = vadd.f32 %v6803_v55, %v8735_v14  ;;  %v7353_v12 = vpop.f32.mrb[122].mxu0  ;;  %v7355_v24 = vpop.f32.mrb[122].mxu1  ;;  %v7358_v32 = vmul.f32 %v1863_v61, %v7229_v48  ;;  %4727 = vtanh.f32 %v7341_v8 }
 0x1ea   : > { %8851 = vst [vmem:[#allocation61_spill] sm:$0xff] %v7353_v12  ;;  %8852 = vst [vmem:[#allocation62_spill] sm:$0xff] %v7355_v24  ;;  %v4712_v34 = vpop.eup %4711  ;;  %v982_v23 = vadd.f32 %v8853_v1, %v8737_v46  ;;  %v1175_v63 = vadd.f32 %v8854_v50, %v8739_v59  ;;  %v7365_v3 = vpop.f32.mrb[123].mxu0  ;;  %v7370_v12 = vmul.f32 %v1865_v33, %v7234_v51  ;;  %4729 = vtanh.f32 %v7347_v36 }
 0x1eb   : > { %8855 = vst [vmem:[#allocation3_spill] sm:$0xff] %v7365_v3  ;;  %v7367_v26 = vpop.f32.mrb[123].mxu1  ;;  %v4714_v55 = vpop.eup %4713  ;;  %v1864_v24 = vadd.f32 1.0, %v4712_v34  ;;  %v7373_v48 = vmul.f32 0.5, %v1173_v56  ;;  %4731 = vtanh.f32 %v7349_v49  ;;  %v2303_v51 = vpack.c.bf16 %v7020_v53, %v6980_v20 }
 0x1ec   : > { %8856 = vst [vmem:[#allocation10_spill] sm:$0xff] %v7367_v26  ;;  %v4716_v61 = vpop.eup %4715  ;;  %v1866_v60 = vadd.f32 1.0, %v4714_v55  ;;  %v7376_v1 = vmul.f32 0.5, %v982_v23  ;;  %v7378_v50 = vmul.f32 0.5, %v1175_v63  ;;  %v2305_v23 = vpack.c.bf16 %v7026_v0, %v6990_v10  ;;  %v7398_v53 = vpop.f32.mrb[124].mxu0 }
 0x1ed   : > { %v4718_v3 = vpop.eup %4717  ;;  %v7381_v26 = vmul.f32 %v1864_v24, %v7249_v54  ;;  %v1871_v28 = vadd.f32 1.0, %v4716_v61  ;;  %4733 = vtanh.f32 %v7373_v48  ;;  %3301 = vmatmul.mubr.bf16.gmra.mrb[196].mxu0 %v2303_v51  ;;  %v2312_v20 = vpack.c.bf16 %v7125_v40, %v7097_v9 }
 0x1ee   : > { %v4720_v56 = vpop.eup %4719  ;;  %v7387_v33 = vmul.f32 %v1866_v60, %v7251_v38  ;;  %v1873_v34 = vadd.f32 1.0, %v4718_v3  ;;  %4735 = vtanh.f32 %v7376_v1  ;;  %v7400_v38 = vpop.f32.mrb[124].mxu1  ;;  %3462 = vmatmul.mubr.bf16.gmra.mrb[196].mxu1 %v2305_v23  ;;  %v2314_v10 = vpack.c.bf16 %v7137_v18, %v7103_v6  ;;  %v8859_v6 = vld [vmem:[#allocation5_spill] sm:$0xff] }
 0x1ef   : > { %v4722_v63 = vpop.eup %4721  ;;  %v7393_v54 = vmul.f32 %v1871_v28, %v7255_v47  ;;  %v1872_v24 = vadd.f32 1.0, %v4720_v56  ;;  %4737 = vtanh.f32 %v7378_v50  ;;  %v986_v0 = vadd.f32 %v6848_v30, %v8733_v41  ;;  %v7409_v47 = vpop.f32.mrb[125].mxu0  ;;  %3308 = vmatprep.mubr.bf16.mxu0 %v2312_v20 }
 0x1f0   : > { %v7403_v60 = vmul.f32 %v1873_v34, %v7257_v57  ;;  %v1874_v3 = vadd.f32 1.0, %v4722_v63  ;;  %8857 = vst [vmem:[#allocation63_spill] sm:$0xff] %v7409_v47  ;;  %v7411_v28 = vpop.f32.mrb[125].mxu1  ;;  %v1179_v57 = vadd.f32 %v6850_v45, %v8735_v14  ;;  %v988_v55 = vadd.f32 %v6861_v13, %v8737_v46  ;;  %v7422_v61 = vpop.f32.mrb[126].mxu0  ;;  %3469 = vmatprep.mubr.bf16.mxu1 %v2314_v10  ;;  %v8862_v45 = vld [vmem:[#allocation36_spill] sm:$0xff] }
 0x1f1   : > { %8858 = vst [vmem:[#allocation64_spill] sm:$0xff] %v7411_v28  ;;  %v4724_v9 = vpop.eup %4723  ;;  %v7414_v40 = vmul.f32 %v1872_v24, %v7269_v7  ;;  %v1181_v18 = vadd.f32 %v8859_v6, %v8739_v59  ;;  %8860 = vst [vmem:[#allocation5_spill] sm:$0xff] %v7422_v61  ;;  %v7424_v30 = vpop.f32.mrb[126].mxu1  ;;  %v7429_v34 = vmul.f32 0.5, %v986_v0  ;;  %v990_v23 = vadd.f32 %v8862_v45, %v8733_v41  ;;  %v8865_v0 = vld [vmem:[#allocation11_spill] sm:$0xff] }
 0x1f2   : > { %8861 = vst [vmem:[#allocation65_spill] sm:$0xff] %v7424_v30  ;;  %v4726_v51 = vpop.eup %4725  ;;  %v7427_v56 = vmul.f32 %v1874_v3, %v7284_v22  ;;  %v1879_v7 = vadd.f32 1.0, %v4724_v9  ;;  %v7433_v63 = vpop.f32.mrb[127].mxu0  ;;  %v7437_v20 = vmul.f32 0.5, %v1179_v57  ;;  %v7439_v6 = vmul.f32 0.5, %v988_v55  ;;  %v8866_v55 = vld [vmem:[#allocation14_spill] sm:$0xff] }
 0x1f3   : > { %8863 = vst [vmem:[#allocation36_spill] sm:$0xff] %v7433_v63  ;;  %v7435_v13 = vpop.f32.mrb[127].mxu1  ;;  %v1881_v24 = vadd.f32 1.0, %v4726_v51  ;;  %v7441_v30 = vmul.f32 0.5, %v1181_v18  ;;  %v4728_v22 = vpop.eup %4727  ;;  %4739 = vtanh.f32 %v7429_v34  ;;  %v7447_v10 = vmul.f32 0.5, %v990_v23  ;;  %v8867_v23 = vld [vmem:[#allocation15_spill] sm:$0xff] }
 0x1f4   : > { %8864 = vst [vmem:[#allocation66_spill] sm:$0xff] %v7435_v13  ;;  %v7444_v3 = vmul.f32 %v1879_v7, %v7316_v25  ;;  %v1183_v9 = vadd.f32 %v8865_v0, %v8735_v14  ;;  %v4730_v45 = vpop.eup %4729  ;;  %v1880_v57 = vadd.f32 1.0, %v4728_v22  ;;  %4741 = vtanh.f32 %v7437_v20 }
 0x1f5   : > { %v7452_v51 = vmul.f32 %v1881_v24, %v7321_v35  ;;  %v992_v18 = vadd.f32 %v8866_v55, %v8737_v46  ;;  %v4732_v13 = vpop.eup %4731  ;;  %v1882_v25 = vadd.f32 1.0, %v4730_v45  ;;  %4743 = vtanh.f32 %v7439_v6 }
 0x1f6   : > { %v7458_v7 = vmul.f32 0.5, %v1183_v9  ;;  %v1185_v63 = vadd.f32 %v8867_v23, %v8739_v59  ;;  %v7463_v61 = vmul.f32 %v1880_v57, %v7341_v8  ;;  %v1887_v35 = vadd.f32 1.0, %v4732_v13 }
 0x1f7   : > { %v4734_v0 = vpop.eup %4733  ;;  %4745 = vtanh.f32 %v7441_v30  ;;  %v7466_v24 = vmul.f32 0.5, %v992_v18  ;;  %v7469_v55 = vmul.f32 %v1882_v25, %v7347_v36  ;;  %v2311_v13 = vpack.c.bf16 %v7109_v15, %v7081_v2  ;;  %v8868_v18 = vld [vmem:[#allocation47_spill] sm:$0xff] }
 0x1f8   : > { %v4736_v22 = vpop.eup %4735  ;;  %v1889_v45 = vadd.f32 1.0, %v4734_v0  ;;  %4747 = vtanh.f32 %v7447_v10  ;;  %v7472_v9 = vmul.f32 0.5, %v1185_v63  ;;  %v7475_v23 = vmul.f32 %v1887_v35, %v7349_v49  ;;  %v8871_v0 = vld [vmem:[#allocation6_spill] sm:$0xff] }
 0x1f9   : > { %v4738_v28 = vpop.eup %4737  ;;  %v1888_v8 = vadd.f32 1.0, %v4736_v22  ;;  %4749 = vtanh.f32 %v7458_v7  ;;  %v2313_v63 = vpack.c.bf16 %v8868_v18, %v7091_v52  ;;  %3309 = vmatmul.mubr.bf16.gmra.mrb[200].mxu0 %v2311_v13  ;;  %v2320_v49 = vpack.c.bf16 %v7232_v5, %v7196_v39  ;;  %v8870_v52 = vld [vmem:[#allocation29_spill] sm:$0xff]  ;;  %v7503_v22 = vpop.f32.mrb[128].mxu0  ;;  %v8873_v39 = vld [vmem:[#allocation28_spill] sm:$0xff] }
 0x1fa   : > { %v7481_v57 = vmul.f32 %v1889_v45, %v7373_v48  ;;  %v1890_v36 = vadd.f32 1.0, %v4738_v28  ;;  %4751 = vtanh.f32 %v7466_v24  ;;  %v2322_v2 = vpack.c.bf16 %v7241_v19, %v7206_v58  ;;  %v8869_v48 = vld [vmem:[#allocation37_spill] sm:$0xff]  ;;  %8872 = vst [vmem:[#allocation11_spill] sm:$0xff] %v7503_v22  ;;  %v8874_v19 = vld [vmem:[#allocation8_spill] sm:$0xff]  ;;  %v7513_v13 = vpop.f32.mrb[129].mxu0 }
 0x1fb   : > { %v7487_v25 = vmul.f32 %v1888_v8, %v7376_v1  ;;  %4753 = vtanh.f32 %v7472_v9  ;;  %3470 = vmatmul.mubr.bf16.gmra.mrb[200].mxu1 %v2313_v63  ;;  %v996_v28 = vadd.f32 %v8869_v48, %v8733_v41  ;;  %v1189_v1 = vadd.f32 %v8870_v52, %v8735_v14  ;;  %3316 = vmatprep.mubr.bf16.mxu0 %v2320_v49  ;;  %v7511_v8 = vpop.f32.mrb[128].mxu1 }
 0x1fc   : > { %v7495_v15 = vmul.f32 %v1890_v36, %v7378_v50  ;;  %v998_v35 = vadd.f32 %v8871_v0, %v8737_v46  ;;  %3477 = vmatprep.mubr.bf16.mxu1 %v2322_v2  ;;  %v1191_v58 = vadd.f32 %v8873_v39, %v8739_v59  ;;  %v1000_v5 = vadd.f32 %v8874_v19, %v8733_v41  ;;  %v8875_v50 = vld [vmem:[#allocation51_spill] sm:$0xff]  ;;  %v8878_v2 = vld [vmem:[#allocation9_spill] sm:$0xff]  ;;  %v7523_v52 = vpop.f32.mrb[129].mxu1  ;;  %v7525_v0 = vpop.f32.mrb[130].mxu0 }
 0x1fd   : > { %v1193_v45 = vadd.f32 %v8875_v50, %v8735_v14  ;;  %8876 = vst [vmem:[#allocation14_spill] sm:$0xff] %v7511_v8  ;;  %8877 = vst [vmem:[#allocation15_spill] sm:$0xff] %v7513_v13  ;;  %v4740_v36 = vpop.eup %4739  ;;  %v7515_v18 = vmul.f32 0.5, %v996_v28  ;;  %v7517_v63 = vmul.f32 0.5, %v1189_v1  ;;  %v1002_v48 = vadd.f32 %v8878_v2, %v8737_v46  ;;  %v7533_v28 = vpop.f32.mrb[130].mxu1 }
 0x1fe   : > { %v7519_v49 = vmul.f32 0.5, %v998_v35  ;;  %8879 = vst [vmem:[#allocation47_spill] sm:$0xff] %v7523_v52  ;;  %8880 = vst [vmem:[#allocation37_spill] sm:$0xff] %v7525_v0  ;;  %v4742_v39 = vpop.eup %4741  ;;  %v1895_v19 = vadd.f32 1.0, %v4740_v36  ;;  %v7527_v50 = vmul.f32 0.5, %v1191_v58  ;;  %v7529_v8 = vmul.f32 0.5, %v1000_v5 }
 0x1ff   : > { %v7531_v13 = vmul.f32 0.5, %v1193_v45  ;;  %8881 = vst [vmem:[#allocation29_spill] sm:$0xff] %v7533_v28  ;;  %v7535_v1 = vpop.f32.mrb[131].mxu0  ;;  %v4744_v35 = vpop.eup %4743  ;;  %v1897_v22 = vadd.f32 1.0, %v4742_v39  ;;  %4755 = vtanh.f32 %v7515_v18  ;;  %v7538_v2 = vmul.f32 0.5, %v1002_v48  ;;  %v8883_v0 = vld [vmem:[#allocation30_spill] sm:$0xff] }
 0x200   : > { %8882 = vst [vmem:[#allocation6_spill] sm:$0xff] %v7535_v1  ;;  %v1195_v52 = vadd.f32 %v8883_v0, %v8739_v59  ;;  %v7542_v36 = vpop.f32.mrb[131].mxu1  ;;  %v7545_v5 = vmul.f32 %v1895_v19, %v7429_v34  ;;  %v1896_v45 = vadd.f32 1.0, %v4744_v35  ;;  %4757 = vtanh.f32 %v7517_v63 }
 0x201   : > { %8884 = vst [vmem:[#allocation28_spill] sm:$0xff] %v7542_v36  ;;  %v4746_v58 = vpop.eup %4745  ;;  %v2319_v28 = vpack.c.bf16 %v7216_v29, %v7180_v37  ;;  %v7551_v1 = vmul.f32 %v1897_v22, %v7437_v20  ;;  %4759 = vtanh.f32 %v7519_v49  ;;  %v2321_v37 = vpack.c.bf16 %v7226_v43, %v7186_v17 }
 0x202   : > { %v4748_v39 = vpop.eup %4747  ;;  %v1898_v48 = vadd.f32 1.0, %v4746_v58  ;;  %v7554_v0 = vmul.f32 0.5, %v1195_v52  ;;  %v7557_v47 = vmul.f32 %v1896_v45, %v7439_v6  ;;  %4761 = vtanh.f32 %v7527_v50  ;;  %v8888_v45 = vld [vmem:[#allocation12_spill] sm:$0xff] }
 0x203   : > { %v4750_v36 = vpop.eup %4749  ;;  %v1903_v34 = vadd.f32 1.0, %v4748_v39  ;;  %3317 = vmatmul.mubr.bf16.gmra.mrb[204].mxu0 %v2319_v28  ;;  %4763 = vtanh.f32 %v7529_v8  ;;  %v2328_v52 = vpack.c.bf16 %v7326_v16, %v7301_v44  ;;  %3478 = vmatmul.mubr.bf16.gmra.mrb[204].mxu1 %v2321_v37  ;;  %v2330_v17 = vpack.c.bf16 %v7338_v4, %v7307_v42  ;;  %v8885_v44 = vld [vmem:[#allocation38_spill] sm:$0xff]  ;;  %v8886_v28 = vld [vmem:[#allocation39_spill] sm:$0xff]  ;;  %v8887_v42 = vld [vmem:[#allocation40_spill] sm:$0xff] }
 0x204   : > { %v4752_v29 = vpop.eup %4751  ;;  %v7563_v20 = vmul.f32 %v1898_v48, %v7441_v30  ;;  %v1905_v22 = vadd.f32 1.0, %v4750_v36  ;;  %4765 = vtanh.f32 %v7531_v13  ;;  %v1006_v16 = vadd.f32 %v8885_v44, %v8733_v41 }
 0x205   : > { %v4754_v19 = vpop.eup %4753  ;;  %v7569_v6 = vmul.f32 %v1903_v34, %v7447_v10  ;;  %v1904_v35 = vadd.f32 1.0, %v4752_v29  ;;  %4767 = vtanh.f32 %v7538_v2  ;;  %3324 = vmatprep.mubr.bf16.mxu0 %v2328_v52  ;;  %3485 = vmatprep.mubr.bf16.mxu1 %v2330_v17  ;;  %v1199_v36 = vadd.f32 %v8886_v28, %v8735_v14  ;;  %v8890_v29 = vld [vmem:[#allocation53_spill] sm:$0xff]  ;;  %v8891_v52 = vld [vmem:[#allocation54_spill] sm:$0xff] }
 0x206   : > { %v7575_v43 = vmul.f32 %v1905_v22, %v7458_v7  ;;  %v1906_v30 = vadd.f32 1.0, %v4754_v19  ;;  %4769 = vtanh.f32 %v7554_v0  ;;  %v1008_v4 = vadd.f32 %v8887_v42, %v8737_v46 }
 0x207   : > { %v7581_v10 = vmul.f32 %v1904_v35, %v7466_v24  ;;  %v7591_v58 = vmul.f32 0.5, %v1006_v16  ;;  %v1201_v39 = vadd.f32 %v8888_v45, %v8739_v59  ;;  %v8889_v24 = vld [vmem:[#allocation52_spill] sm:$0xff]  ;;  %v7597_v34 = vmul.f32 0.5, %v1199_v36 }
 0x208   : > { %v7589_v7 = vmul.f32 %v1906_v30, %v7472_v9  ;;  %v1010_v48 = vadd.f32 %v8889_v24, %v8733_v41  ;;  %v7599_v37 = vmul.f32 0.5, %v1008_v4  ;;  %v1203_v22 = vadd.f32 %v8890_v29, %v8735_v14  ;;  %v8892_v30 = vld [vmem:[#allocation55_spill] sm:$0xff] }
 0x209   : > { %v1012_v19 = vadd.f32 %v8891_v52, %v8737_v46  ;;  %v4756_v9 = vpop.eup %4755  ;;  %4771 = vtanh.f32 %v7591_v58  ;;  %v7606_v35 = vmul.f32 0.5, %v1201_v39  ;;  %v1205_v44 = vadd.f32 %v8892_v30, %v8739_v59 }
 0x20a   : > { %v7608_v17 = vmul.f32 0.5, %v1010_v48  ;;  %v4758_v16 = vpop.eup %4757  ;;  %v1911_v28 = vadd.f32 1.0, %v4756_v9  ;;  %4773 = vtanh.f32 %v7597_v34  ;;  %v7613_v36 = vmul.f32 0.5, %v1203_v22 }
 0x20b   : > { %v7615_v42 = vmul.f32 0.5, %v1012_v19  ;;  %v4760_v4 = vpop.eup %4759  ;;  %v1913_v45 = vadd.f32 1.0, %v4758_v16  ;;  %4775 = vtanh.f32 %v7599_v37  ;;  %v7618_v24 = vmul.f32 0.5, %v1205_v44 }
 0x20c   : > { %v2327_v39 = vpack.c.bf16 %v7313_v31, %v7281_v11  ;;  %v4762_v48 = vpop.eup %4761  ;;  %v7623_v29 = vmul.f32 %v1911_v28, %v7515_v18  ;;  %v1912_v52 = vadd.f32 1.0, %v4760_v4  ;;  %4777 = vtanh.f32 %v7606_v35 }
 0x20d   : > { %v2329_v22 = vpack.c.bf16 %v7319_v21, %v7291_v62  ;;  %v4764_v19 = vpop.eup %4763  ;;  %v7629_v9 = vmul.f32 %v1913_v45, %v7517_v63  ;;  %v1914_v30 = vadd.f32 1.0, %v4762_v48  ;;  %4779 = vtanh.f32 %v7608_v17 }
 0x20e   : > { %3325 = vmatmul.mubr.bf16.gmra.mrb[208].mxu0 %v2327_v39  ;;  %v2336_v11 = vpack.c.bf16 %v7414_v40, %v7381_v26  ;;  %v4766_v31 = vpop.eup %4765  ;;  %v7635_v18 = vmul.f32 %v1912_v52, %v7519_v49  ;;  %v1919_v44 = vadd.f32 1.0, %v4764_v19  ;;  %4781 = vtanh.f32 %v7613_v36  ;;  %v8893_v26 = vld [vmem:[#allocation16_spill] sm:$0xff] }
 0x20f   : > { %3486 = vmatmul.mubr.bf16.gmra.mrb[208].mxu1 %v2329_v22  ;;  %v2338_v62 = vpack.c.bf16 %v7427_v56, %v7387_v33  ;;  %v4768_v21 = vpop.eup %4767  ;;  %v7641_v63 = vmul.f32 %v1914_v30, %v7527_v50  ;;  %v1921_v16 = vadd.f32 1.0, %v4766_v31  ;;  %4783 = vtanh.f32 %v7615_v42  ;;  %v8894_v33 = vld [vmem:[#allocation17_spill] sm:$0xff]  ;;  %v7652_v50 = vpop.f32.mrb[132].mxu0  ;;  %v8896_v52 = vld [vmem:[#allocation20_spill] sm:$0xff] }
 0x210   : > { %3332 = vmatprep.mubr.bf16.mxu0 %v2336_v11  ;;  %v1016_v40 = vadd.f32 %v8893_v26, %v8733_v41  ;;  %v4770_v49 = vpop.eup %4769  ;;  %v7647_v28 = vmul.f32 %v1919_v44, %v7529_v8  ;;  %v1920_v4 = vadd.f32 1.0, %v4768_v21  ;;  %4785 = vtanh.f32 %v7618_v24  ;;  %8895 = vst [vmem:[#allocation8_spill] sm:$0xff] %v7652_v50  ;;  %v7661_v8 = vpop.f32.mrb[133].mxu0  ;;  %v8898_v11 = vld [vmem:[#allocation31_spill] sm:$0xff] }
 0x211   : > { %3493 = vmatprep.mubr.bf16.mxu1 %v2338_v62  ;;  %v1209_v56 = vadd.f32 %v8894_v33, %v8735_v14  ;;  %v7655_v45 = vmul.f32 %v1921_v16, %v7531_v13  ;;  %v1922_v39 = vadd.f32 1.0, %v4770_v49  ;;  %v1018_v22 = vadd.f32 %v8896_v52, %v8737_v46  ;;  %8897 = vst [vmem:[#allocation51_spill] sm:$0xff] %v7661_v8  ;;  %v8899_v44 = vld [vmem:[#allocation19_spill] sm:$0xff]  ;;  %v7672_v62 = vpop.f32.mrb[132].mxu1  ;;  %v7674_v21 = vpop.f32.mrb[134].mxu0 }
 0x212   : > { %v7657_v48 = vmul.f32 0.5, %v1016_v40  ;;  %v7664_v19 = vmul.f32 %v1920_v4, %v7538_v2  ;;  %v1211_v31 = vadd.f32 %v8898_v11, %v8739_v59  ;;  %v1020_v13 = vadd.f32 %v8899_v44, %v8733_v41  ;;  %8900 = vst [vmem:[#allocation9_spill] sm:$0xff] %v7672_v62  ;;  %8901 = vst [vmem:[#allocation30_spill] sm:$0xff] %v7674_v21  ;;  %v8902_v40 = vld [vmem:[#allocation41_spill] sm:$0xff]  ;;  %v7684_v4 = vpop.f32.mrb[133].mxu1  ;;  %v7686_v33 = vpop.f32.mrb[135].mxu0 }
 0x213   : > { %v7666_v30 = vmul.f32 0.5, %v1209_v56  ;;  %v4772_v16 = vpop.eup %4771  ;;  %v7677_v26 = vmul.f32 %v1922_v39, %v7554_v0  ;;  %v7680_v2 = vmul.f32 0.5, %v1018_v22  ;;  %v1213_v49 = vadd.f32 %v8902_v40, %v8735_v14  ;;  %8903 = vst [vmem:[#allocation38_spill] sm:$0xff] %v7684_v4  ;;  %8904 = vst [vmem:[#allocation39_spill] sm:$0xff] %v7686_v33  ;;  %v7693_v0 = vpop.f32.mrb[134].mxu1  ;;  %v8906_v40 = vld [vmem:[#allocation42_spill] sm:$0xff] }
 0x214   : > { %4787 = vtanh.f32 %v7657_v48  ;;  %v4774_v56 = vpop.eup %4773  ;;  %v1927_v52 = vadd.f32 1.0, %v4772_v16  ;;  %v7689_v11 = vmul.f32 0.5, %v1211_v31  ;;  %v7691_v44 = vmul.f32 0.5, %v1020_v13  ;;  %8905 = vst [vmem:[#allocation40_spill] sm:$0xff] %v7693_v0  ;;  %v7700_v33 = vpop.f32.mrb[135].mxu1  ;;  %v8908_v13 = vld [vmem:[#allocation43_spill] sm:$0xff] }
 0x215   : > { %4789 = vtanh.f32 %v7666_v30  ;;  %v4776_v39 = vpop.eup %4775  ;;  %v1929_v22 = vadd.f32 1.0, %v4774_v56  ;;  %v7696_v21 = vmul.f32 0.5, %v1213_v49  ;;  %v1022_v4 = vadd.f32 %v8906_v40, %v8737_v46  ;;  %8907 = vst [vmem:[#allocation12_spill] sm:$0xff] %v7700_v33 }
 0x216   : > { %4791 = vtanh.f32 %v7680_v2  ;;  %v4778_v16 = vpop.eup %4777  ;;  %v7703_v62 = vmul.f32 %v1927_v52, %v7591_v58  ;;  %v1928_v31 = vadd.f32 1.0, %v4776_v39  ;;  %v1215_v0 = vadd.f32 %v8908_v13, %v8739_v59 }
 0x217   : > { %4793 = vtanh.f32 %v7689_v11  ;;  %v4780_v56 = vpop.eup %4779  ;;  %v7709_v8 = vmul.f32 %v1929_v22, %v7597_v34  ;;  %v1930_v49 = vadd.f32 1.0, %v4778_v16  ;;  %v7712_v40 = vmul.f32 0.5, %v1022_v4 }
 0x218   : > { %4795 = vtanh.f32 %v7691_v44  ;;  %v4782_v33 = vpop.eup %4781  ;;  %v7715_v50 = vmul.f32 %v1928_v31, %v7599_v37  ;;  %v1935_v58 = vadd.f32 1.0, %v4780_v56  ;;  %v7718_v52 = vmul.f32 0.5, %v1215_v0 }
 0x219   : > { %4797 = vtanh.f32 %v7696_v21  ;;  %v4784_v39 = vpop.eup %4783  ;;  %v7721_v13 = vmul.f32 %v1930_v49, %v7606_v35  ;;  %v1937_v34 = vadd.f32 1.0, %v4782_v33  ;;  %v2335_v4 = vpack.c.bf16 %v7393_v54, %v7358_v32 }
 0x21a   : > { %4799 = vtanh.f32 %v7712_v40  ;;  %v4786_v22 = vpop.eup %4785  ;;  %v7727_v16 = vmul.f32 %v1935_v58, %v7608_v17  ;;  %v1936_v37 = vadd.f32 1.0, %v4784_v39  ;;  %v2337_v0 = vpack.c.bf16 %v7403_v60, %v7370_v12  ;;  %v8909_v17 = vld [vmem:[#allocation34_spill] sm:$0xff] }
 0x21b   : > { %4801 = vtanh.f32 %v7718_v52  ;;  %v7733_v31 = vmul.f32 %v1937_v34, %v7613_v36  ;;  %v1938_v35 = vadd.f32 1.0, %v4786_v22  ;;  %3333 = vmatmul.mubr.bf16.gmra.mrb[212].mxu0 %v2335_v4  ;;  %v2344_v33 = vpack.c.bf16 %v7487_v25, %v7463_v61  ;;  %v8910_v12 = vld [vmem:[#allocation50_spill] sm:$0xff]  ;;  %v8911_v36 = vld [vmem:[#allocation13_spill] sm:$0xff]  ;;  %v7757_v34 = vpop.f32.mrb[136].mxu1 }
 0x21c   : > { %v2346_v32 = vpack.c.bf16 %v7495_v15, %v7469_v55  ;;  %v7740_v54 = vmul.f32 %v1936_v37, %v7615_v42  ;;  %3494 = vmatmul.mubr.bf16.gmra.mrb[212].mxu1 %v2337_v0  ;;  %v1026_v56 = vadd.f32 %v8909_v17, %v8733_v41  ;;  %v1219_v60 = vadd.f32 %v8910_v12, %v8735_v14  ;;  %v8912_v61 = vld [vmem:[#allocation18_spill] sm:$0xff]  ;;  %v8913_v25 = vld [vmem:[#allocation21_spill] sm:$0xff]  ;;  %v7755_v42 = vpop.f32.mrb[136].mxu0 }
 0x21d   : > { %v1028_v49 = vadd.f32 %v8911_v36, %v8737_v46  ;;  %v7749_v39 = vmul.f32 %v1938_v35, %v7618_v24  ;;  %3340 = vmatprep.mubr.bf16.mxu0 %v2344_v33  ;;  %v1221_v55 = vadd.f32 %v8912_v61, %v8739_v59  ;;  %v1030_v15 = vadd.f32 %v8913_v25, %v8733_v41  ;;  %v7765_v35 = vpop.f32.mrb[137].mxu0  ;;  %v7767_v33 = vpop.f32.mrb[137].mxu1  ;;  %v8918_v61 = vld [vmem:[#allocation44_spill] sm:$0xff] }
 0x21e   : > { %v4788_v58 = vpop.eup %4787  ;;  %3501 = vmatprep.mubr.bf16.mxu1 %v2346_v32  ;;  %8914 = vst [vmem:[#allocation52_spill] sm:$0xff] %v7755_v42  ;;  %8915 = vst [vmem:[#allocation53_spill] sm:$0xff] %v7757_v34  ;;  %v7759_v37 = vmul.f32 0.5, %v1026_v56  ;;  %v7761_v0 = vmul.f32 0.5, %v1219_v60  ;;  %v1223_v25 = vadd.f32 %v8918_v61, %v8735_v14  ;;  %v7777_v56 = vpop.f32.mrb[138].mxu1 }
 0x21f   : > { %v4790_v4 = vpop.eup %4789  ;;  %v1943_v22 = vadd.f32 1.0, %v4788_v58  ;;  %v7763_v24 = vmul.f32 0.5, %v1028_v49  ;;  %8916 = vst [vmem:[#allocation54_spill] sm:$0xff] %v7765_v35  ;;  %8917 = vst [vmem:[#allocation55_spill] sm:$0xff] %v7767_v33  ;;  %v7769_v12 = vmul.f32 0.5, %v1221_v55  ;;  %v7771_v36 = vmul.f32 0.5, %v1030_v15 }
 0x220   : > { %v4792_v32 = vpop.eup %4791  ;;  %v1945_v17 = vadd.f32 1.0, %v4790_v4  ;;  %v7775_v58 = vpop.f32.mrb[138].mxu0  ;;  %8920 = vst [vmem:[#allocation17_spill] sm:$0xff] %v7777_v56  ;;  %4803 = vtanh.f32 %v7759_v37  ;;  %v8921_v4 = vld [vmem:[#allocation24_spill] sm:$0xff]  ;;  %v7793_v56 = vmul.f32 0.5, %v1223_v25 }
 0x221   : > { %8919 = vst [vmem:[#allocation16_spill] sm:$0xff] %v7775_v58  ;;  %v4794_v60 = vpop.eup %4793  ;;  %v7780_v49 = vmul.f32 %v1943_v22, %v7657_v48  ;;  %v1944_v34 = vadd.f32 1.0, %v4792_v32  ;;  %v1032_v55 = vadd.f32 %v8921_v4, %v8737_v46  ;;  %v7785_v33 = vpop.f32.mrb[139].mxu0  ;;  %4805 = vtanh.f32 %v7761_v0 }
 0x222   : > { %8922 = vst [vmem:[#allocation20_spill] sm:$0xff] %v7785_v33  ;;  %v7787_v15 = vpop.f32.mrb[139].mxu1  ;;  %v4796_v35 = vpop.eup %4795  ;;  %v7790_v61 = vmul.f32 %v1945_v17, %v7666_v30  ;;  %v1946_v58 = vadd.f32 1.0, %v4794_v60  ;;  %4807 = vtanh.f32 %v7763_v24  ;;  %v8924_v17 = vld [vmem:[#allocation25_spill] sm:$0xff] }
 0x223   : > { %8923 = vst [vmem:[#allocation31_spill] sm:$0xff] %v7787_v15  ;;  %v4798_v48 = vpop.eup %4797  ;;  %v7796_v22 = vmul.f32 %v1944_v34, %v7680_v2  ;;  %v1951_v32 = vadd.f32 1.0, %v4796_v35  ;;  %v7799_v4 = vmul.f32 0.5, %v1032_v55  ;;  %4809 = vtanh.f32 %v7769_v12 }
 0x224   : > { %v4800_v33 = vpop.eup %4799  ;;  %v7802_v15 = vmul.f32 %v1946_v58, %v7689_v11  ;;  %v1953_v30 = vadd.f32 1.0, %v4798_v48  ;;  %v1225_v25 = vadd.f32 %v8924_v17, %v8739_v59  ;;  %4811 = vtanh.f32 %v7771_v36  ;;  %v8926_v48 = vld [vmem:[#allocation33_spill] sm:$0xff] }
 0x225   : > { %v4802_v60 = vpop.eup %4801  ;;  %v7808_v42 = vmul.f32 %v1951_v32, %v7691_v44  ;;  %v1952_v2 = vadd.f32 1.0, %v4800_v33  ;;  %v2343_v34 = vpack.c.bf16 %v7475_v23, %v7444_v3  ;;  %4813 = vtanh.f32 %v7793_v56 }
 0x226   : > { %v7814_v35 = vmul.f32 %v1953_v30, %v7696_v21  ;;  %v1954_v11 = vadd.f32 1.0, %v4802_v60  ;;  %v7817_v58 = vmul.f32 0.5, %v1225_v25  ;;  %4815 = vtanh.f32 %v7799_v4  ;;  %v7843_v30 = vpop.f32.mrb[140].mxu1  ;;  %v8931_v25 = vld [vmem:[#allocation58_spill] sm:$0xff] }
 0x227   : > { %v7820_v55 = vmul.f32 %v1952_v2, %v7712_v40  ;;  %3341 = vmatmul.mubr.bf16.gmra.mrb[216].mxu0 %v2343_v34  ;;  %v2345_v44 = vpack.c.bf16 %v7481_v57, %v7452_v51  ;;  %v2352_v3 = vpack.c.bf16 %v7581_v10, %v7557_v47  ;;  %v2354_v21 = vpack.c.bf16 %v7589_v7, %v7563_v20  ;;  %v8925_v40 = vld [vmem:[#allocation32_spill] sm:$0xff]  ;;  %v8928_v47 = vld [vmem:[#allocation57_spill] sm:$0xff]  ;;  %v8930_v7 = vld [vmem:[#allocation22_spill] sm:$0xff] }
 0x228   : > { %v7828_v23 = vmul.f32 %v1954_v11, %v7718_v52  ;;  %4817 = vtanh.f32 %v7817_v58  ;;  %v1036_v33 = vadd.f32 %v8925_v40, %v8733_v41  ;;  %v1229_v32 = vadd.f32 %v8926_v48, %v8735_v14  ;;  %v8927_v51 = vld [vmem:[#allocation56_spill] sm:$0xff]  ;;  %v7841_v52 = vpop.f32.mrb[140].mxu0  ;;  %8929 = vst [vmem:[#allocation19_spill] sm:$0xff] %v7843_v30  ;;  %v8932_v2 = vld [vmem:[#allocation35_spill] sm:$0xff] }
 0x229   : > { %3502 = vmatmul.mubr.bf16.gmra.mrb[216].mxu1 %v2345_v44  ;;  %3348 = vmatprep.mubr.bf16.mxu0 %v2352_v3  ;;  %v1038_v57 = vadd.f32 %v8927_v51, %v8737_v46  ;;  %v1231_v10 = vadd.f32 %v8928_v47, %v8739_v59  ;;  %v1040_v17 = vadd.f32 %v8930_v7, %v8733_v41  ;;  %v7853_v11 = vpop.f32.mrb[141].mxu0  ;;  %v7855_v44 = vpop.f32.mrb[141].mxu1 }
 0x22a   : > { %3509 = vmatprep.mubr.bf16.mxu1 %v2354_v21  ;;  %v7845_v20 = vmul.f32 0.5, %v1036_v33  ;;  %v1233_v60 = vadd.f32 %v8931_v25, %v8735_v14  ;;  %v1042_v34 = vadd.f32 %v8932_v2, %v8737_v46  ;;  %8933 = vst [vmem:[#allocation41_spill] sm:$0xff] %v7853_v11  ;;  %8934 = vst [vmem:[#allocation42_spill] sm:$0xff] %v7855_v44  ;;  %v4804_v3 = vpop.eup %4803  ;;  %v7857_v40 = vmul.f32 0.5, %v1229_v32  ;;  %v8935_v33 = vld [vmem:[#allocation59_spill] sm:$0xff]  ;;  %v7865_v47 = vpop.f32.mrb[142].mxu0 }
 0x22b   : > { %v7859_v48 = vmul.f32 0.5, %v1038_v57  ;;  %v7861_v21 = vmul.f32 0.5, %v1231_v10  ;;  %v1235_v51 = vadd.f32 %v8935_v33, %v8739_v59  ;;  %8936 = vst [vmem:[#allocation43_spill] sm:$0xff] %v7865_v47  ;;  %v7867_v7 = vpop.f32.mrb[142].mxu1  ;;  %v4806_v25 = vpop.eup %4805  ;;  %v1959_v2 = vadd.f32 1.0, %v4804_v3 }
 0x22c   : > { %8937 = vst [vmem:[#allocation34_spill] sm:$0xff] %v7867_v7  ;;  %4819 = vtanh.f32 %v7845_v20  ;;  %v7870_v30 = vmul.f32 0.5, %v1040_v17  ;;  %v7872_v44 = vmul.f32 0.5, %v1233_v60  ;;  %v7874_v32 = vpop.f32.mrb[143].mxu0  ;;  %v7876_v57 = vpop.f32.mrb[143].mxu1  ;;  %v1961_v11 = vadd.f32 1.0, %v4806_v25 }
 0x22d   : > { %8938 = vst [vmem:[#allocation50_spill] sm:$0xff] %v7874_v32  ;;  %8939 = vst [vmem:[#allocation13_spill] sm:$0xff] %v7876_v57  ;;  %v4808_v10 = vpop.eup %4807  ;;  %4821 = vtanh.f32 %v7857_v40  ;;  %v7879_v33 = vmul.f32 0.5, %v1042_v34  ;;  %v7881_v47 = vmul.f32 0.5, %v1235_v51  ;;  %v7884_v3 = vmul.f32 %v1959_v2, %v7759_v37 }
 0x22e   : > { %v4810_v7 = vpop.eup %4809  ;;  %v1960_v17 = vadd.f32 1.0, %v4808_v10  ;;  %4823 = vtanh.f32 %v7859_v48  ;;  %v2351_v60 = vpack.c.bf16 %v7569_v6, %v7545_v5  ;;  %v7890_v57 = vmul.f32 %v1961_v11, %v7761_v0 }
 0x22f   : > { %v4812_v32 = vpop.eup %4811  ;;  %v1962_v25 = vadd.f32 1.0, %v4810_v7  ;;  %4825 = vtanh.f32 %v7861_v21  ;;  %v2353_v34 = vpack.c.bf16 %v7575_v43, %v7551_v1  ;;  %v2360_v5 = vpack.c.bf16 %v7664_v19, %v7635_v18  ;;  %v7907_v43 = vpop.f32.mrb[144].mxu0 }
 0x230   : > { %v4814_v51 = vpop.eup %4813  ;;  %v7896_v37 = vmul.f32 %v1960_v17, %v7763_v24  ;;  %v1967_v2 = vadd.f32 1.0, %v4812_v32  ;;  %4827 = vtanh.f32 %v7870_v30  ;;  %3349 = vmatmul.mubr.bf16.gmra.mrb[220].mxu0 %v2351_v60  ;;  %v2362_v1 = vpack.c.bf16 %v7677_v26, %v7641_v63  ;;  %8940 = vst [vmem:[#allocation18_spill] sm:$0xff] %v7907_v43  ;;  %v7915_v19 = vpop.f32.mrb[145].mxu0  ;;  %v8942_v63 = vld [vmem:[#allocation26_spill] sm:$0xff] }
 0x231   : > { %v4816_v6 = vpop.eup %4815  ;;  %v7902_v0 = vmul.f32 %v1962_v25, %v7769_v12  ;;  %v1969_v11 = vadd.f32 1.0, %v4814_v51  ;;  %4829 = vtanh.f32 %v7872_v44  ;;  %3510 = vmatmul.mubr.bf16.gmra.mrb[220].mxu1 %v2353_v34  ;;  %3356 = vmatprep.mubr.bf16.mxu0 %v2360_v5  ;;  %v1046_v18 = vadd.f32 %v7264_v27, %v8733_v41  ;;  %8941 = vst [vmem:[#allocation21_spill] sm:$0xff] %v7915_v19  ;;  %v7925_v17 = vpop.f32.mrb[146].mxu0  ;;  %v8945_v25 = vld [vmem:[#allocation23_spill] sm:$0xff]  ;;  %v8946_v34 = vld [vmem:[#allocation45_spill] sm:$0xff] }
 0x232   : > { %v4818_v24 = vpop.eup %4817  ;;  %v7910_v7 = vmul.f32 %v1967_v2, %v7771_v36  ;;  %v1968_v32 = vadd.f32 1.0, %v4816_v6  ;;  %4831 = vtanh.f32 %v7879_v33  ;;  %3517 = vmatprep.mubr.bf16.mxu1 %v2362_v1  ;;  %v1239_v26 = vadd.f32 %v8942_v63, %v8735_v14  ;;  %v7923_v36 = vpop.f32.mrb[144].mxu1  ;;  %8944 = vst [vmem:[#allocation24_spill] sm:$0xff] %v7925_v17 }
 0x233   : > { %v7918_v12 = vmul.f32 %v1969_v11, %v7793_v56  ;;  %v1970_v10 = vadd.f32 1.0, %v4818_v24  ;;  %4833 = vtanh.f32 %v7881_v47  ;;  %8943 = vst [vmem:[#allocation44_spill] sm:$0xff] %v7923_v36  ;;  %v7930_v27 = vmul.f32 0.5, %v1046_v18  ;;  %v7936_v2 = vpop.f32.mrb[145].mxu1  ;;  %v7938_v5 = vpop.f32.mrb[147].mxu0  ;;  %v8950_v24 = vld [vmem:[#allocation48_spill] sm:$0xff] }
 0x234   : > { %v7928_v60 = vmul.f32 %v1968_v32, %v7799_v4  ;;  %v1048_v56 = vadd.f32 %v8945_v25, %v8737_v46  ;;  %v1241_v51 = vadd.f32 %v8946_v34, %v8739_v59  ;;  %8947 = vst [vmem:[#allocation25_spill] sm:$0xff] %v7936_v2  ;;  %8948 = vst [vmem:[#allocation32_spill] sm:$0xff] %v7938_v5  ;;  %v7943_v11 = vmul.f32 0.5, %v1239_v26  ;;  %v8949_v4 = vld [vmem:[#allocation46_spill] sm:$0xff]  ;;  %v7949_v18 = vpop.f32.mrb[146].mxu1 }
 0x235   : > { %v7941_v6 = vmul.f32 %v1970_v10, %v7817_v58  ;;  %v1050_v1 = vadd.f32 %v8949_v4, %v8733_v41  ;;  %v1243_v32 = vadd.f32 %v8950_v24, %v8735_v14  ;;  %8951 = vst [vmem:[#allocation33_spill] sm:$0xff] %v7949_v18  ;;  %4835 = vtanh.f32 %v7930_v27  ;;  %v8952_v58 = vld [vmem:[#allocation49_spill] sm:$0xff]  ;;  %v7958_v26 = vpop.f32.mrb[147].mxu1 }
 0x236   : > { %v4820_v63 = vpop.eup %4819  ;;  %v7952_v25 = vmul.f32 0.5, %v1048_v56  ;;  %v7954_v34 = vmul.f32 0.5, %v1241_v51  ;;  %v1052_v10 = vadd.f32 %v8952_v58, %v8737_v46  ;;  %8953 = vst [vmem:[#allocation56_spill] sm:$0xff] %v7958_v26  ;;  %4837 = vtanh.f32 %v7943_v11  ;;  %v8954_v51 = vld [vmem:[#allocation60_spill] sm:$0xff] }
 0x237   : > { %v4822_v5 = vpop.eup %4821  ;;  %v1975_v17 = vadd.f32 1.0, %v4820_v63  ;;  %v7961_v4 = vmul.f32 0.5, %v1050_v1  ;;  %v7963_v24 = vmul.f32 0.5, %v1243_v32  ;;  %v1245_v36 = vadd.f32 %v8954_v51, %v8739_v59 }
 0x238   : > { %v4824_v18 = vpop.eup %4823  ;;  %v1977_v2 = vadd.f32 1.0, %v4822_v5  ;;  %4839 = vtanh.f32 %v7952_v25  ;;  %v7966_v56 = vmul.f32 0.5, %v1052_v10  ;;  %v2359_v1 = vpack.c.bf16 %v7647_v28, %v7623_v29 }
 0x239   : > { %v4826_v58 = vpop.eup %4825  ;;  %v7971_v26 = vmul.f32 %v1975_v17, %v7845_v20  ;;  %v1976_v63 = vadd.f32 1.0, %v4824_v18  ;;  %4841 = vtanh.f32 %v7954_v34  ;;  %v7980_v10 = vmul.f32 0.5, %v1245_v36 }
 0x23a   : > { %v4828_v32 = vpop.eup %4827  ;;  %v7977_v5 = vmul.f32 %v1977_v2, %v7857_v40  ;;  %v1978_v19 = vadd.f32 1.0, %v4826_v58  ;;  %4843 = vtanh.f32 %v7961_v4  ;;  %3357 = vmatmul.mubr.bf16.gmra.mrb[224].mxu0 %v2359_v1  ;;  %v2361_v29 = vpack.c.bf16 %v7655_v45, %v7629_v9  ;;  %v7994_v2 = vpop.f32.mrb[148].mxu0 }
 0x23b   : > { %v4830_v51 = vpop.eup %4829  ;;  %v7983_v43 = vmul.f32 %v1976_v63, %v7859_v48  ;;  %v1983_v20 = vadd.f32 1.0, %v4828_v32  ;;  %4845 = vtanh.f32 %v7963_v24  ;;  %v2368_v36 = vpack.c.bf16 %v7740_v54, %v7715_v50  ;;  %8955 = vst [vmem:[#allocation57_spill] sm:$0xff] %v7994_v2  ;;  %v8002_v45 = vpop.f32.mrb[149].mxu0  ;;  %v8957_v50 = vld [vmem:[#allocation2_spill] sm:$0xff] }
 0x23c   : > { %v4832_v28 = vpop.eup %4831  ;;  %v7989_v40 = vmul.f32 %v1978_v19, %v7861_v21  ;;  %v1985_v17 = vadd.f32 1.0, %v4830_v51  ;;  %4847 = vtanh.f32 %v7966_v56  ;;  %3518 = vmatmul.mubr.bf16.gmra.mrb[224].mxu1 %v2361_v29  ;;  %v2370_v9 = vpack.c.bf16 %v7749_v39, %v7721_v13  ;;  %8956 = vst [vmem:[#allocation22_spill] sm:$0xff] %v8002_v45  ;;  %v8011_v1 = vpop.f32.mrb[148].mxu1  ;;  %v8961_v13 = vld [vmem:[#allocation4_spill] sm:$0xff]  ;;  %v8963_v29 = vld [vmem:[#allocation61_spill] sm:$0xff] }
 0x23d   : > { %v4834_v48 = vpop.eup %4833  ;;  %v7997_v18 = vmul.f32 %v1983_v20, %v7870_v30  ;;  %v1984_v58 = vadd.f32 1.0, %v4832_v28  ;;  %4849 = vtanh.f32 %v7980_v10  ;;  %3364 = vmatprep.mubr.bf16.mxu0 %v2368_v36  ;;  %v1056_v54 = vadd.f32 %v8957_v50, %v8733_v41  ;;  %v8958_v30 = vld [vmem:[#allocation7_spill] sm:$0xff]  ;;  %8959 = vst [vmem:[#allocation58_spill] sm:$0xff] %v8011_v1  ;;  %v8013_v32 = vpop.f32.mrb[150].mxu0 }
 0x23e   : > { %v8005_v21 = vmul.f32 %v1985_v17, %v7872_v44  ;;  %v1986_v19 = vadd.f32 1.0, %v4834_v48  ;;  %v1249_v63 = vadd.f32 %v8958_v30, %v8735_v14  ;;  %8960 = vst [vmem:[#allocation35_spill] sm:$0xff] %v8013_v32  ;;  %3525 = vmatprep.mubr.bf16.mxu1 %v2370_v9  ;;  %v1058_v39 = vadd.f32 %v8961_v13, %v8737_v46  ;;  %v8962_v44 = vld [vmem:[#allocation27_spill] sm:$0xff]  ;;  %v8024_v17 = vpop.f32.mrb[149].mxu1  ;;  %v8026_v36 = vpop.f32.mrb[151].mxu0  ;;  %v8966_v9 = vld [vmem:[#allocation62_spill] sm:$0xff] }
 0x23f   : > { %v8016_v51 = vmul.f32 %v1984_v58, %v7879_v33  ;;  %v1251_v20 = vadd.f32 %v8962_v44, %v8739_v59  ;;  %v1060_v28 = vadd.f32 %v8963_v29, %v8733_v41  ;;  %8964 = vst [vmem:[#allocation59_spill] sm:$0xff] %v8024_v17  ;;  %8965 = vst [vmem:[#allocation26_spill] sm:$0xff] %v8026_v36  ;;  %v4836_v48 = vpop.eup %4835  ;;  %v8031_v33 = vmul.f32 0.5, %v1056_v54  ;;  %v8037_v13 = vpop.f32.mrb[150].mxu1 }
 0x240   : > { %v8029_v50 = vmul.f32 %v1986_v19, %v7881_v47  ;;  %v8033_v58 = vmul.f32 0.5, %v1249_v63  ;;  %v1253_v30 = vadd.f32 %v8966_v9, %v8735_v14  ;;  %8967 = vst [vmem:[#allocation23_spill] sm:$0xff] %v8037_v13  ;;  %v4838_v44 = vpop.eup %4837  ;;  %v1991_v32 = vadd.f32 1.0, %v4836_v48  ;;  %v8045_v1 = vpop.f32.mrb[151].mxu1  ;;  %v8969_v63 = vld [vmem:[#allocation3_spill] sm:$0xff] }
 0x241   : > { %v8039_v29 = vmul.f32 0.5, %v1058_v39  ;;  %v8041_v17 = vmul.f32 0.5, %v1251_v20  ;;  %v8043_v36 = vmul.f32 0.5, %v1060_v28  ;;  %8968 = vst [vmem:[#allocation45_spill] sm:$0xff] %v8045_v1  ;;  %v1993_v19 = vadd.f32 1.0, %v4838_v44  ;;  %v8970_v20 = vld [vmem:[#allocation10_spill] sm:$0xff] }
 0x242   : > { %v4840_v47 = vpop.eup %4839  ;;  %4851 = vtanh.f32 %v8031_v33  ;;  %v8048_v54 = vmul.f32 0.5, %v1253_v30  ;;  %v1062_v9 = vadd.f32 %v8969_v63, %v8737_v46  ;;  %v8053_v48 = vmul.f32 %v1991_v32, %v7930_v27 }
 0x243   : > { %v4842_v13 = vpop.eup %4841  ;;  %v1992_v39 = vadd.f32 1.0, %v4840_v47  ;;  %4853 = vtanh.f32 %v8033_v58  ;;  %v1255_v28 = vadd.f32 %v8970_v20, %v8739_v59  ;;  %v8059_v44 = vmul.f32 %v1993_v19, %v7943_v11 }
 0x244   : > { %v4844_v1 = vpop.eup %4843  ;;  %v1994_v45 = vadd.f32 1.0, %v4842_v13  ;;  %4855 = vtanh.f32 %v8039_v29  ;;  %v8062_v30 = vmul.f32 0.5, %v1062_v9  ;;  %v2367_v13 = vpack.c.bf16 %v7727_v16, %v7703_v62 }
 0x245   : > { %v4846_v63 = vpop.eup %4845  ;;  %v8065_v2 = vmul.f32 %v1992_v39, %v7952_v25  ;;  %v1999_v27 = vadd.f32 1.0, %v4844_v1  ;;  %4857 = vtanh.f32 %v8041_v17  ;;  %v8068_v32 = vmul.f32 0.5, %v1255_v28  ;;  %v8082_v39 = vpop.f32.mrb[152].mxu0 }
 0x246   : > { %v4848_v47 = vpop.eup %4847  ;;  %v8071_v20 = vmul.f32 %v1994_v45, %v7954_v34  ;;  %v2001_v11 = vadd.f32 1.0, %v4846_v63  ;;  %4859 = vtanh.f32 %v8043_v36  ;;  %v2369_v1 = vpack.c.bf16 %v7733_v31, %v7709_v8  ;;  %3365 = vmatmul.mubr.bf16.gmra.mrb[228].mxu0 %v2367_v13  ;;  %v8090_v16 = vpop.f32.mrb[153].mxu0  ;;  %v8975_v13 = vld [vmem:[#allocation65_spill] sm:$0xff] }
 0x247   : > { %v4850_v19 = vpop.eup %4849  ;;  %v8077_v9 = vmul.f32 %v1999_v27, %v7961_v4  ;;  %v2000_v25 = vadd.f32 1.0, %v4848_v47  ;;  %4861 = vtanh.f32 %v8048_v54  ;;  %v2376_v62 = vpack.c.bf16 %v7820_v55, %v7796_v22  ;;  %v8102_v28 = vpop.f32.mrb[154].mxu0  ;;  %v8972_v27 = vld [vmem:[#allocation64_spill] sm:$0xff] }
 0x248   : > { %v8085_v34 = vmul.f32 %v2001_v11, %v7963_v24  ;;  %v2002_v45 = vadd.f32 1.0, %v4850_v19  ;;  %4863 = vtanh.f32 %v8062_v30  ;;  %3526 = vmatmul.mubr.bf16.gmra.mrb[228].mxu1 %v2369_v1  ;;  %v2378_v8 = vpack.c.bf16 %v7828_v23, %v7802_v15  ;;  %v8100_v24 = vpop.f32.mrb[152].mxu1 }
 0x249   : > { %v8093_v4 = vmul.f32 %v2000_v25, %v7966_v56  ;;  %4865 = vtanh.f32 %v8068_v32  ;;  %v1066_v31 = vadd.f32 %v7398_v53, %v8733_v41  ;;  %3372 = vmatprep.mubr.bf16.mxu0 %v2376_v62  ;;  %v1259_v55 = vadd.f32 %v7400_v38, %v8735_v14  ;;  %v8971_v56 = vld [vmem:[#allocation63_spill] sm:$0xff]  ;;  %v8113_v23 = vpop.f32.mrb[153].mxu1  ;;  %v8115_v53 = vpop.f32.mrb[155].mxu0  ;;  %v8976_v38 = vld [vmem:[#allocation36_spill] sm:$0xff] }
 0x24a   : > { %v8105_v22 = vmul.f32 %v2002_v45, %v7980_v10  ;;  %v1068_v63 = vadd.f32 %v8971_v56, %v8737_v46  ;;  %v1261_v15 = vadd.f32 %v8972_v27, %v8739_v59  ;;  %8973 = vst [vmem:[#allocation46_spill] sm:$0xff] %v8115_v53  ;;  %3533 = vmatprep.mubr.bf16.mxu1 %v2378_v8  ;;  %v8974_v10 = vld [vmem:[#allocation5_spill] sm:$0xff]  ;;  %v8125_v1 = vpop.f32.mrb[154].mxu1  ;;  %v8977_v8 = vld [vmem:[#allocation66_spill] sm:$0xff] }
 0x24b   : > { %v8117_v47 = vmul.f32 0.5, %v1066_v31  ;;  %v1070_v11 = vadd.f32 %v8974_v10, %v8733_v41  ;;  %v1263_v19 = vadd.f32 %v8975_v13, %v8735_v14  ;;  %v1072_v25 = vadd.f32 %v8976_v38, %v8737_v46  ;;  %v8135_v53 = vpop.f32.mrb[155].mxu1 }
 0x24c   : > { %v4852_v45 = vpop.eup %4851  ;;  %v8127_v62 = vmul.f32 0.5, %v1259_v55  ;;  %v8129_v56 = vmul.f32 0.5, %v1068_v63  ;;  %v8131_v27 = vmul.f32 0.5, %v1261_v15  ;;  %v1265_v31 = vadd.f32 %v8977_v8, %v8739_v59 }
 0x24d   : > { %v4854_v41 = vpop.eup %4853  ;;  %v2007_v10 = vadd.f32 1.0, %v4852_v45  ;;  %4867 = vtanh.f32 %v8117_v47  ;;  %v8138_v14 = vmul.f32 0.5, %v1070_v11  ;;  %v8140_v46 = vmul.f32 0.5, %v1263_v19 }
 0x24e   : > { %v4856_v13 = vpop.eup %4855  ;;  %v2009_v55 = vadd.f32 1.0, %v4854_v41  ;;  %4869 = vtanh.f32 %v8127_v62  ;;  %v8143_v63 = vmul.f32 0.5, %v1072_v25  ;;  %v8145_v15 = vmul.f32 0.5, %v1265_v31 }
 0x24f   : > { %v4858_v38 = vpop.eup %4857  ;;  %v8148_v59 = vmul.f32 %v2007_v10, %v8031_v33  ;;  %v2008_v8 = vadd.f32 1.0, %v4856_v13  ;;  %4871 = vtanh.f32 %v8129_v56  ;;  %v2375_v11 = vpack.c.bf16 %v7808_v42, %v7780_v49 }
 0x250   : > { %v4860_v19 = vpop.eup %4859  ;;  %v8154_v45 = vmul.f32 %v2009_v55, %v8033_v58  ;;  %v2010_v41 = vadd.f32 1.0, %v4858_v38  ;;  %4873 = vtanh.f32 %v8131_v27  ;;  %v2377_v25 = vpack.c.bf16 %v7814_v35, %v7790_v61  ;;  %v8174_v35 = vld [vmem:[%s8574_s4] ss:$0 sm:$0xff]  ;;  %v8980_v38 = vld [vmem:[#allocation15_spill] sm:$0xff] }
 0x251   : > { %v4862_v31 = vpop.eup %4861  ;;  %v8160_v33 = vmul.f32 %v2008_v8, %v8039_v29  ;;  %v2015_v10 = vadd.f32 1.0, %v4860_v19  ;;  %4875 = vtanh.f32 %v8138_v14  ;;  %3373 = vmatmul.mubr.bf16.gmra.mrb[232].mxu0 %v2375_v11  ;;  %v2384_v42 = vpack.c.bf16 %v7928_v60, %v7896_v37  ;;  %v8176_v29 = vpop.f32.mrb[156].mxu0  ;;  %v8982_v19 = vld [vmem:[#allocation14_spill] sm:$0xff] }
 0x252   : > { %v4864_v49 = vpop.eup %4863  ;;  %v8166_v58 = vmul.f32 %v2010_v41, %v8041_v17  ;;  %v2017_v13 = vadd.f32 1.0, %v4862_v31  ;;  %4877 = vtanh.f32 %v8140_v46  ;;  %3534 = vmatmul.mubr.bf16.gmra.mrb[232].mxu1 %v2377_v25  ;;  %v2386_v61 = vpack.c.bf16 %v7941_v6, %v7902_v0  ;;  %8978 = vst [vmem:[#allocation48_spill] sm:$0xff] %v8176_v29  ;;  %v8979_v17 = vld [vmem:[#allocation11_spill] sm:$0xff]  ;;  %v8184_v11 = vpop.f32.mrb[157].mxu0 }
 0x253   : > { %v4866_v55 = vpop.eup %4865  ;;  %v8179_v37 = vmul.f32 %v2015_v10, %v8043_v36  ;;  %v2016_v60 = vadd.f32 1.0, %v4864_v49  ;;  %4879 = vtanh.f32 %v8143_v63  ;;  %3380 = vmatprep.mubr.bf16.mxu0 %v2384_v42  ;;  %v3849_v8 = vadd.f32 %v8980_v38, %v8979_v17  ;;  %8981 = vst [vmem:[#allocation49_spill] sm:$0xff] %v8184_v11  ;;  %v8983_v41 = vld [vmem:[#allocation47_spill] sm:$0xff]  ;;  %v8192_v25 = vpop.f32.mrb[156].mxu1  ;;  %v8986_v49 = vld [vmem:[#allocation37_spill] sm:$0xff]  ;;  %v8987_v17 = vld [vmem:[#allocation6_spill] sm:$0xff] }
 0x254   : > { %v8187_v0 = vmul.f32 %v2017_v13, %v8048_v54  ;;  %v2018_v6 = vadd.f32 1.0, %v4866_v55  ;;  %4881 = vtanh.f32 %v8145_v15  ;;  %3541 = vmatprep.mubr.bf16.mxu1 %v2386_v61  ;;  %v3961_v36 = vadd.f32 %v8983_v41, %v8982_v19  ;;  %8984 = vst [vmem:[#allocation60_spill] sm:$0xff] %v8192_v25  ;;  %v8194_v31 = vpop.f32.mrb[158].mxu0  ;;  %v8988_v13 = vld [vmem:[#allocation29_spill] sm:$0xff]  ;;  %v8989_v55 = vld [vmem:[#allocation28_spill] sm:$0xff]  ;;  %v8204_v11 = vpop.f32.mrb[157].mxu1 }
 0x255   : > { %8985 = vst [vmem:[#allocation2_spill] sm:$0xff] %v8194_v31  ;;  %v8197_v10 = vmul.f32 %v2016_v60, %v8062_v30  ;;  %v2973_v42 = vadd.f32 %v3849_v8, %v8174_v35  ;;  %v3852_v54 = vadd.f32 %v8987_v17, %v8986_v49  ;;  %v3964_v38 = vadd.f32 %v8989_v55, %v8988_v13  ;;  %v8206_v61 = vpop.f32.mrb[159].mxu0  ;;  %v8217_v8 = vpop.f32.mrb[158].mxu1  ;;  %v8995_v55 = vld [vmem:[#allocation51_spill] sm:$0xff]  ;;  %v8997_v31 = vld [vmem:[#allocation38_spill] sm:$0xff] }
 0x256   : > { %8990 = vst [vmem:[#allocation7_spill] sm:$0xff] %v8204_v11  ;;  %8991 = vst [vmem:[#allocation4_spill] sm:$0xff] %v8206_v61  ;;  %v8209_v19 = vmul.f32 %v2018_v6, %v8068_v32  ;;  %v2383_v41 = vpack.c.bf16 %v7910_v7, %v7884_v3  ;;  %v2385_v30 = vpack.c.bf16 %v7918_v12, %v7890_v57  ;;  %v8994_v6 = vld [vmem:[#allocation8_spill] sm:$0xff]  ;;  %v8226_v3 = vpop.f32.mrb[159].mxu1  ;;  %v8996_v12 = vld [vmem:[#allocation9_spill] sm:$0xff] }
 0x257   : > { %v2392_v60 = vpack.c.bf16 %v8016_v51, %v7983_v43  ;;  %8992 = vst [vmem:[#allocation27_spill] sm:$0xff] %v8217_v8  ;;  %v4868_v49 = vpop.eup %4867  ;;  %v8219_v17 = vadd.f32 %v3961_v36, %v2973_v42  ;;  %v2976_v13 = vadd.f32 %v3852_v54, %v8174_v35  ;;  %v2394_v32 = vpack.c.bf16 %v8029_v50, %v7989_v40  ;;  %v8998_v51 = vld [vmem:[#allocation30_spill] sm:$0xff]  ;;  %v8999_v8 = vld [vmem:[#allocation39_spill] sm:$0xff]  ;;  %v9000_v36 = vld [vmem:[#allocation40_spill] sm:$0xff] }
 0x258   : > { %v3855_v61 = vadd.f32 %v8995_v55, %v8994_v6  ;;  %v4870_v7 = vpop.eup %4869  ;;  %v2023_v57 = vadd.f32 1.0, %v4868_v49  ;;  %v3967_v43 = vadd.f32 %v8997_v31, %v8996_v12  ;;  %v3858_v11 = vadd.f32 %v8999_v8, %v8998_v51  ;;  %v9001_v42 = vld [vmem:[#allocation12_spill] sm:$0xff] }
 0x259   : > { %8993 = vst [vmem:[#allocation61_spill] sm:$0xff] %v8219_v17  ;;  %v3970_v17 = vadd.f32 %v9001_v42, %v9000_v36  ;;  %v4872_v54 = vpop.eup %4871  ;;  %v2025_v25 = vadd.f32 1.0, %v4870_v7  ;;  %v8234_v29 = vadd.f32 %v3964_v38, %v2976_v13  ;;  %3381 = vmatmul.mubr.bf16.gmra.mrb[236].mxu0 %v2383_v41  ;;  %v2391_v50 = vpack.c.bf16 %v7997_v18, %v7971_v26  ;;  %v9006_v51 = vld [vmem:[#allocation16_spill] sm:$0xff]  ;;  %v9008_v36 = vld [vmem:[#allocation17_spill] sm:$0xff] }
 0x25a   : > { %v2981_v40 = vadd.f32 %v3855_v61, %v8174_v35  ;;  %v4874_v49 = vpop.eup %4873  ;;  %v8240_v6 = vmul.f32 %v2023_v57, %v8117_v47  ;;  %v2024_v31 = vadd.f32 1.0, %v4872_v54  ;;  %3542 = vmatmul.mubr.bf16.gmra.mrb[236].mxu1 %v2385_v30  ;;  %3388 = vmatprep.mubr.bf16.mxu0 %v2392_v60  ;;  %v2984_v8 = vadd.f32 %v3858_v11, %v8174_v35  ;;  %v9002_v60 = vld [vmem:[#allocation52_spill] sm:$0xff]  ;;  %v9004_v57 = vld [vmem:[#allocation53_spill] sm:$0xff]  ;;  %v8266_v12 = vpop.f32.mrb[160].mxu0 }
 0x25b   : > { %v2393_v55 = vpack.c.bf16 %v8005_v21, %v7977_v5  ;;  %v4876_v38 = vpop.eup %4875  ;;  %v8246_v41 = vmul.f32 %v2025_v25, %v8127_v62  ;;  %v2026_v61 = vadd.f32 1.0, %v4874_v49  ;;  %3549 = vmatprep.mubr.bf16.mxu1 %v2394_v32  ;;  %v2400_v26 = vpack.c.bf16 %v8093_v4, %v8065_v2  ;;  %v9003_v32 = vld [vmem:[#allocation54_spill] sm:$0xff]  ;;  %v9005_v2 = vld [vmem:[#allocation55_spill] sm:$0xff]  ;;  %v8275_v54 = vpop.f32.mrb[161].mxu0 }
 0x25c   : > { %v8248_v13 = vadd.f32 %v3967_v43, %v2981_v40  ;;  %v4878_v18 = vpop.eup %4877  ;;  %v8253_v47 = vmul.f32 %v2024_v31, %v8129_v56  ;;  %v2031_v30 = vadd.f32 1.0, %v4876_v38  ;;  %v8255_v11 = vadd.f32 %v3970_v17, %v2984_v8  ;;  %v8285_v38 = vpop.f32.mrb[162].mxu0 }
 0x25d   : > { %v2402_v5 = vpack.c.bf16 %v8105_v22, %v8071_v20  ;;  %v4880_v21 = vpop.eup %4879  ;;  %v8260_v62 = vmul.f32 %v2026_v61, %v8131_v27  ;;  %v2033_v25 = vadd.f32 1.0, %v4878_v18  ;;  %v3861_v7 = vadd.f32 %v9003_v32, %v9002_v60  ;;  %v9007_v20 = vld [vmem:[#allocation20_spill] sm:$0xff]  ;;  %v9009_v27 = vld [vmem:[#allocation31_spill] sm:$0xff]  ;;  %v9010_v60 = vld [vmem:[#allocation41_spill] sm:$0xff] }
 0x25e   : > { %v3973_v4 = vadd.f32 %v9005_v2, %v9004_v57  ;;  %v4882_v56 = vpop.eup %4881  ;;  %v8269_v17 = vmul.f32 %v2031_v30, %v8138_v14  ;;  %v2032_v43 = vadd.f32 1.0, %v4880_v21  ;;  %v3864_v22 = vadd.f32 %v9007_v20, %v9006_v51  ;;  %v8283_v14 = vpop.f32.mrb[160].mxu1  ;;  %v9014_v57 = vld [vmem:[#allocation50_spill] sm:$0xff]  ;;  %v9018_v20 = vld [vmem:[#allocation21_spill] sm:$0xff] }
 0x25f   : > { %v3976_v42 = vadd.f32 %v9009_v27, %v9008_v36  ;;  %v8278_v40 = vmul.f32 %v2033_v25, %v8140_v46  ;;  %v2034_v49 = vadd.f32 1.0, %v4882_v56  ;;  %v2989_v31 = vadd.f32 %v3861_v7, %v8174_v35  ;;  %v8295_v21 = vpop.f32.mrb[161].mxu1  ;;  %v8297_v25 = vpop.f32.mrb[163].mxu0  ;;  %v9019_v27 = vld [vmem:[#allocation44_spill] sm:$0xff] }
 0x260   : > { %v2399_v8 = vpack.c.bf16 %v8077_v9, %v8053_v48  ;;  %v8288_v61 = vmul.f32 %v2032_v43, %v8143_v63  ;;  %v2992_v18 = vadd.f32 %v3864_v22, %v8174_v35  ;;  %v2401_v30 = vpack.c.bf16 %v8085_v34, %v8059_v44  ;;  %v8308_v44 = vpop.f32.mrb[162].mxu1 }
 0x261   : > { %v2408_v46 = vpack.c.bf16 %v8197_v10, %v8160_v33  ;;  %v8300_v48 = vmul.f32 %v2034_v49, %v8145_v15  ;;  %3389 = vmatmul.mubr.bf16.gmra.mrb[240].mxu0 %v2391_v50  ;;  %v8302_v9 = vadd.f32 %v3973_v4, %v2989_v31  ;;  %v2410_v63 = vpack.c.bf16 %v8209_v19, %v8166_v58  ;;  %v9011_v33 = vld [vmem:[#allocation19_spill] sm:$0xff]  ;;  %v9012_v10 = vld [vmem:[#allocation42_spill] sm:$0xff]  ;;  %v4011_v2 = vpop.f32.mrb[163].mxu1  ;;  %v9016_v19 = vld [vmem:[#allocation13_spill] sm:$0xff] }
 0x262   : > { %v3867_v32 = vadd.f32 %v9010_v60, %v7841_v52  ;;  %3550 = vmatmul.mubr.bf16.gmra.mrb[240].mxu1 %v2393_v55  ;;  %3396 = vmatprep.mubr.bf16.mxu0 %v2400_v26  ;;  %v8310_v34 = vadd.f32 %v3976_v42, %v2992_v18  ;;  %v3979_v7 = vadd.f32 %v9012_v10, %v9011_v33  ;;  %v9013_v15 = vld [vmem:[#allocation43_spill] sm:$0xff]  ;;  %v9015_v58 = vld [vmem:[#allocation34_spill] sm:$0xff]  ;;  %v9020_v42 = vld [vmem:[#allocation25_spill] sm:$0xff] }
 0x263   : > { %v3870_v50 = vadd.f32 %v9014_v57, %v9013_v15  ;;  %3557 = vmatprep.mubr.bf16.mxu1 %v2402_v5  ;;  %v3982_v56 = vadd.f32 %v9016_v19, %v9015_v58  ;;  %v2407_v52 = vpack.c.bf16 %v8179_v37, %v8148_v59  ;;  %v2409_v55 = vpack.c.bf16 %v8187_v0, %v8154_v45  ;;  %v9017_v5 = vld [vmem:[#allocation18_spill] sm:$0xff]  ;;  %v9021_v31 = vld [vmem:[#allocation24_spill] sm:$0xff]  ;;  %v9025_v58 = vld [vmem:[#allocation57_spill] sm:$0xff] }
 0x264   : > { %v2997_v4 = vadd.f32 %v3867_v32, %v8174_v35  ;;  %v2416_v43 = vpack.c.bf16 %v8288_v61, %v8253_v47  ;;  %v2418_v51 = vpack.c.bf16 %v8300_v48, %v8260_v62  ;;  %v3873_v22 = vadd.f32 %v9018_v20, %v9017_v5  ;;  %v9022_v18 = vld [vmem:[#allocation32_spill] sm:$0xff]  ;;  %v9023_v32 = vld [vmem:[#allocation33_spill] sm:$0xff]  ;;  %v9026_v19 = vld [vmem:[#allocation22_spill] sm:$0xff] }
 0x265   : > { %v3000_v26 = vadd.f32 %v3870_v50, %v8174_v35  ;;  %v3985_v49 = vadd.f32 %v9020_v42, %v9019_v27  ;;  %v3876_v60 = vadd.f32 %v9022_v18, %v9021_v31  ;;  %v9024_v33 = vld [vmem:[#allocation56_spill] sm:$0xff]  ;;  %v3879_v5 = vadd.f32 %v9026_v19, %v9025_v58  ;;  %v9027_v20 = vld [vmem:[#allocation58_spill] sm:$0xff]  ;;  %v9028_v27 = vld [vmem:[#allocation59_spill] sm:$0xff] }
 0x266   : > { %v8330_v36 = vadd.f32 %v3979_v7, %v2997_v4  ;;  %v3988_v10 = vadd.f32 %v9024_v33, %v9023_v32  ;;  %v3005_v57 = vadd.f32 %v3873_v22, %v8174_v35  ;;  %v3991_v42 = vadd.f32 %v9028_v27, %v9027_v20  ;;  %v9029_v31 = vld [vmem:[#allocation35_spill] sm:$0xff]  ;;  %v9030_v18 = vld [vmem:[#allocation26_spill] sm:$0xff]  ;;  %v9032_v32 = vld [vmem:[#allocation45_spill] sm:$0xff]  ;;  %v3901_v7 = vpop.f32.mrb[164].mxu0 }
 0x267   : > { %v8338_v15 = vadd.f32 %v3982_v56, %v3000_v26  ;;  %v3008_v4 = vadd.f32 %v3876_v60, %v8174_v35  ;;  %v3882_v56 = vadd.f32 %v9030_v18, %v9029_v31  ;;  %v9031_v22 = vld [vmem:[#allocation23_spill] sm:$0xff]  ;;  %v3885_v50 = vadd.f32 %v8090_v16, %v8082_v39  ;;  %v3902_v27 = vpop.f32.mrb[165].mxu0  ;;  %v9034_v16 = vld [vmem:[#allocation48_spill] sm:$0xff] }
 0x268   : > { %v8352_v26 = vadd.f32 %v3985_v49, %v3005_v57  ;;  %v3994_v33 = vadd.f32 %v9032_v32, %v9031_v22  ;;  %v3997_v60 = vadd.f32 %v8113_v23, %v8100_v24  ;;  %v3013_v19 = vadd.f32 %v3879_v5, %v8174_v35  ;;  %v9033_v49 = vld [vmem:[#allocation46_spill] sm:$0xff]  ;;  %v9035_v24 = vld [vmem:[#allocation49_spill] sm:$0xff]  ;;  %v9036_v18 = vld [vmem:[#allocation60_spill] sm:$0xff] }
 0x269   : > { %3397 = vmatmul.mubr.bf16.gmra.mrb[244].mxu0 %v2399_v8  ;;  %v8360_v58 = vadd.f32 %v3988_v10, %v3008_v4  ;;  %v3016_v20 = vadd.f32 %v3882_v56, %v8174_v35  ;;  %v3888_v57 = vadd.f32 %v9033_v49, %v8102_v28  ;;  %v3021_v31 = vadd.f32 %v3885_v50, %v8174_v35  ;;  %v4013_v8 = vpop.f32.mrb[164].mxu1  ;;  %v3904_v10 = vpop.f32.mrb[166].mxu0  ;;  %v9039_v32 = vld [vmem:[#allocation4_spill] sm:$0xff] }
 0x26a   : > { %3558 = vmatmul.mubr.bf16.gmra.mrb[244].mxu1 %v2401_v30  ;;  %3404 = vmatprep.mubr.bf16.mxu0 %v2408_v46  ;;  %v4000_v39 = vadd.f32 %v8135_v53, %v8125_v1  ;;  %v3891_v23 = vadd.f32 %v9035_v24, %v9034_v16  ;;  %v8371_v4 = vadd.f32 %v3991_v42, %v3013_v19  ;;  %v9037_v30 = vld [vmem:[#allocation7_spill] sm:$0xff]  ;;  %v4014_v56 = vpop.f32.mrb[165].mxu1  ;;  %v3905_v50 = vpop.f32.mrb[167].mxu0  ;;  %v9038_v1 = vld [vmem:[#allocation2_spill] sm:$0xff] }
 0x26b   : > { %3565 = vmatprep.mubr.bf16.mxu1 %v2410_v63  ;;  %v8373_v5 = vadd.f32 %v3994_v33, %v3016_v20  ;;  %v3024_v28 = vadd.f32 %v3888_v57, %v8174_v35  ;;  %v4003_v46 = vadd.f32 %v9037_v30, %v9036_v18  ;;  %v8378_v22 = vadd.f32 %v3997_v60, %v3021_v31  ;;  %v9040_v16 = vld [vmem:[#allocation27_spill] sm:$0xff]  ;;  %v4016_v42 = vpop.f32.mrb[166].mxu1 }
 0x26c   : > { %v3029_v53 = vadd.f32 %v3891_v23, %v8174_v35  ;;  %v3894_v49 = vadd.f32 %v9039_v32, %v9038_v1  ;;  %v4006_v63 = vadd.f32 %v8226_v3, %v9040_v16  ;;  %v3897_v19 = vadd.f32 %v8275_v54, %v8266_v12  ;;  %v4017_v57 = vpop.f32.mrb[167].mxu1 }
 0x26d   : > { %v8385_v33 = vadd.f32 %v4000_v39, %v3024_v28  ;;  %v4009_v20 = vadd.f32 %v8295_v21, %v8283_v14  ;;  %v3900_v60 = vadd.f32 %v8297_v25, %v8285_v38  ;;  %v4012_v23 = vadd.f32 %v4011_v2, %v8308_v44 }
 0x26e   : > { %v8393_v31 = vadd.f32 %v4003_v46, %v3029_v53  ;;  %v3032_v24 = vadd.f32 %v3894_v49, %v8174_v35  ;;  %v3903_v3 = vadd.f32 %v3902_v27, %v3901_v7  ;;  %v3037_v39 = vadd.f32 %v3897_v19, %v8174_v35 }
 0x26f   : > { %v3040_v28 = vadd.f32 %v3900_v60, %v8174_v35  ;;  %v4015_v18 = vadd.f32 %v4014_v56, %v4013_v8  ;;  %v3906_v12 = vadd.f32 %v3905_v50, %v3904_v10  ;;  %v4018_v21 = vadd.f32 %v4017_v57, %v4016_v42 }
 0x270   : > { %v8399_v54 = vadd.f32 %v4006_v63, %v3032_v24  ;;  %v3045_v14 = vadd.f32 %v3903_v3, %v8174_v35  ;;  %v8405_v38 = vadd.f32 %v4009_v20, %v3037_v39  ;;  %v3907_v37 = vpop.f32.mrb[168].mxu0  ;;  %v9041_v30 = vpack.c.bf16 %v8269_v17, %v8240_v6 }
 0x271   : > { %3405 = vmatmul.mubr.bf16.gmra.mrb[248].mxu0 %v2407_v52  ;;  %v8407_v25 = vadd.f32 %v4012_v23, %v3040_v28  ;;  %v3048_v44 = vadd.f32 %v3906_v12, %v8174_v35  ;;  %v3908_v52 = vpop.f32.mrb[169].mxu0  ;;  %v4019_v7 = vpop.f32.mrb[168].mxu1  ;;  %v9042_v46 = vpack.c.bf16 %v8278_v40, %v8246_v41 }
 0x272   : > { %3566 = vmatmul.mubr.bf16.gmra.mrb[248].mxu1 %v2409_v55  ;;  %3412 = vmatprep.mubr.bf16.mxu0 %v2416_v43  ;;  %v8416_v2 = vadd.f32 %v4015_v18, %v3045_v14  ;;  %v3909_v27 = vadd.f32 %v3908_v52, %v3907_v37  ;;  %v3910_v8 = vpop.f32.mrb[170].mxu0  ;;  %v4020_v10 = vpop.f32.mrb[169].mxu1 }
 0x273   : > { %3573 = vmatprep.mubr.bf16.mxu1 %v2418_v51  ;;  %v8421_v59 = vadd.f32 %v4018_v21, %v3048_v44  ;;  %v3911_v45 = vpop.f32.mrb[171].mxu0  ;;  %v4021_v55 = vadd.f32 %v4020_v10, %v4019_v7  ;;  %v4022_v47 = vpop.f32.mrb[170].mxu1 }
 0x274   : > { %v3053_v0 = vadd.f32 %v3909_v27, %v8174_v35  ;;  %v3912_v61 = vadd.f32 %v3911_v45, %v3910_v8  ;;  %v4023_v43 = vpop.f32.mrb[171].mxu1 }
 0x275   : > { %v4024_v51 = vadd.f32 %v4023_v43, %v4022_v47 }
 0x276   : > { %v8427_v62 = vadd.f32 %v4021_v55, %v3053_v0  ;;  %v3056_v48 = vadd.f32 %v3912_v61, %v8174_v35 }
 0x278   : > { %v8433_v56 = vadd.f32 %v4024_v51, %v3056_v48 }
 0x279   : > { %3413 = vmatmul.mubr.bf16.gmra.mrb[252].mxu0 %v9041_v30 }
 0x27a   : > { %3574 = vmatmul.mubr.bf16.gmra.mrb[252].mxu1 %v9042_v46 }
 0x27c   : > { %v3913_v50 = vpop.f32.mrb[172].mxu0 }
 0x27d   : > { %v3914_v53 = vpop.f32.mrb[173].mxu0 }
 0x27e   : > { %v4025_v1 = vpop.f32.mrb[172].mxu1  ;;  %v3915_v32 = vadd.f32 %v3914_v53, %v3913_v50  ;;  %v3916_v49 = vpop.f32.mrb[174].mxu0 }
 0x27f   : > { %v4026_v16 = vpop.f32.mrb[173].mxu1  ;;  %v3917_v63 = vpop.f32.mrb[175].mxu0 }
 0x280   : > { %v3061_v6 = vadd.f32 %v3915_v32, %v8174_v35  ;;  %v4027_v17 = vadd.f32 %v4026_v16, %v4025_v1  ;;  %v4028_v42 = vpop.f32.mrb[174].mxu1  ;;  %v3918_v19 = vadd.f32 %v3917_v63, %v3916_v49 }
 0x281   : > { %v4029_v20 = vpop.f32.mrb[175].mxu1 }
 0x282   : > { %v8436_v60 = vadd.f32 %v4027_v17, %v3061_v6  ;;  %v3064_v41 = vadd.f32 %v3918_v19, %v8174_v35  ;;  %v4030_v40 = vadd.f32 %v4029_v20, %v4028_v42 }
 0x284   : > { %v8439_v57 = vadd.f32 %v4030_v40, %v3064_v41 }
 0x286   : > { %v3919_v24 = vpop.f32.mrb[176].mxu0 }
 0x287   : > { %v3920_v23 = vpop.f32.mrb[177].mxu0  ;;  %v4031_v3 = vpop.f32.mrb[176].mxu1 }
 0x288   : > { %v3921_v39 = vadd.f32 %v3920_v23, %v3919_v24  ;;  %v3922_v28 = vpop.f32.mrb[178].mxu0  ;;  %v4032_v18 = vpop.f32.mrb[177].mxu1 }
 0x289   : > { %v3923_v12 = vpop.f32.mrb[179].mxu0  ;;  %v4033_v21 = vadd.f32 %v4032_v18, %v4031_v3  ;;  %v4034_v44 = vpop.f32.mrb[178].mxu1 }
 0x28a   : > { %v3069_v14 = vadd.f32 %v3921_v39, %v8174_v35  ;;  %v3924_v37 = vadd.f32 %v3923_v12, %v3922_v28  ;;  %v4035_v52 = vpop.f32.mrb[179].mxu1 }
 0x28b   : > { %v4036_v8 = vadd.f32 %v4035_v52, %v4034_v44 }
 0x28c   : > { %v8442_v7 = vadd.f32 %v4033_v21, %v3069_v14  ;;  %v3072_v27 = vadd.f32 %v3924_v37, %v8174_v35 }
 0x28e   : > { %v8445_v10 = vadd.f32 %v4036_v8, %v3072_v27 }
 0x293   : > { %v3925_v45 = vpop.f32.mrb[180].mxu0 }
 0x294   : > { %v3926_v0 = vpop.f32.mrb[181].mxu0 }
 0x295   : > { %v4037_v55 = vpop.f32.mrb[180].mxu1  ;;  %v3927_v47 = vadd.f32 %v3926_v0, %v3925_v45  ;;  %v3928_v61 = vpop.f32.mrb[182].mxu0 }
 0x296   : > { %v4038_v43 = vpop.f32.mrb[181].mxu1  ;;  %v3929_v30 = vpop.f32.mrb[183].mxu0 }
 0x297   : > { %v3077_v48 = vadd.f32 %v3927_v47, %v8174_v35  ;;  %v4039_v51 = vadd.f32 %v4038_v43, %v4037_v55  ;;  %v4040_v46 = vpop.f32.mrb[182].mxu1  ;;  %v3930_v50 = vadd.f32 %v3929_v30, %v3928_v61 }
 0x298   : > { %v4041_v53 = vpop.f32.mrb[183].mxu1 }
 0x299   : > { %v8448_v1 = vadd.f32 %v4039_v51, %v3077_v48  ;;  %v3080_v32 = vadd.f32 %v3930_v50, %v8174_v35  ;;  %v4042_v49 = vadd.f32 %v4041_v53, %v4040_v46 }
 0x29b   : > { %v8451_v16 = vadd.f32 %v4042_v49, %v3080_v32 }
 0x29f   : > { %v3931_v63 = vpop.f32.mrb[184].mxu0 }
 0x2a0   : > { %v3932_v6 = vpop.f32.mrb[185].mxu0 }
 0x2a1   : > { %v4043_v17 = vpop.f32.mrb[184].mxu1  ;;  %v3933_v42 = vadd.f32 %v3932_v6, %v3931_v63  ;;  %v3934_v19 = vpop.f32.mrb[186].mxu0 }
 0x2a2   : > { %v4044_v20 = vpop.f32.mrb[185].mxu1  ;;  %v3935_v41 = vpop.f32.mrb[187].mxu0 }
 0x2a3   : > { %v3085_v40 = vadd.f32 %v3933_v42, %v8174_v35  ;;  %v4045_v24 = vadd.f32 %v4044_v20, %v4043_v17  ;;  %v4046_v23 = vpop.f32.mrb[186].mxu1  ;;  %v3936_v3 = vadd.f32 %v3935_v41, %v3934_v19  ;;  %v9043_v20 = vld [vmem:[#allocation61_spill] sm:$0xff] }
 0x2a4   : > { %v4047_v39 = vpop.f32.mrb[187].mxu1 }
 0x2a5   : > { %v8454_v28 = vadd.f32 %v4045_v24, %v3085_v40  ;;  %v3088_v18 = vadd.f32 %v3936_v3, %v8174_v35  ;;  %v4048_v12 = vadd.f32 %v4047_v39, %v4046_v23 }
 0x2a7   : > { %v8457_v14 = vadd.f32 %v4048_v12, %v3088_v18 }
 0x2a9   : > { %v3937_v21 = vpop.f32.mrb[188].mxu0 }
 0x2aa   : > { %v4049_v44 = vpop.f32.mrb[188].mxu1  ;;  %v3938_v37 = vpop.f32.mrb[189].mxu0 }
 0x2ab   : > { %v3939_v52 = vadd.f32 %v3938_v37, %v3937_v21  ;;  %v4050_v27 = vpop.f32.mrb[189].mxu1  ;;  %v3940_v8 = vpop.f32.mrb[190].mxu0 }
 0x2ac   : > { %v4051_v45 = vadd.f32 %v4050_v27, %v4049_v44  ;;  %v4052_v0 = vpop.f32.mrb[190].mxu1  ;;  %v3941_v55 = vpop.f32.mrb[191].mxu0 }
 0x2ad   : > { %v3093_v47 = vadd.f32 %v3939_v52, %v8174_v35  ;;  %v3942_v61 = vadd.f32 %v3941_v55, %v3940_v8  ;;  %v4053_v43 = vpop.f32.mrb[191].mxu1 }
 0x2ae   : > { %v4054_v30 = vadd.f32 %v4053_v43, %v4052_v0 }
 0x2af   : > { %v8460_v48 = vadd.f32 %v4051_v45, %v3093_v47  ;;  %v3096_v51 = vadd.f32 %v3942_v61, %v8174_v35 }
 0x2b1   : > { %v8463_v46 = vadd.f32 %v4054_v30, %v3096_v51 }
 0x2b3   : > { %v4071_v50 = vpop.f32.mrb[192].mxu0 }
 0x2b4   : > { %v4183_v53 = vpop.f32.mrb[192].mxu1  ;;  %v4072_v32 = vpop.f32.mrb[193].mxu0 }
 0x2b5   : > { %v4073_v49 = vadd.f32 %v4072_v32, %v4071_v50  ;;  %v4184_v63 = vpop.f32.mrb[193].mxu1  ;;  %v4074_v6 = vpop.f32.mrb[194].mxu0 }
 0x2b6   : > { %v4185_v17 = vadd.f32 %v4184_v63, %v4183_v53  ;;  %v4186_v42 = vpop.f32.mrb[194].mxu1  ;;  %v4075_v19 = vpop.f32.mrb[195].mxu0 }
 0x2b7   : > { %v3295_v41 = vadd.f32 %v4073_v49, %v9043_v20  ;;  %v4076_v40 = vadd.f32 %v4075_v19, %v4074_v6  ;;  %v4187_v24 = vpop.f32.mrb[195].mxu1 }
 0x2b8   : > { %v4188_v35 = vadd.f32 %v4187_v24, %v4186_v42 }
 0x2b9   : > { %v3456_v23 = vadd.f32 %v4185_v17, %v3295_v41  ;;  %v3298_v3 = vadd.f32 %v4076_v40, %v8234_v29 }
 0x2bb   : > { %3583 = vst.msk [vmem:[%s8470_s26] sm:$0xff] %vm3582_vm2, %v3456_v23  ;;  %v3459_v39 = vadd.f32 %v4188_v35, %v3298_v3 }
 0x2bd   : > { %3584 = vst.msk [vmem:[%s8470_s26 + $0x8] sm:$0xff] %vm3582_vm2, %v3459_v39 }
 0x2c0   : > { %v4077_v18 = vpop.f32.mrb[196].mxu0 }
 0x2c1   : > { %v4189_v12 = vpop.f32.mrb[196].mxu1  ;;  %v4078_v21 = vpop.f32.mrb[197].mxu0 }
 0x2c2   : > { %v4079_v44 = vadd.f32 %v4078_v21, %v4077_v18  ;;  %v4190_v37 = vpop.f32.mrb[197].mxu1  ;;  %v4080_v52 = vpop.f32.mrb[198].mxu0 }
 0x2c3   : > { %v4191_v27 = vadd.f32 %v4190_v37, %v4189_v12  ;;  %v4192_v8 = vpop.f32.mrb[198].mxu1  ;;  %v4081_v45 = vpop.f32.mrb[199].mxu0 }
 0x2c4   : > { %v3303_v0 = vadd.f32 %v4079_v44, %v8248_v13  ;;  %v4082_v55 = vadd.f32 %v4081_v45, %v4080_v52  ;;  %v4193_v29 = vpop.f32.mrb[199].mxu1 }
 0x2c5   : > { %v4194_v47 = vadd.f32 %v4193_v29, %v4192_v8 }
 0x2c6   : > { %v3464_v61 = vadd.f32 %v4191_v27, %v3303_v0  ;;  %v3306_v43 = vadd.f32 %v4082_v55, %v8255_v11 }
 0x2c8   : > { %3585 = vst.msk [vmem:[%s8470_s26 + $0x10] sm:$0xff] %vm3582_vm2, %v3464_v61  ;;  %v3467_v30 = vadd.f32 %v4194_v47, %v3306_v43 }
 0x2ca   : > { %3586 = vst.msk [vmem:[%s8470_s26 + $0x18] sm:$0xff] %vm3582_vm2, %v3467_v30 }
 0x2cc   : > { %v4083_v51 = vpop.f32.mrb[200].mxu0 }
 0x2cd   : > { %v4084_v53 = vpop.f32.mrb[201].mxu0 }
 0x2ce   : > { %v4195_v50 = vpop.f32.mrb[200].mxu1  ;;  %v4085_v32 = vadd.f32 %v4084_v53, %v4083_v51  ;;  %v4086_v63 = vpop.f32.mrb[202].mxu0 }
 0x2cf   : > { %v4196_v49 = vpop.f32.mrb[201].mxu1  ;;  %v4087_v17 = vpop.f32.mrb[203].mxu0 }
 0x2d0   : > { %v4197_v13 = vadd.f32 %v4196_v49, %v4195_v50  ;;  %v4198_v6 = vpop.f32.mrb[202].mxu1  ;;  %v3311_v42 = vadd.f32 %v4085_v32, %v8302_v9  ;;  %v4088_v19 = vadd.f32 %v4087_v17, %v4086_v63 }
 0x2d1   : > { %v4199_v11 = vpop.f32.mrb[203].mxu1 }
 0x2d2   : > { %v4200_v20 = vadd.f32 %v4199_v11, %v4198_v6  ;;  %v3472_v41 = vadd.f32 %v4197_v13, %v3311_v42  ;;  %v3314_v40 = vadd.f32 %v4088_v19, %v8310_v34 }
 0x2d4   : > { %3587 = vst.msk [vmem:[%s8470_s26 + $0x20] sm:$0xff] %vm3582_vm2, %v3472_v41  ;;  %v3475_v24 = vadd.f32 %v4200_v20, %v3314_v40 }
 0x2d6   : > { %v4089_v35 = vpop.f32.mrb[204].mxu0  ;;  %3588 = vst.msk [vmem:[%s8470_s26 + $0x28] sm:$0xff] %vm3582_vm2, %v3475_v24  ;;  %v4201_v3 = vpop.f32.mrb[204].mxu1 }
 0x2d7   : > { %v4090_v23 = vpop.f32.mrb[205].mxu0  ;;  %v4202_v12 = vpop.f32.mrb[205].mxu1 }
 0x2d8   : > { %v4091_v39 = vadd.f32 %v4090_v23, %v4089_v35  ;;  %v4092_v18 = vpop.f32.mrb[206].mxu0  ;;  %v4203_v44 = vadd.f32 %v4202_v12, %v4201_v3  ;;  %v4204_v37 = vpop.f32.mrb[206].mxu1 }
 0x2d9   : > { %v4093_v9 = vpop.f32.mrb[207].mxu0  ;;  %v4205_v34 = vpop.f32.mrb[207].mxu1 }
 0x2da   : > { %v3319_v21 = vadd.f32 %v4091_v39, %v8330_v36  ;;  %v4094_v52 = vadd.f32 %v4093_v9, %v4092_v18  ;;  %v4206_v45 = vadd.f32 %v4205_v34, %v4204_v37 }
 0x2dc   : > { %v3480_v27 = vadd.f32 %v4203_v44, %v3319_v21  ;;  %v3322_v8 = vadd.f32 %v4094_v52, %v8338_v15 }
 0x2de   : > { %3589 = vst.msk [vmem:[%s8470_s26 + $0x30] sm:$0xff] %vm3582_vm2, %v3480_v27  ;;  %v3483_v0 = vadd.f32 %v4206_v45, %v3322_v8 }
 0x2e0   : > { %3590 = vst.msk [vmem:[%s8470_s26 + $0x38] sm:$0xff] %vm3582_vm2, %v3483_v0 }
 0x2e1   : > { %v4095_v55 = vpop.f32.mrb[208].mxu0 }
 0x2e2   : > { %v4207_v29 = vpop.f32.mrb[208].mxu1  ;;  %v4096_v47 = vpop.f32.mrb[209].mxu0 }
 0x2e3   : > { %v4097_v61 = vadd.f32 %v4096_v47, %v4095_v55  ;;  %v4208_v36 = vpop.f32.mrb[209].mxu1  ;;  %v4098_v43 = vpop.f32.mrb[210].mxu0 }
 0x2e4   : > { %v4209_v30 = vadd.f32 %v4208_v36, %v4207_v29  ;;  %v4210_v51 = vpop.f32.mrb[210].mxu1  ;;  %v4099_v50 = vpop.f32.mrb[211].mxu0 }
 0x2e5   : > { %v3327_v53 = vadd.f32 %v4097_v61, %v8352_v26  ;;  %v4100_v15 = vadd.f32 %v4099_v50, %v4098_v43  ;;  %v4211_v32 = vpop.f32.mrb[211].mxu1 }
 0x2e6   : > { %v4212_v49 = vadd.f32 %v4211_v32, %v4210_v51 }
 0x2e7   : > { %v3488_v63 = vadd.f32 %v4209_v30, %v3327_v53  ;;  %v3330_v13 = vadd.f32 %v4100_v15, %v8360_v58 }
 0x2e9   : > { %3591 = vst.msk [vmem:[%s8470_s26 + $0x40] sm:$0xff] %vm3582_vm2, %v3488_v63  ;;  %v3491_v6 = vadd.f32 %v4212_v49, %v3330_v13 }
 0x2eb   : > { %3592 = vst.msk [vmem:[%s8470_s26 + $0x48] sm:$0xff] %vm3582_vm2, %v3491_v6 }
 0x2ee   : > { %v4101_v17 = vpop.f32.mrb[212].mxu0 }
 0x2ef   : > { %v4213_v42 = vpop.f32.mrb[212].mxu1  ;;  %v4102_v19 = vpop.f32.mrb[213].mxu0 }
 0x2f0   : > { %v4103_v11 = vadd.f32 %v4102_v19, %v4101_v17  ;;  %v4214_v20 = vpop.f32.mrb[213].mxu1  ;;  %v4104_v41 = vpop.f32.mrb[214].mxu0 }
 0x2f1   : > { %v4215_v26 = vadd.f32 %v4214_v20, %v4213_v42  ;;  %v4216_v40 = vpop.f32.mrb[214].mxu1  ;;  %v4105_v24 = vpop.f32.mrb[215].mxu0 }
 0x2f2   : > { %v3335_v35 = vadd.f32 %v4103_v11, %v8371_v4  ;;  %v4106_v23 = vadd.f32 %v4105_v24, %v4104_v41  ;;  %v4217_v58 = vpop.f32.mrb[215].mxu1 }
 0x2f3   : > { %v4218_v3 = vadd.f32 %v4217_v58, %v4216_v40 }
 0x2f4   : > { %v3496_v39 = vadd.f32 %v4215_v26, %v3335_v35  ;;  %v3338_v18 = vadd.f32 %v4106_v23, %v8373_v5 }
 0x2f6   : > { %3593 = vst.msk [vmem:[%s8470_s26 + $0x50] sm:$0xff] %vm3582_vm2, %v3496_v39  ;;  %v3499_v12 = vadd.f32 %v4218_v3, %v3338_v18 }
 0x2f8   : > { %3594 = vst.msk [vmem:[%s8470_s26 + $0x58] sm:$0xff] %vm3582_vm2, %v3499_v12 }
 0x2fa   : > { %v4107_v9 = vpop.f32.mrb[216].mxu0 }
 0x2fb   : > { %v4108_v21 = vpop.f32.mrb[217].mxu0 }
 0x2fc   : > { %v4219_v44 = vpop.f32.mrb[216].mxu1  ;;  %v4109_v37 = vadd.f32 %v4108_v21, %v4107_v9  ;;  %v4110_v52 = vpop.f32.mrb[218].mxu0 }
 0x2fd   : > { %v4220_v34 = vpop.f32.mrb[217].mxu1  ;;  %v4111_v4 = vpop.f32.mrb[219].mxu0 }
 0x2fe   : > { %v3343_v27 = vadd.f32 %v4109_v37, %v8378_v22  ;;  %v4221_v8 = vadd.f32 %v4220_v34, %v4219_v44  ;;  %v4222_v45 = vpop.f32.mrb[218].mxu1  ;;  %v4112_v0 = vadd.f32 %v4111_v4, %v4110_v52 }
 0x2ff   : > { %v4223_v5 = vpop.f32.mrb[219].mxu1 }
 0x300   : > { %v3504_v55 = vadd.f32 %v4221_v8, %v3343_v27  ;;  %v3346_v29 = vadd.f32 %v4112_v0, %v8385_v33  ;;  %v4224_v47 = vadd.f32 %v4223_v5, %v4222_v45 }
 0x302   : > { %3595 = vst.msk [vmem:[%s8470_s26 + $0x60] sm:$0xff] %vm3582_vm2, %v3504_v55  ;;  %v3507_v61 = vadd.f32 %v4224_v47, %v3346_v29 }
 0x303   : > { %v4113_v36 = vpop.f32.mrb[220].mxu0 }
 0x304   : > { %3596 = vst.msk [vmem:[%s8470_s26 + $0x68] sm:$0xff] %vm3582_vm2, %v3507_v61  ;;  %v4225_v43 = vpop.f32.mrb[220].mxu1  ;;  %v4114_v30 = vpop.f32.mrb[221].mxu0 }
 0x305   : > { %v4115_v51 = vadd.f32 %v4114_v30, %v4113_v36  ;;  %v4226_v22 = vpop.f32.mrb[221].mxu1  ;;  %v4116_v50 = vpop.f32.mrb[222].mxu0 }
 0x306   : > { %v4227_v53 = vadd.f32 %v4226_v22, %v4225_v43  ;;  %v4228_v15 = vpop.f32.mrb[222].mxu1  ;;  %v4117_v32 = vpop.f32.mrb[223].mxu0 }
 0x307   : > { %v3351_v49 = vadd.f32 %v4115_v51, %v8393_v31  ;;  %v4118_v33 = vadd.f32 %v4117_v32, %v4116_v50  ;;  %v4229_v63 = vpop.f32.mrb[223].mxu1 }
 0x308   : > { %v4230_v13 = vadd.f32 %v4229_v63, %v4228_v15 }
 0x309   : > { %v3512_v6 = vadd.f32 %v4227_v53, %v3351_v49  ;;  %v3354_v17 = vadd.f32 %v4118_v33, %v8399_v54 }
 0x30b   : > { %3597 = vst.msk [vmem:[%s8470_s26 + $0x70] sm:$0xff] %vm3582_vm2, %v3512_v6  ;;  %v3515_v42 = vadd.f32 %v4230_v13, %v3354_v17 }
 0x30d   : > { %3598 = vst.msk [vmem:[%s8470_s26 + $0x78] sm:$0xff] %vm3582_vm2, %v3515_v42  ;;  %v4119_v19 = vpop.f32.mrb[224].mxu0 }
 0x30e   : > { %v4120_v11 = vpop.f32.mrb[225].mxu0 }
 0x30f   : > { %v4231_v20 = vpop.f32.mrb[224].mxu1  ;;  %v4121_v41 = vadd.f32 %v4120_v11, %v4119_v19  ;;  %v4122_v26 = vpop.f32.mrb[226].mxu0 }
 0x310   : > { %v4232_v40 = vpop.f32.mrb[225].mxu1  ;;  %v4123_v31 = vpop.f32.mrb[227].mxu0 }
 0x311   : > { %v3359_v24 = vadd.f32 %v4121_v41, %v8405_v38  ;;  %v4233_v35 = vadd.f32 %v4232_v40, %v4231_v20  ;;  %v4234_v23 = vpop.f32.mrb[226].mxu1  ;;  %v4124_v58 = vadd.f32 %v4123_v31, %v4122_v26 }
 0x312   : > { %v4235_v54 = vpop.f32.mrb[227].mxu1 }
 0x313   : > { %v3520_v3 = vadd.f32 %v4233_v35, %v3359_v24  ;;  %v3362_v39 = vadd.f32 %v4124_v58, %v8407_v25  ;;  %v4236_v18 = vadd.f32 %v4235_v54, %v4234_v23 }
 0x315   : > { %3599 = vst.msk [vmem:[%s8470_s26 + $0x80] sm:$0xff] %vm3582_vm2, %v3520_v3  ;;  %v3523_v12 = vadd.f32 %v4236_v18, %v3362_v39 }
 0x317   : > { %3600 = vst.msk [vmem:[%s8470_s26 + $0x88] sm:$0xff] %vm3582_vm2, %v3523_v12 }
 0x319   : > { %v4125_v9 = vpop.f32.mrb[228].mxu0 }
 0x31a   : > { %v4126_v44 = vpop.f32.mrb[229].mxu0 }
 0x31b   : > { %v4237_v21 = vpop.f32.mrb[228].mxu1  ;;  %v4127_v37 = vadd.f32 %v4126_v44, %v4125_v9  ;;  %v4128_v52 = vpop.f32.mrb[230].mxu0 }
 0x31c   : > { %v4238_v38 = vpop.f32.mrb[229].mxu1  ;;  %v4129_v27 = vpop.f32.mrb[231].mxu0 }
 0x31d   : > { %v4239_v34 = vadd.f32 %v4238_v38, %v4237_v21  ;;  %v4240_v4 = vpop.f32.mrb[230].mxu1  ;;  %v3367_v8 = vadd.f32 %v4127_v37, %v8416_v2  ;;  %v4130_v25 = vadd.f32 %v4129_v27, %v4128_v52 }
 0x31e   : > { %v4241_v45 = vpop.f32.mrb[231].mxu1 }
 0x31f   : > { %v4242_v0 = vadd.f32 %v4241_v45, %v4240_v4  ;;  %v3528_v5 = vadd.f32 %v4239_v34, %v3367_v8  ;;  %v3370_v55 = vadd.f32 %v4130_v25, %v8421_v59 }
 0x321   : > { %3601 = vst.msk [vmem:[%s8470_s26 + $0x90] sm:$0xff] %vm3582_vm2, %v3528_v5  ;;  %v3531_v29 = vadd.f32 %v4242_v0, %v3370_v55 }
 0x323   : > { %3602 = vst.msk [vmem:[%s8470_s26 + $0x98] sm:$0xff] %vm3582_vm2, %v3531_v29 }
 0x324   : > { %v4131_v47 = vpop.f32.mrb[232].mxu0 }
 0x325   : > { %v4243_v61 = vpop.f32.mrb[232].mxu1  ;;  %v4132_v36 = vpop.f32.mrb[233].mxu0 }
 0x326   : > { %v4133_v43 = vadd.f32 %v4132_v36, %v4131_v47  ;;  %v4244_v30 = vpop.f32.mrb[233].mxu1  ;;  %v4134_v51 = vpop.f32.mrb[234].mxu0 }
 0x327   : > { %v4245_v2 = vadd.f32 %v4244_v30, %v4243_v61  ;;  %v4246_v22 = vpop.f32.mrb[234].mxu1  ;;  %v4135_v50 = vpop.f32.mrb[235].mxu0 }
 0x328   : > { %v3375_v53 = vadd.f32 %v4133_v43, %v8427_v62  ;;  %v4136_v15 = vadd.f32 %v4135_v50, %v4134_v51  ;;  %v4247_v59 = vpop.f32.mrb[235].mxu1 }
 0x329   : > { %v4248_v32 = vadd.f32 %v4247_v59, %v4246_v22 }
 0x32a   : > { %v3536_v49 = vadd.f32 %v4245_v2, %v3375_v53  ;;  %v3378_v33 = vadd.f32 %v4136_v15, %v8433_v56 }
 0x32c   : > { %3603 = vst.msk [vmem:[%s8470_s26 + $0xa0] sm:$0xff] %vm3582_vm2, %v3536_v49  ;;  %v3539_v63 = vadd.f32 %v4248_v32, %v3378_v33  ;;  %v4137_v13 = vpop.f32.mrb[236].mxu0 }
 0x32d   : > { %v4249_v6 = vpop.f32.mrb[236].mxu1  ;;  %v4138_v17 = vpop.f32.mrb[237].mxu0 }
 0x32e   : > { %3604 = vst.msk [vmem:[%s8470_s26 + $0xa8] sm:$0xff] %vm3582_vm2, %v3539_v63  ;;  %v4139_v42 = vadd.f32 %v4138_v17, %v4137_v13  ;;  %v4250_v19 = vpop.f32.mrb[237].mxu1  ;;  %v4140_v11 = vpop.f32.mrb[238].mxu0 }
 0x32f   : > { %v4251_v62 = vadd.f32 %v4250_v19, %v4249_v6  ;;  %v4252_v20 = vpop.f32.mrb[238].mxu1  ;;  %v4141_v41 = vpop.f32.mrb[239].mxu0 }
 0x330   : > { %v3383_v26 = vadd.f32 %v4139_v42, %v8436_v60  ;;  %v4142_v40 = vadd.f32 %v4141_v41, %v4140_v11  ;;  %v4253_v56 = vpop.f32.mrb[239].mxu1 }
 0x331   : > { %v4254_v31 = vadd.f32 %v4253_v56, %v4252_v20 }
 0x332   : > { %v3544_v24 = vadd.f32 %v4251_v62, %v3383_v26  ;;  %v3386_v35 = vadd.f32 %v4142_v40, %v8439_v57 }
 0x334   : > { %3605 = vst.msk [vmem:[%s8470_s26 + $0xb0] sm:$0xff] %vm3582_vm2, %v3544_v24  ;;  %v3547_v23 = vadd.f32 %v4254_v31, %v3386_v35  ;;  %v4143_v58 = vpop.f32.mrb[240].mxu0 }
 0x335   : > { %v4255_v54 = vpop.f32.mrb[240].mxu1  ;;  %v4144_v3 = vpop.f32.mrb[241].mxu0 }
 0x336   : > { %3606 = vst.msk [vmem:[%s8470_s26 + $0xb8] sm:$0xff] %vm3582_vm2, %v3547_v23  ;;  %v4145_v39 = vadd.f32 %v4144_v3, %v4143_v58  ;;  %v4256_v18 = vpop.f32.mrb[241].mxu1  ;;  %v4146_v12 = vpop.f32.mrb[242].mxu0 }
 0x337   : > { %v4257_v60 = vadd.f32 %v4256_v18, %v4255_v54  ;;  %v4258_v9 = vpop.f32.mrb[242].mxu1  ;;  %v4147_v21 = vpop.f32.mrb[243].mxu0 }
 0x338   : > { %v3391_v44 = vadd.f32 %v4145_v39, %v8442_v7  ;;  %v4148_v37 = vadd.f32 %v4147_v21, %v4146_v12  ;;  %v4259_v57 = vpop.f32.mrb[243].mxu1 }
 0x339   : > { %v4260_v38 = vadd.f32 %v4259_v57, %v4258_v9 }
 0x33a   : > { %v3552_v52 = vadd.f32 %v4257_v60, %v3391_v44  ;;  %v3394_v34 = vadd.f32 %v4148_v37, %v8445_v10 }
 0x33c   : > { %3607 = vst.msk [vmem:[%s8470_s26 + $0xc0] sm:$0xff] %vm3582_vm2, %v3552_v52  ;;  %v3555_v4 = vadd.f32 %v4260_v38, %v3394_v34  ;;  %v4149_v27 = vpop.f32.mrb[244].mxu0 }
 0x33d   : > { %v4261_v8 = vpop.f32.mrb[244].mxu1  ;;  %v4150_v25 = vpop.f32.mrb[245].mxu0 }
 0x33e   : > { %3608 = vst.msk [vmem:[%s8470_s26 + $0xc8] sm:$0xff] %vm3582_vm2, %v3555_v4  ;;  %v4151_v45 = vadd.f32 %v4150_v25, %v4149_v27  ;;  %v4262_v0 = vpop.f32.mrb[245].mxu1  ;;  %v4152_v5 = vpop.f32.mrb[246].mxu0 }
 0x33f   : > { %v4263_v7 = vadd.f32 %v4262_v0, %v4261_v8  ;;  %v4264_v55 = vpop.f32.mrb[246].mxu1  ;;  %v4153_v29 = vpop.f32.mrb[247].mxu0 }
 0x340   : > { %v3399_v47 = vadd.f32 %v4151_v45, %v8448_v1  ;;  %v4154_v61 = vadd.f32 %v4153_v29, %v4152_v5  ;;  %v4265_v10 = vpop.f32.mrb[247].mxu1 }
 0x341   : > { %v4266_v36 = vadd.f32 %v4265_v10, %v4264_v55 }
 0x342   : > { %v3560_v43 = vadd.f32 %v4263_v7, %v3399_v47  ;;  %v3402_v30 = vadd.f32 %v4154_v61, %v8451_v16 }
 0x344   : > { %3609 = vst.msk [vmem:[%s8470_s26 + $0xd0] sm:$0xff] %vm3582_vm2, %v3560_v43  ;;  %v3563_v51 = vadd.f32 %v4266_v36, %v3402_v30  ;;  %v4155_v2 = vpop.f32.mrb[248].mxu0 }
 0x345   : > { %v4267_v22 = vpop.f32.mrb[248].mxu1  ;;  %v4156_v50 = vpop.f32.mrb[249].mxu0 }
 0x346   : > { %3610 = vst.msk [vmem:[%s8470_s26 + $0xd8] sm:$0xff] %vm3582_vm2, %v3563_v51  ;;  %v4157_v53 = vadd.f32 %v4156_v50, %v4155_v2  ;;  %v4268_v15 = vpop.f32.mrb[249].mxu1  ;;  %v4158_v59 = vpop.f32.mrb[250].mxu0 }
 0x347   : > { %v4269_v1 = vadd.f32 %v4268_v15, %v4267_v22  ;;  %v4270_v32 = vpop.f32.mrb[250].mxu1  ;;  %v4159_v49 = vpop.f32.mrb[251].mxu0 }
 0x348   : > { %v3407_v33 = vadd.f32 %v4157_v53, %v8454_v28  ;;  %v4160_v63 = vadd.f32 %v4159_v49, %v4158_v59  ;;  %v4271_v16 = vpop.f32.mrb[251].mxu1 }
 0x349   : > { %v4272_v13 = vadd.f32 %v4271_v16, %v4270_v32 }
 0x34a   : > { %v3568_v6 = vadd.f32 %v4269_v1, %v3407_v33  ;;  %v3410_v17 = vadd.f32 %v4160_v63, %v8457_v14 }
 0x34c   : > { %3611 = vst.msk [vmem:[%s8470_s26 + $0xe0] sm:$0xff] %vm3582_vm2, %v3568_v6  ;;  %v3571_v42 = vadd.f32 %v4272_v13, %v3410_v17  ;;  %v4161_v19 = vpop.f32.mrb[252].mxu0 }
 0x34d   : > { %v4273_v11 = vpop.f32.mrb[252].mxu1  ;;  %v4162_v62 = vpop.f32.mrb[253].mxu0 }
 0x34e   : > { %3612 = vst.msk [vmem:[%s8470_s26 + $0xe8] sm:$0xff] %vm3582_vm2, %v3571_v42  ;;  %v4163_v20 = vadd.f32 %v4162_v62, %v4161_v19  ;;  %v4274_v41 = vpop.f32.mrb[253].mxu1  ;;  %v4164_v26 = vpop.f32.mrb[254].mxu0 }
 0x34f   : > { %v4275_v28 = vadd.f32 %v4274_v41, %v4273_v11  ;;  %v4276_v40 = vpop.f32.mrb[254].mxu1  ;;  %v4165_v56 = vpop.f32.mrb[255].mxu0 }
 0x350   : > { %v3415_v31 = vadd.f32 %v4163_v20, %v8460_v48  ;;  %v4166_v24 = vadd.f32 %v4165_v56, %v4164_v26  ;;  %v4277_v14 = vpop.f32.mrb[255].mxu1 }
 0x351   : > { %v4278_v35 = vadd.f32 %v4277_v14, %v4276_v40 }
 0x352   : > { %v3576_v23 = vadd.f32 %v4275_v28, %v3415_v31  ;;  %v3418_v58 = vadd.f32 %v4166_v24, %v8463_v46 }
 0x354   : > { %3613 = vst.msk [vmem:[%s8470_s26 + $0xf0] sm:$0xff] %vm3582_vm2, %v3576_v23  ;;  %v3579_v54 = vadd.f32 %v4278_v35, %v3418_v58 }
 0x356   : > { %3614 = vst.msk [vmem:[%s8470_s26 + $0xf8] sm:$0xff] %vm3582_vm2, %v3579_v54 }
 0x357 PF: > { %s15_s18 = sadd.s32 1, %s4889_s18  }
 0x358   : > { %p12_p4 = scmp.ge.s32.totalorder %s15_s18, 4  }
 0x35a   :  { %14 = sbr.rel (!%p12_p4) target bundleno = 1 (0x1), region = 70 }

</bundles_post_ra>
